<compile_context>
chip_gen: v7x
topology: tpu7x:2x2x1
jax: 0.10.0
libtpu: 0.0.40
codegen_flags: <defaults>
</compile_context>

<pallas_src>
import numpy as np
import jax
import jax.numpy as jnp
from jax.experimental import pallas as pl
from jax.experimental.pallas import tpu as pltpu  # noqa: F401  (not needed for this single-step kernel)

FRONT_CHANNELS = 32
MIDDLE_CHANNELS = 32
NUM_PATTERNS = 10
NUM_SYMMETRY = 8
INPUT_CHANNELS = 2
MAX_PATTERN = 10
PAD_FEAT = MAX_PATTERN * INPUT_CHANNELS          # per-pattern padded feature width (20)
CONCAT_FEAT = NUM_PATTERNS * PAD_FEAT            # 200
WIDE = NUM_PATTERNS * FRONT_CHANNELS             # 320
BN_EPS = 1e-5


def generate_patterns():
    return [[0, 1, 2, 3, 4, 5, 6, 7, 9, 14],
            [8, 9, 10, 11, 12, 13, 14, 15],
            [16, 17, 18, 19, 20, 21, 22, 23],
            [24, 25, 26, 27, 28, 29, 30, 31],
            [0, 1, 2, 3, 4, 8, 9, 10, 11, 12],
            [0, 1, 2, 3, 8, 9, 10, 16, 17, 24],
            [3, 4, 10, 11, 17, 18, 24, 25, 32],
            [5, 12, 19, 26, 33, 40],
            [6, 13, 20, 27, 34, 41, 48],
            [7, 20, 21, 28, 35, 42, 49, 56]]


# ---------------------------------------------------------------------------
# Shared forward math.  Called with Pallas Refs inside the kernel and with
# plain jnp arrays in the pure-JAX mirror: `a[...]` / `a[i]` behave the same.
# ---------------------------------------------------------------------------
def _forward_math(xc, wf, wm, bm, wl, bl, bw1, bw2, bw3, bb3, bns, bnb):
    f32, bf16 = jnp.float32, jnp.bfloat16

    # Frontend (EmbedPattern for all 10 patterns, block-diagonal): one wide matmul.
    z = jnp.dot(xc[...], wf[...], preferred_element_type=f32)            # (B8, 320) f32

    # 3 residual blocks x 3 grouped 1x1 convs == block-diagonal (320, 320) matmuls.
    b = z
    for j in range(3):
        h = jnp.maximum(b, 0.0)
        for k in range(3):
            layer = 3 * j + k
            h = jnp.dot(h.astype(bf16), wm[layer],
                        preferred_element_type=f32) + bm[layer]          # f32 bias add
            if k < 2:
                h = jnp.maximum(h, 0.0)
        b = b + h

    # Last middle layer, row-stacked (320 -> 32): contraction folds the pattern sum.
    out = jnp.dot(jnp.maximum(b, 0.0).astype(bf16), wl[...],
                  preferred_element_type=f32) + bl[...]                  # (B8, 32)

    # Symmetry sum: reshape + sublane (XLU) reduce — no selection-matrix matmul.
    B8, M = out.shape
    acc = out.reshape(B8 // NUM_SYMMETRY, NUM_SYMMETRY, M).sum(axis=1)   # (B, 32)

    # Backend MLP, eval-mode BatchNorm folded into per-feature scale/shift (f32).
    # TODO(synk): PyTorch default train-mode BN (batch statistics) is not reproduced.
    h = acc * bns[0] + bnb[0]
    h = jnp.dot(jnp.maximum(h, 0.0).astype(bf16), bw1[...], preferred_element_type=f32)
    h = h * bns[1] + bnb[1]
    h = jnp.dot(jnp.maximum(h, 0.0).astype(bf16), bw2[...], preferred_element_type=f32)
    h = h * bns[2] + bnb[2]
    h = jnp.dot(jnp.maximum(h, 0.0).astype(bf16), bw3[...],
                preferred_element_type=f32) + bb3[...]
    return h                                                             # (B, 1) f32


def _fused_kernel(xc_ref, wf_ref, wm_ref, bm_ref, wl_ref, bl_ref,
                  bw1_ref, bw2_ref, bw3_ref, bb3_ref, bns_ref, bnb_ref, y_ref):
    """Single-invocation kernel: all operands resident in VMEM (a few MiB total)."""
    y = _forward_math(xc_ref, wf_ref, wm_ref, bm_ref, wl_ref, bl_ref,
                      bw1_ref, bw2_ref, bw3_ref, bb3_ref, bns_ref, bnb_ref)
    y_ref[...] = y.astype(y_ref.dtype)


# ---------------------------------------------------------------------------
# Parameters (same shapes/semantics as the PyTorch module) + one-time packing.
# ---------------------------------------------------------------------------
def init_params(key):
    patterns = generate_patterns()
    F, M = FRONT_CHANNELS, MIDDLE_CHANNELS
    keys = jax.random.split(key, 16)

    # EmbedPattern: Linear(2*S_p -> F, bias=False), stored (in, out), zero-padded to 20 rows.
    wf = []
    for p, pat in enumerate(patterns):
        s = len(pat) * INPUT_CHANNELS
        w = jax.random.normal(jax.random.fold_in(keys[0], p), (s, F), jnp.float32) / np.sqrt(s)
        wf.append(jnp.pad(w, ((0, PAD_FEAT - s), (0, 0))))
    wf = jnp.stack(wf)                                                   # (10, 20, F)

    # Middle: 3 residual blocks x 3 grouped 1x1 convs, per pattern F->F (+bias).
    wm = jax.random.normal(keys[1], (NUM_PATTERNS, 9, F, F), jnp.float32) / np.sqrt(F)
    bm = 0.1 * jax.random.normal(keys[2], (NUM_PATTERNS, 9, F), jnp.float32)
    # middle_block_last: per pattern F -> M (+bias).
    wl = jax.random.normal(keys[3], (NUM_PATTERNS, F, M), jnp.float32) / np.sqrt(F)
    bl = 0.1 * jax.random.normal(keys[4], (NUM_PATTERNS, M), jnp.float32)

    # Backend linears.
    bw1 = jax.random.normal(keys[5], (M, M), jnp.float32) / np.sqrt(M)
    bw2 = jax.random.normal(keys[6], (M, M), jnp.float32) / np.sqrt(M)
    bw3 = jax.random.normal(keys[7], (M, 1), jnp.float32) / np.sqrt(M)
    bb3 = 0.1 * jax.random.normal(keys[8], (1, 1), jnp.float32)

    # BatchNorm1d(M) x3, eval mode, folded into per-feature scale & shift.
    gamma = 1.0 + 0.1 * jax.random.normal(keys[9], (3, M), jnp.float32)
    beta = 0.1 * jax.random.normal(keys[10], (3, M), jnp.float32)
    rmean = 0.1 * jax.random.normal(keys[11], (3, M), jnp.float32)
    rvar = 1.0 + 0.1 * jax.random.uniform(keys[12], (3, M), jnp.float32)
    bns = (gamma / jnp.sqrt(rvar + BN_EPS))[:, None, :]                  # (3, 1, M)
    bnb = beta[:, None, :] - rmean[:, None, :] * bns                     # (3, 1, M)

    return dict(wf=wf, wm=wm, bm=bm, wl=wl, bl=bl,
                bw1=bw1, bw2=bw2, bw3=bw3, bb3=bb3, bns=bns, bnb=bnb)


def pack_params(params):
    """One-time packing into block-diagonal / row-stacked fused weights (bf16 matmul operands)."""
    F, M, P, K = FRONT_CHANNELS, MIDDLE_CHANNELS, NUM_PATTERNS, PAD_FEAT
    wf_bd = jnp.zeros((P * K, P * F), jnp.float32)
    wm_bd = jnp.zeros((9, P * F, P * F), jnp.float32)
    for p in range(P):
        wf_bd = wf_bd.at[p * K:(p + 1) * K, p * F:(p + 1) * F].set(params["wf"][p])
        wm_bd = wm_bd.at[:, p * F:(p + 1) * F, p * F:(p + 1) * F].set(params["wm"][p])
    bm_bd = jnp.transpose(params["bm"], (1, 0, 2)).reshape(9, 1, P * F)  # (9, 1, 320) f32
    wl_stack = params["wl"].reshape(P * F, M)                            # row-stacked -> pattern sum
    bl_sum = params["bl"].sum(axis=0, keepdims=True)                     # (1, M) f32
    return dict(
        wf_bd=wf_bd.astype(jnp.bfloat16),
        wm_bd=wm_bd.astype(jnp.bfloat16),
        bm_bd=bm_bd,
        wl_stack=wl_stack.astype(jnp.bfloat16),
        bl_sum=bl_sum,
        bw1=params["bw1"].astype(jnp.bfloat16),
        bw2=params["bw2"].astype(jnp.bfloat16),
        bw3=params["bw3"].astype(jnp.bfloat16),
        bb3=params["bb3"], bns=params["bns"], bnb=params["bnb"])


# ---------------------------------------------------------------------------
# Input glue: 8-fold symmetry expansion + pattern gather (pure index shuffling).
# ---------------------------------------------------------------------------
def _symmetry_expand(x):
    B = x.shape[0]
    x = x.reshape(B, 1, INPUT_CHANNELS, 8, 8).astype(jnp.float32)
    x0 = x
    x1 = jnp.swapaxes(x, 3, 4)
    x01 = jnp.concatenate([x0, x1], axis=1)
    x23 = jnp.flip(x01, axis=3)
    x03 = jnp.concatenate([x01, x23], axis=1)
    x47 = jnp.flip(x03, axis=4)
    x07 = jnp.concatenate([x03, x47], axis=1)
    return x07.reshape(B, NUM_SYMMETRY, INPUT_CHANNELS, 64)


def _build_pattern_stack(x):
    vx = _symmetry_expand(x)
    B8 = x.shape[0] * NUM_SYMMETRY
    slabs = []
    for pat in generate_patterns():
        s = len(pat)
        xs = vx[:, :, :, jnp.array(pat)].reshape(B8, INPUT_CHANNELS * s)  # torch.reshape ordering
        slabs.append(jnp.pad(xs, ((0, 0), (0, PAD_FEAT - INPUT_CHANNELS * s))))
    return jnp.stack(slabs, axis=0)                                       # (10, B*8, 20)


def _build_concat_inputs(x):
    stack = _build_pattern_stack(x)
    B8 = stack.shape[1]
    return jnp.transpose(stack, (1, 0, 2)).reshape(B8, CONCAT_FEAT)       # (B*8, 200)


# ---------------------------------------------------------------------------
# Pallas wrapper + references.
# ---------------------------------------------------------------------------
def pattern_based_v2_forward(x, packed):
    B = x.shape[0]
    xc = _build_concat_inputs(x).astype(jnp.bfloat16)                     # (B*8, 200) bf16
    return pl.pallas_call(
        _fused_kernel,
        out_shape=jax.ShapeDtypeStruct((B, 1), jnp.float32),
        # No grid / specs: single step, whole arrays (a few MiB) resident in VMEM.
    )(xc, packed["wf_bd"], packed["wm_bd"], packed["bm_bd"], packed["wl_stack"],
      packed["bl_sum"], packed["bw1"], packed["bw2"], packed["bw3"],
      packed["bb3"], packed["bns"], packed["bnb"])


def reference_forward_packed(x, packed):
    """Pure-JAX mirror of the exact fused bf16 math (validates the Pallas lowering)."""
    xc = _build_concat_inputs(x).astype(jnp.bfloat16)
    return _forward_math(xc, packed["wf_bd"], packed["wm_bd"], packed["bm_bd"],
                         packed["wl_stack"], packed["bl_sum"], packed["bw1"],
                         packed["bw2"], packed["bw3"], packed["bb3"],
                         packed["bns"], packed["bnb"])


def reference_forward_f32(x, params):
    """Per-pattern f32 reference mirroring the original module math (validates the packing)."""
    xpat = _build_pattern_stack(x)
    B8 = xpat.shape[1]
    B, M = B8 // NUM_SYMMETRY, MIDDLE_CHANNELS
    acc = jnp.zeros((B, M), jnp.float32)
    for p in range(NUM_PATTERNS):
        z = xpat[p] @ params["wf"][p]
        b = z
        for j in range(3):
            h = jnp.maximum(b, 0.0)
            for k in range(3):
                h = h @ params["wm"][p, 3 * j + k] + params["bm"][p, 3 * j + k]
                if k < 2:
                    h = jnp.maximum(h, 0.0)
            b = b + h
        out = jnp.maximum(b, 0.0) @ params["wl"][p] + params["bl"][p]
        acc = acc + out.reshape(B, NUM_SYMMETRY, M).sum(axis=1)
    h = acc * params["bns"][0] + params["bnb"][0]
    h = jnp.maximum(h, 0.0) @ params["bw1"]
    h = h * params["bns"][1] + params["bnb"][1]
    h = jnp.maximum(h, 0.0) @ params["bw2"]
    h = h * params["bns"][2] + params["bnb"][2]
    h = jnp.maximum(h, 0.0) @ params["bw3"] + params["bb3"]
    return h


if __name__ == "__main__":
    key = jax.random.PRNGKey(0)
    pkey, xkey = jax.random.split(key)
    params = init_params(pkey)
    packed = pack_params(params)

    B = 2
    x = jax.random.normal(xkey, (B, INPUT_CHANNELS, 8, 8), jnp.float32)

    fwd = jax.jit(pattern_based_v2_forward)
    y = jax.block_until_ready(fwd(x, packed))
    assert y.shape == (B, 1)

    # Strict check: pure-JAX mirror of the same fused bf16 math.
    y_mirror = reference_forward_packed(x, packed)
    np.testing.assert_allclose(np.asarray(y), np.asarray(y_mirror), rtol=2e-2, atol=2e-2)

    # Loose end-to-end check vs. per-pattern f32 math (difference = bf16 weight rounding).
    y_f32 = reference_forward_f32(x, params)
    np.testing.assert_allclose(np.asarray(y), np.asarray(y_f32), rtol=1e-1, atol=2.0)

    print("KERNEL_OK")
</pallas_src>

<mosaic_0001>
module attributes {stable_mosaic.version = 11 : i64} {
  func.func @_fused_kernel(%arg0: memref<16x200xbf16, #tpu.memory_space<vmem>>, %arg1: memref<200x320xbf16, #tpu.memory_space<vmem>>, %arg2: memref<9x320x320xbf16, #tpu.memory_space<vmem>>, %arg3: memref<9x1x320xf32, #tpu.memory_space<vmem>>, %arg4: memref<320x32xbf16, #tpu.memory_space<vmem>>, %arg5: memref<1x32xf32, #tpu.memory_space<vmem>>, %arg6: memref<32x32xbf16, #tpu.memory_space<vmem>>, %arg7: memref<32x32xbf16, #tpu.memory_space<vmem>>, %arg8: memref<32x1xbf16, #tpu.memory_space<vmem>>, %arg9: memref<1x1xf32, #tpu.memory_space<vmem>>, %arg10: memref<3x1x32xf32, #tpu.memory_space<vmem>>, %arg11: memref<3x1x32xf32, #tpu.memory_space<vmem>>, %arg12: memref<2x1xf32, #tpu.memory_space<vmem>>) attributes {dimension_semantics = [], scalar_prefetch = 0 : i64, scratch_operands = 0 : i64, tpu.core_type = #tpu.core_type<tc>} {
    %c0 = arith.constant 0 : index
    %c0_0 = arith.constant 0 : index
    %0 = vector.load %arg0[%c0, %c0_0] : memref<16x200xbf16, #tpu.memory_space<vmem>>, vector<16x200xbf16>
    %c0_1 = arith.constant 0 : index
    %c0_2 = arith.constant 0 : index
    %1 = vector.load %arg1[%c0_1, %c0_2] : memref<200x320xbf16, #tpu.memory_space<vmem>>, vector<200x320xbf16>
    %cst = arith.constant dense<0.000000e+00> : vector<16x320xf32>
    %2 = tpu.matmul %0, %1, %cst {dimension_numbers = #tpu.dot_dimension_numbers<[1], [0], [0], [1], [0, 0, 1, 1], [], []>} : vector<16x200xbf16>, vector<200x320xbf16>, vector<16x320xf32> -> vector<16x320xf32>
    %cst_3 = arith.constant 0.000000e+00 : f32
    %3 = vector.broadcast %cst_3 : f32 to vector<16x320xf32>
    %4 = arith.maximumf %2, %3 : vector<16x320xf32>
    %5 = arith.truncf %4 : vector<16x320xf32> to vector<16x320xbf16>
    %c0_4 = arith.constant 0 : index
    %c0_5 = arith.constant 0 : index
    %c0_6 = arith.constant 0 : index
    %6 = vector.load %arg2[%c0_4, %c0_5, %c0_6] : memref<9x320x320xbf16, #tpu.memory_space<vmem>>, vector<1x320x320xbf16>
    %7 = vector.shape_cast %6 : vector<1x320x320xbf16> to vector<320x320xbf16>
    %cst_7 = arith.constant dense<0.000000e+00> : vector<16x320xf32>
    %8 = tpu.matmul %5, %7, %cst_7 {dimension_numbers = #tpu.dot_dimension_numbers<[1], [0], [0], [1], [0, 0, 1, 1], [], []>} : vector<16x320xbf16>, vector<320x320xbf16>, vector<16x320xf32> -> vector<16x320xf32>
    %c0_8 = arith.constant 0 : index
    %c0_9 = arith.constant 0 : index
    %c0_10 = arith.constant 0 : index
    %9 = vector.load %arg3[%c0_8, %c0_9, %c0_10] : memref<9x1x320xf32, #tpu.memory_space<vmem>>, vector<1x1x320xf32>
    %10 = vector.shape_cast %9 : vector<1x1x320xf32> to vector<1x320xf32>
    %11 = vector.broadcast %10 : vector<1x320xf32> to vector<16x320xf32>
    %12 = arith.addf %8, %11 : vector<16x320xf32>
    %cst_11 = arith.constant 0.000000e+00 : f32
    %13 = vector.broadcast %cst_11 : f32 to vector<16x320xf32>
    %14 = arith.maximumf %12, %13 : vector<16x320xf32>
    %15 = arith.truncf %14 : vector<16x320xf32> to vector<16x320xbf16>
    %c1 = arith.constant 1 : index
    %c0_12 = arith.constant 0 : index
    %c0_13 = arith.constant 0 : index
    %16 = vector.load %arg2[%c1, %c0_12, %c0_13] : memref<9x320x320xbf16, #tpu.memory_space<vmem>>, vector<1x320x320xbf16>
    %17 = vector.shape_cast %16 : vector<1x320x320xbf16> to vector<320x320xbf16>
    %cst_14 = arith.constant dense<0.000000e+00> : vector<16x320xf32>
    %18 = tpu.matmul %15, %17, %cst_14 {dimension_numbers = #tpu.dot_dimension_numbers<[1], [0], [0], [1], [0, 0, 1, 1], [], []>} : vector<16x320xbf16>, vector<320x320xbf16>, vector<16x320xf32> -> vector<16x320xf32>
    %c1_15 = arith.constant 1 : index
    %c0_16 = arith.constant 0 : index
    %c0_17 = arith.constant 0 : index
    %19 = vector.load %arg3[%c1_15, %c0_16, %c0_17] : memref<9x1x320xf32, #tpu.memory_space<vmem>>, vector<1x1x320xf32>
    %20 = vector.shape_cast %19 : vector<1x1x320xf32> to vector<1x320xf32>
    %21 = vector.broadcast %20 : vector<1x320xf32> to vector<16x320xf32>
    %22 = arith.addf %18, %21 : vector<16x320xf32>
    %cst_18 = arith.constant 0.000000e+00 : f32
    %23 = vector.broadcast %cst_18 : f32 to vector<16x320xf32>
    %24 = arith.maximumf %22, %23 : vector<16x320xf32>
    %25 = arith.truncf %24 : vector<16x320xf32> to vector<16x320xbf16>
    %c2 = arith.constant 2 : index
    %c0_19 = arith.constant 0 : index
    %c0_20 = arith.constant 0 : index
    %26 = vector.load %arg2[%c2, %c0_19, %c0_20] : memref<9x320x320xbf16, #tpu.memory_space<vmem>>, vector<1x320x320xbf16>
    %27 = vector.shape_cast %26 : vector<1x320x320xbf16> to vector<320x320xbf16>
    %cst_21 = arith.constant dense<0.000000e+00> : vector<16x320xf32>
    %28 = tpu.matmul %25, %27, %cst_21 {dimension_numbers = #tpu.dot_dimension_numbers<[1], [0], [0], [1], [0, 0, 1, 1], [], []>} : vector<16x320xbf16>, vector<320x320xbf16>, vector<16x320xf32> -> vector<16x320xf32>
    %c2_22 = arith.constant 2 : index
    %c0_23 = arith.constant 0 : index
    %c0_24 = arith.constant 0 : index
    %29 = vector.load %arg3[%c2_22, %c0_23, %c0_24] : memref<9x1x320xf32, #tpu.memory_space<vmem>>, vector<1x1x320xf32>
    %30 = vector.shape_cast %29 : vector<1x1x320xf32> to vector<1x320xf32>
    %31 = vector.broadcast %30 : vector<1x320xf32> to vector<16x320xf32>
    %32 = arith.addf %28, %31 : vector<16x320xf32>
    %33 = arith.addf %2, %32 : vector<16x320xf32>
    %cst_25 = arith.constant 0.000000e+00 : f32
    %34 = vector.broadcast %cst_25 : f32 to vector<16x320xf32>
    %35 = arith.maximumf %33, %34 : vector<16x320xf32>
    %36 = arith.truncf %35 : vector<16x320xf32> to vector<16x320xbf16>
    %c3 = arith.constant 3 : index
    %c0_26 = arith.constant 0 : index
    %c0_27 = arith.constant 0 : index
    %37 = vector.load %arg2[%c3, %c0_26, %c0_27] : memref<9x320x320xbf16, #tpu.memory_space<vmem>>, vector<1x320x320xbf16>
    %38 = vector.shape_cast %37 : vector<1x320x320xbf16> to vector<320x320xbf16>
    %cst_28 = arith.constant dense<0.000000e+00> : vector<16x320xf32>
    %39 = tpu.matmul %36, %38, %cst_28 {dimension_numbers = #tpu.dot_dimension_numbers<[1], [0], [0], [1], [0, 0, 1, 1], [], []>} : vector<16x320xbf16>, vector<320x320xbf16>, vector<16x320xf32> -> vector<16x320xf32>
    %c3_29 = arith.constant 3 : index
    %c0_30 = arith.constant 0 : index
    %c0_31 = arith.constant 0 : index
    %40 = vector.load %arg3[%c3_29, %c0_30, %c0_31] : memref<9x1x320xf32, #tpu.memory_space<vmem>>, vector<1x1x320xf32>
    %41 = vector.shape_cast %40 : vector<1x1x320xf32> to vector<1x320xf32>
    %42 = vector.broadcast %41 : vector<1x320xf32> to vector<16x320xf32>
    %43 = arith.addf %39, %42 : vector<16x320xf32>
    %cst_32 = arith.constant 0.000000e+00 : f32
    %44 = vector.broadcast %cst_32 : f32 to vector<16x320xf32>
    %45 = arith.maximumf %43, %44 : vector<16x320xf32>
    %46 = arith.truncf %45 : vector<16x320xf32> to vector<16x320xbf16>
    %c4 = arith.constant 4 : index
    %c0_33 = arith.constant 0 : index
    %c0_34 = arith.constant 0 : index
    %47 = vector.load %arg2[%c4, %c0_33, %c0_34] : memref<9x320x320xbf16, #tpu.memory_space<vmem>>, vector<1x320x320xbf16>
    %48 = vector.shape_cast %47 : vector<1x320x320xbf16> to vector<320x320xbf16>
    %cst_35 = arith.constant dense<0.000000e+00> : vector<16x320xf32>
    %49 = tpu.matmul %46, %48, %cst_35 {dimension_numbers = #tpu.dot_dimension_numbers<[1], [0], [0], [1], [0, 0, 1, 1], [], []>} : vector<16x320xbf16>, vector<320x320xbf16>, vector<16x320xf32> -> vector<16x320xf32>
    %c4_36 = arith.constant 4 : index
    %c0_37 = arith.constant 0 : index
    %c0_38 = arith.constant 0 : index
    %50 = vector.load %arg3[%c4_36, %c0_37, %c0_38] : memref<9x1x320xf32, #tpu.memory_space<vmem>>, vector<1x1x320xf32>
    %51 = vector.shape_cast %50 : vector<1x1x320xf32> to vector<1x320xf32>
    %52 = vector.broadcast %51 : vector<1x320xf32> to vector<16x320xf32>
    %53 = arith.addf %49, %52 : vector<16x320xf32>
    %cst_39 = arith.constant 0.000000e+00 : f32
    %54 = vector.broadcast %cst_39 : f32 to vector<16x320xf32>
    %55 = arith.maximumf %53, %54 : vector<16x320xf32>
    %56 = arith.truncf %55 : vector<16x320xf32> to vector<16x320xbf16>
    %c5 = arith.constant 5 : index
    %c0_40 = arith.constant 0 : index
    %c0_41 = arith.constant 0 : index
    %57 = vector.load %arg2[%c5, %c0_40, %c0_41] : memref<9x320x320xbf16, #tpu.memory_space<vmem>>, vector<1x320x320xbf16>
    %58 = vector.shape_cast %57 : vector<1x320x320xbf16> to vector<320x320xbf16>
    %cst_42 = arith.constant dense<0.000000e+00> : vector<16x320xf32>
    %59 = tpu.matmul %56, %58, %cst_42 {dimension_numbers = #tpu.dot_dimension_numbers<[1], [0], [0], [1], [0, 0, 1, 1], [], []>} : vector<16x320xbf16>, vector<320x320xbf16>, vector<16x320xf32> -> vector<16x320xf32>
    %c5_43 = arith.constant 5 : index
    %c0_44 = arith.constant 0 : index
    %c0_45 = arith.constant 0 : index
    %60 = vector.load %arg3[%c5_43, %c0_44, %c0_45] : memref<9x1x320xf32, #tpu.memory_space<vmem>>, vector<1x1x320xf32>
    %61 = vector.shape_cast %60 : vector<1x1x320xf32> to vector<1x320xf32>
    %62 = vector.broadcast %61 : vector<1x320xf32> to vector<16x320xf32>
    %63 = arith.addf %59, %62 : vector<16x320xf32>
    %64 = arith.addf %33, %63 : vector<16x320xf32>
    %cst_46 = arith.constant 0.000000e+00 : f32
    %65 = vector.broadcast %cst_46 : f32 to vector<16x320xf32>
    %66 = arith.maximumf %64, %65 : vector<16x320xf32>
    %67 = arith.truncf %66 : vector<16x320xf32> to vector<16x320xbf16>
    %c6 = arith.constant 6 : index
    %c0_47 = arith.constant 0 : index
    %c0_48 = arith.constant 0 : index
    %68 = vector.load %arg2[%c6, %c0_47, %c0_48] : memref<9x320x320xbf16, #tpu.memory_space<vmem>>, vector<1x320x320xbf16>
    %69 = vector.shape_cast %68 : vector<1x320x320xbf16> to vector<320x320xbf16>
    %cst_49 = arith.constant dense<0.000000e+00> : vector<16x320xf32>
    %70 = tpu.matmul %67, %69, %cst_49 {dimension_numbers = #tpu.dot_dimension_numbers<[1], [0], [0], [1], [0, 0, 1, 1], [], []>} : vector<16x320xbf16>, vector<320x320xbf16>, vector<16x320xf32> -> vector<16x320xf32>
    %c6_50 = arith.constant 6 : index
    %c0_51 = arith.constant 0 : index
    %c0_52 = arith.constant 0 : index
    %71 = vector.load %arg3[%c6_50, %c0_51, %c0_52] : memref<9x1x320xf32, #tpu.memory_space<vmem>>, vector<1x1x320xf32>
    %72 = vector.shape_cast %71 : vector<1x1x320xf32> to vector<1x320xf32>
    %73 = vector.broadcast %72 : vector<1x320xf32> to vector<16x320xf32>
    %74 = arith.addf %70, %73 : vector<16x320xf32>
    %cst_53 = arith.constant 0.000000e+00 : f32
    %75 = vector.broadcast %cst_53 : f32 to vector<16x320xf32>
    %76 = arith.maximumf %74, %75 : vector<16x320xf32>
    %77 = arith.truncf %76 : vector<16x320xf32> to vector<16x320xbf16>
    %c7 = arith.constant 7 : index
    %c0_54 = arith.constant 0 : index
    %c0_55 = arith.constant 0 : index
    %78 = vector.load %arg2[%c7, %c0_54, %c0_55] : memref<9x320x320xbf16, #tpu.memory_space<vmem>>, vector<1x320x320xbf16>
    %79 = vector.shape_cast %78 : vector<1x320x320xbf16> to vector<320x320xbf16>
    %cst_56 = arith.constant dense<0.000000e+00> : vector<16x320xf32>
    %80 = tpu.matmul %77, %79, %cst_56 {dimension_numbers = #tpu.dot_dimension_numbers<[1], [0], [0], [1], [0, 0, 1, 1], [], []>} : vector<16x320xbf16>, vector<320x320xbf16>, vector<16x320xf32> -> vector<16x320xf32>
    %c7_57 = arith.constant 7 : index
    %c0_58 = arith.constant 0 : index
    %c0_59 = arith.constant 0 : index
    %81 = vector.load %arg3[%c7_57, %c0_58, %c0_59] : memref<9x1x320xf32, #tpu.memory_space<vmem>>, vector<1x1x320xf32>
    %82 = vector.shape_cast %81 : vector<1x1x320xf32> to vector<1x320xf32>
    %83 = vector.broadcast %82 : vector<1x320xf32> to vector<16x320xf32>
    %84 = arith.addf %80, %83 : vector<16x320xf32>
    %cst_60 = arith.constant 0.000000e+00 : f32
    %85 = vector.broadcast %cst_60 : f32 to vector<16x320xf32>
    %86 = arith.maximumf %84, %85 : vector<16x320xf32>
    %87 = arith.truncf %86 : vector<16x320xf32> to vector<16x320xbf16>
    %c8 = arith.constant 8 : index
    %c0_61 = arith.constant 0 : index
    %c0_62 = arith.constant 0 : index
    %88 = vector.load %arg2[%c8, %c0_61, %c0_62] : memref<9x320x320xbf16, #tpu.memory_space<vmem>>, vector<1x320x320xbf16>
    %89 = vector.shape_cast %88 : vector<1x320x320xbf16> to vector<320x320xbf16>
    %cst_63 = arith.constant dense<0.000000e+00> : vector<16x320xf32>
    %90 = tpu.matmul %87, %89, %cst_63 {dimension_numbers = #tpu.dot_dimension_numbers<[1], [0], [0], [1], [0, 0, 1, 1], [], []>} : vector<16x320xbf16>, vector<320x320xbf16>, vector<16x320xf32> -> vector<16x320xf32>
    %c8_64 = arith.constant 8 : index
    %c0_65 = arith.constant 0 : index
    %c0_66 = arith.constant 0 : index
    %91 = vector.load %arg3[%c8_64, %c0_65, %c0_66] : memref<9x1x320xf32, #tpu.memory_space<vmem>>, vector<1x1x320xf32>
    %92 = vector.shape_cast %91 : vector<1x1x320xf32> to vector<1x320xf32>
    %93 = vector.broadcast %92 : vector<1x320xf32> to vector<16x320xf32>
    %94 = arith.addf %90, %93 : vector<16x320xf32>
    %95 = arith.addf %64, %94 : vector<16x320xf32>
    %cst_67 = arith.constant 0.000000e+00 : f32
    %96 = vector.broadcast %cst_67 : f32 to vector<16x320xf32>
    %97 = arith.maximumf %95, %96 : vector<16x320xf32>
    %98 = arith.truncf %97 : vector<16x320xf32> to vector<16x320xbf16>
    %c0_68 = arith.constant 0 : index
    %c0_69 = arith.constant 0 : index
    %99 = vector.load %arg4[%c0_68, %c0_69] : memref<320x32xbf16, #tpu.memory_space<vmem>>, vector<320x32xbf16>
    %cst_70 = arith.constant dense<0.000000e+00> : vector<16x32xf32>
    %100 = tpu.matmul %98, %99, %cst_70 {dimension_numbers = #tpu.dot_dimension_numbers<[1], [0], [0], [1], [0, 0, 1, 1], [], []>} : vector<16x320xbf16>, vector<320x32xbf16>, vector<16x32xf32> -> vector<16x32xf32>
    %c0_71 = arith.constant 0 : index
    %c0_72 = arith.constant 0 : index
    %101 = vector.load %arg5[%c0_71, %c0_72] : memref<1x32xf32, #tpu.memory_space<vmem>>, vector<1x32xf32>
    %102 = vector.broadcast %101 : vector<1x32xf32> to vector<16x32xf32>
    %103 = arith.addf %100, %102 : vector<16x32xf32>
    %104 = vector.shape_cast %103 : vector<16x32xf32> to vector<2x8x32xf32>
    %cst_73 = arith.constant dense<0.000000e+00> : vector<2x32xf32>
    %105 = vector.multi_reduction <add>, %104, %cst_73 [1] : vector<2x8x32xf32> to vector<2x32xf32>
    %c0_74 = arith.constant 0 : index
    %c0_75 = arith.constant 0 : index
    %c0_76 = arith.constant 0 : index
    %106 = vector.load %arg10[%c0_74, %c0_75, %c0_76] : memref<3x1x32xf32, #tpu.memory_space<vmem>>, vector<1x1x32xf32>
    %107 = vector.shape_cast %106 : vector<1x1x32xf32> to vector<1x32xf32>
    %108 = vector.broadcast %107 : vector<1x32xf32> to vector<2x32xf32>
    %109 = arith.mulf %105, %108 : vector<2x32xf32>
    %c0_77 = arith.constant 0 : index
    %c0_78 = arith.constant 0 : index
    %c0_79 = arith.constant 0 : index
    %110 = vector.load %arg11[%c0_77, %c0_78, %c0_79] : memref<3x1x32xf32, #tpu.memory_space<vmem>>, vector<1x1x32xf32>
    %111 = vector.shape_cast %110 : vector<1x1x32xf32> to vector<1x32xf32>
    %112 = vector.broadcast %111 : vector<1x32xf32> to vector<2x32xf32>
    %113 = arith.addf %109, %112 : vector<2x32xf32>
    %cst_80 = arith.constant 0.000000e+00 : f32
    %114 = vector.broadcast %cst_80 : f32 to vector<2x32xf32>
    %115 = arith.maximumf %113, %114 : vector<2x32xf32>
    %116 = arith.truncf %115 : vector<2x32xf32> to vector<2x32xbf16>
    %c0_81 = arith.constant 0 : index
    %c0_82 = arith.constant 0 : index
    %117 = vector.load %arg6[%c0_81, %c0_82] : memref<32x32xbf16, #tpu.memory_space<vmem>>, vector<32x32xbf16>
    %cst_83 = arith.constant dense<0.000000e+00> : vector<2x32xf32>
    %118 = tpu.matmul %116, %117, %cst_83 {dimension_numbers = #tpu.dot_dimension_numbers<[1], [0], [0], [1], [0, 0, 1, 1], [], []>} : vector<2x32xbf16>, vector<32x32xbf16>, vector<2x32xf32> -> vector<2x32xf32>
    %c1_84 = arith.constant 1 : index
    %c0_85 = arith.constant 0 : index
    %c0_86 = arith.constant 0 : index
    %119 = vector.load %arg10[%c1_84, %c0_85, %c0_86] : memref<3x1x32xf32, #tpu.memory_space<vmem>>, vector<1x1x32xf32>
    %120 = vector.shape_cast %119 : vector<1x1x32xf32> to vector<1x32xf32>
    %121 = vector.broadcast %120 : vector<1x32xf32> to vector<2x32xf32>
    %122 = arith.mulf %118, %121 : vector<2x32xf32>
    %c1_87 = arith.constant 1 : index
    %c0_88 = arith.constant 0 : index
    %c0_89 = arith.constant 0 : index
    %123 = vector.load %arg11[%c1_87, %c0_88, %c0_89] : memref<3x1x32xf32, #tpu.memory_space<vmem>>, vector<1x1x32xf32>
    %124 = vector.shape_cast %123 : vector<1x1x32xf32> to vector<1x32xf32>
    %125 = vector.broadcast %124 : vector<1x32xf32> to vector<2x32xf32>
    %126 = arith.addf %122, %125 : vector<2x32xf32>
    %cst_90 = arith.constant 0.000000e+00 : f32
    %127 = vector.broadcast %cst_90 : f32 to vector<2x32xf32>
    %128 = arith.maximumf %126, %127 : vector<2x32xf32>
    %129 = arith.truncf %128 : vector<2x32xf32> to vector<2x32xbf16>
    %c0_91 = arith.constant 0 : index
    %c0_92 = arith.constant 0 : index
    %130 = vector.load %arg7[%c0_91, %c0_92] : memref<32x32xbf16, #tpu.memory_space<vmem>>, vector<32x32xbf16>
    %cst_93 = arith.constant dense<0.000000e+00> : vector<2x32xf32>
    %131 = tpu.matmul %129, %130, %cst_93 {dimension_numbers = #tpu.dot_dimension_numbers<[1], [0], [0], [1], [0, 0, 1, 1], [], []>} : vector<2x32xbf16>, vector<32x32xbf16>, vector<2x32xf32> -> vector<2x32xf32>
    %c2_94 = arith.constant 2 : index
    %c0_95 = arith.constant 0 : index
    %c0_96 = arith.constant 0 : index
    %132 = vector.load %arg10[%c2_94, %c0_95, %c0_96] : memref<3x1x32xf32, #tpu.memory_space<vmem>>, vector<1x1x32xf32>
    %133 = vector.shape_cast %132 : vector<1x1x32xf32> to vector<1x32xf32>
    %134 = vector.broadcast %133 : vector<1x32xf32> to vector<2x32xf32>
    %135 = arith.mulf %131, %134 : vector<2x32xf32>
    %c2_97 = arith.constant 2 : index
    %c0_98 = arith.constant 0 : index
    %c0_99 = arith.constant 0 : index
    %136 = vector.load %arg11[%c2_97, %c0_98, %c0_99] : memref<3x1x32xf32, #tpu.memory_space<vmem>>, vector<1x1x32xf32>
    %137 = vector.shape_cast %136 : vector<1x1x32xf32> to vector<1x32xf32>
    %138 = vector.broadcast %137 : vector<1x32xf32> to vector<2x32xf32>
    %139 = arith.addf %135, %138 : vector<2x32xf32>
    %cst_100 = arith.constant 0.000000e+00 : f32
    %140 = vector.broadcast %cst_100 : f32 to vector<2x32xf32>
    %141 = arith.maximumf %139, %140 : vector<2x32xf32>
    %142 = arith.truncf %141 : vector<2x32xf32> to vector<2x32xbf16>
    %c0_101 = arith.constant 0 : index
    %c0_102 = arith.constant 0 : index
    %143 = vector.load %arg8[%c0_101, %c0_102] : memref<32x1xbf16, #tpu.memory_space<vmem>>, vector<32x1xbf16>
    %cst_103 = arith.constant dense<0.000000e+00> : vector<2x1xf32>
    %144 = tpu.matmul %142, %143, %cst_103 {dimension_numbers = #tpu.dot_dimension_numbers<[1], [0], [0], [1], [0, 0, 1, 1], [], []>} : vector<2x32xbf16>, vector<32x1xbf16>, vector<2x1xf32> -> vector<2x1xf32>
    %c0_104 = arith.constant 0 : index
    %c0_105 = arith.constant 0 : index
    %145 = vector.load %arg9[%c0_104, %c0_105] : memref<1x1xf32, #tpu.memory_space<vmem>>, vector<1x1xf32>
    %146 = vector.broadcast %145 : vector<1x1xf32> to vector<2x1xf32>
    %147 = arith.addf %144, %146 : vector<2x1xf32>
    %c0_106 = arith.constant 0 : index
    %c0_107 = arith.constant 0 : index
    %148 = vector.load %arg12[%c0_106, %c0_107] : memref<2x1xf32, #tpu.memory_space<vmem>>, vector<2x1xf32>
    tpu.vector_store %arg12[%c0_106, %c0_107], %147 {strides = array<i32>} : memref<2x1xf32, #tpu.memory_space<vmem>>, vector<2x1xf32>,
    return
  }
}

</mosaic_0001>

<bundles_post_ra>
// kernel: pattern_based_v2_forward.1
= control target key start
LH: loop header
LB: loop body
LE: loop exit
PB: predicated region body
PF: predicated region fallthrough
CT: control target
= control target key end

     0   :  { %s9107_s0 = inlined_call_operand.vmem [shape: bf16[16,200], index: 0, kind: input, shape index: {}]   ;;  %s9108_s1 = inlined_call_operand.hbm [shape: bf16[200,320], index: 1, kind: input, shape index: {}]   ;;  %s9109_s2 = inlined_call_operand.hbm [shape: bf16[9,320,320], index: 2, kind: input, shape index: {}]   ;;  %s9110_s3 = inlined_call_operand.hbm [shape: f32[9,1,320], index: 3, kind: input, shape index: {}]   ;;  %s9111_s4 = inlined_call_operand.vmem [shape: bf16[320,32], index: 4, kind: input, shape index: {}]   ;;  %s9112_s5 = inlined_call_operand.hbm [shape: f32[1,32], index: 5, kind: input, shape index: {}]   ;;  %s9113_s6 = inlined_call_operand.hbm [shape: bf16[32,32], index: 6, kind: input, shape index: {}]   ;;  %s9114_s7 = inlined_call_operand.hbm [shape: bf16[32,32], index: 7, kind: input, shape index: {}]   ;;  %s9115_s8 = inlined_call_operand.vmem [shape: bf16[32,1], index: 8, kind: input, shape index: {}]   ;;  %s9116_s9 = inlined_call_operand.<no memory space> [shape: f32[1,1], index: 9, kind: input, shape index: {}]   ;;  %s9117_s10 = inlined_call_operand.hbm [shape: f32[3,1,32], index: 10, kind: input, shape index: {}]   ;;  %s9118_s11 = inlined_call_operand.hbm [shape: f32[3,1,32], index: 11, kind: input, shape index: {}]   ;;  %s9119_s12 = inlined_call_operand.vmem [shape: f32[2,1], index: 12, kind: output, shape index: {}]  }
   0x1   :  { %v17_v0 = vstv %s9116_s9 }
   0x2   :  { %18 = vst [vmem:[#allocation2] sm:$0x1] %v17_v0 }
   0x3   :  { %19 = vsyncpa [#allocation4], 0 }
   0x4   :  { %20 = vsyncpa [#allocation6], 0 }
   0x5   :  { %21 = vsyncpa [#allocation9], 0 }
   0x6   :  { %22 = vsyncpa [#allocation12], 0 }
   0x7   :  { %23 = vsyncpa [#allocation15], 0  ;;  %s8599_s23 = smov [#allocation5]   ;;  %s8600_s25 = smov [#allocation8]  }
   0x8   :  { %s43_s24 = sshll.u32 %s8599_s23, 4  ;;  %s70_s26 = sshll.u32 %s8600_s25, 4  ;;  %s44_s24 = int_to_ptr.vmem [resolvable:$true] %s43_s24  ;;  %s8686_s26 = int_to_ptr.vmem [resolvable:$true] %s70_s26 }
   0x9   :  { %s8413_s29 = scalar_lea.hbm %s9109_s2, 69120 }
   0xa   :  { %p8414_p0 = scmp.ne.s32.totalorder %s9109_s2, %s8413_s29  ;;  %p8417_p1 = scmp.lt.u32.totalorder %s8413_s29, %s9109_s2 }
   0xc   :  { %p8419_p2 = pnand %p8417_p1, %p8414_p0 }
   0xe   :  { %8422 = shalt.err (!%p8419_p2)
}
   0xf   :  { %s8423_s15 = scalar_lea.vmem %s44_s24, 69120  ;;  %p8428_p4 = scmp.lt.s32.totalorder %s44_s24, %s44_s24 }
  0x10   :  { %p8424_p3 = scmp.ne.s32.totalorder %s44_s24, %s8423_s15  ;;  %p8429_p5 = scmp.lt.s32.totalorder %s8423_s15, %s8423_s15 }
  0x12   :  { %p8430_p6 = por %p8429_p5, %p8428_p4 }
  0x14   :  { %p8431_p7 = pnand %p8430_p6, %p8424_p3 }
  0x16   :  { %8434 = shalt.err (!%p8431_p7)
}
  0x17   :  { %s8601_s16 = smov 192   ;;  %s8602_s17 = smov 12  }
  0x18   :  { %49 = dma.hbm_to_vmem [thread:$0]  %s9109_s2, 69120, %s44_s24, [#allocation6], %s8601_s16, %s8601_s16, %s8602_s17  }
  0x19   :  { %s8435_s22 = scalar_lea.hbm %s9112_s5, 16 }
  0x1a   :  { %p8436_p8 = scmp.ne.s32.totalorder %s9112_s5, %s8435_s22  ;;  %p8439_p9 = scmp.lt.u32.totalorder %s8435_s22, %s9112_s5 }
  0x1c   :  { %p8441_p10 = pnand %p8439_p9, %p8436_p8 }
  0x1e   :  { %8444 = shalt.err (!%p8441_p10)
}
  0x1f   :  { %s8445_s29 = scalar_lea.vmem %s8686_s26, 16  ;;  %s8449_s2 = scalar_lea.vmem %s8686_s26, 32 }
  0x20   :  { %p8446_p11 = scmp.ne.s32.totalorder %s8686_s26, %s8445_s29  ;;  %p8450_p12 = scmp.lt.s32.totalorder %s8686_s26, %s8686_s26 }
  0x21   :  { %p8451_p13 = scmp.lt.s32.totalorder %s8449_s2, %s8445_s29 }
  0x23   :  { %p8452_p0 = por %p8451_p13, %p8450_p12 }
  0x25   :  { %p8453_p1 = pnand %p8452_p0, %p8446_p11 }
  0x27   :  { %8456 = shalt.err (!%p8453_p1)
}
  0x28   :  { %73 = dma.hbm_to_vmem [thread:$0]  %s9112_s5, 16, %s8686_s26, [#allocation9]  }
  0x29   :  { %s8603_s13 = smov [#allocation11]   ;;  %s8604_s14 = smov [#allocation3]  }
  0x2a   :  { %s91_s9 = sshll.u32 %s8603_s13, 4  ;;  %s31_s15 = sshll.u32 %s8604_s14, 4  ;;  %s92_s9 = int_to_ptr.vmem [resolvable:$true] %s91_s9  ;;  %s8721_s15 = int_to_ptr.vmem [resolvable:$true] %s31_s15 }
  0x2b   :  { %s8457_s20 = scalar_lea.hbm %s9114_s7, 256 }
  0x2c   :  { %p8458_p2 = scmp.ne.s32.totalorder %s9114_s7, %s8457_s20  ;;  %p8461_p3 = scmp.lt.u32.totalorder %s8457_s20, %s9114_s7 }
  0x2e   :  { %p8463_p4 = pnand %p8461_p3, %p8458_p2 }
  0x30   :  { %8466 = shalt.err (!%p8463_p4)
}
  0x31   :  { %s8467_s5 = scalar_lea.vmem %s92_s9, 256  ;;  %p8472_p6 = scmp.lt.s32.totalorder %s92_s9, %s92_s9 }
  0x32   :  { %p8468_p5 = scmp.ne.s32.totalorder %s92_s9, %s8467_s5  ;;  %p8473_p7 = scmp.lt.s32.totalorder %s8467_s5, %s8467_s5 }
  0x34   :  { %p8474_p8 = por %p8473_p7, %p8472_p6 }
  0x36   :  { %p8475_p9 = pnand %p8474_p8, %p8468_p5 }
  0x38   :  { %8478 = shalt.err (!%p8475_p9)
}
  0x39   :  { %s8605_s26 = smov 64   ;;  %s8606_s27 = smov 4  }
  0x3a   :  { %97 = dma.hbm_to_vmem [thread:$0]  %s9114_s7, 256, %s92_s9, [#allocation12], %s8605_s26, %s8605_s26, %s8606_s27  }
  0x3b   :  { %s8479_s30 = scalar_lea.hbm %s9108_s1, 4800 }
  0x3c   :  { %p8480_p10 = scmp.ne.s32.totalorder %s9108_s1, %s8479_s30  ;;  %p8483_p11 = scmp.lt.u32.totalorder %s8479_s30, %s9108_s1 }
  0x3e   :  { %p8485_p12 = pnand %p8483_p11, %p8480_p10 }
  0x40   :  { %8488 = shalt.err (!%p8485_p12)
}
  0x41   :  { %s8489_s20 = scalar_lea.vmem %s8721_s15, 4800  ;;  %p8494_p0 = scmp.lt.s32.totalorder %s8721_s15, %s8721_s15 }
  0x42   :  { %p8490_p13 = scmp.ne.s32.totalorder %s8721_s15, %s8489_s20  ;;  %p8495_p1 = scmp.lt.s32.totalorder %s8489_s20, %s8489_s20 }
  0x44   :  { %p8496_p2 = por %p8495_p1, %p8494_p0 }
  0x46   :  { %p8497_p3 = pnand %p8496_p2, %p8490_p13 }
  0x48   :  { %8500 = shalt.err (!%p8497_p3)
}
  0x49   :  { %37 = dma.hbm_to_vmem [thread:$0]  %s9108_s1, 4800, %s8721_s15, [#allocation4], %s8601_s16, %s8601_s16, %s8602_s17  }
  0x4a   :  { %s8607_s21 = smov [#allocation7]   ;;  %s8501_s5 = scalar_lea.hbm %s9110_s3, 432 }
  0x4b   :  { %s55_s22 = sshll.u32 %s8607_s21, 4  ;;  %p8502_p4 = scmp.ne.s32.totalorder %s9110_s3, %s8501_s5  ;;  %s56_s22 = int_to_ptr.vmem [resolvable:$true] %s55_s22 }
  0x4c   :  { %p8505_p5 = scmp.lt.u32.totalorder %s8501_s5, %s9110_s3 }
  0x4e   :  { %p8507_p6 = pnand %p8505_p5, %p8502_p4 }
  0x50   :  { %8510 = shalt.err (!%p8507_p6)
}
  0x51   :  { %s8511_s30 = scalar_lea.vmem %s56_s22, 432  ;;  %s8515_s1 = scalar_lea.vmem %s56_s22, 448 }
  0x52   :  { %p8512_p7 = scmp.ne.s32.totalorder %s56_s22, %s8511_s30  ;;  %p8516_p8 = scmp.lt.s32.totalorder %s56_s22, %s56_s22 }
  0x53   :  { %p8517_p9 = scmp.lt.s32.totalorder %s8515_s1, %s8511_s30 }
  0x55   :  { %p8518_p10 = por %p8517_p9, %p8516_p8 }
  0x57   :  { %p8519_p11 = pnand %p8518_p10, %p8512_p7 }
  0x59   :  { %8522 = shalt.err (!%p8519_p11)
}
  0x5a   :  { %s8608_s16 = smov 48   ;;  %s8609_s17 = smov 3  }
  0x5b   :  { %61 = dma.hbm_to_vmem [thread:$0]  %s9110_s3, 432, %s56_s22, [#allocation6], %s8608_s16, %s8608_s16, %s8609_s17  }
  0x5c   :  { %s8610_s14 = smov [#allocation10]   ;;  %s8611_s19 = smov [#allocation13]  }
  0x5d   :  { %s79_s18 = sshll.u32 %s8610_s14, 4  ;;  %s107_s20 = sshll.u32 %s8611_s19, 4  ;;  %s80_s18 = int_to_ptr.vmem [resolvable:$true] %s79_s18  ;;  %s108_s20 = int_to_ptr.vmem [resolvable:$true] %s107_s20 }
  0x5e   :  { %s8523_s21 = scalar_lea.hbm %s9113_s6, 256 }
  0x5f   :  { %p8524_p12 = scmp.ne.s32.totalorder %s9113_s6, %s8523_s21  ;;  %p8527_p13 = scmp.lt.u32.totalorder %s8523_s21, %s9113_s6 }
  0x61   :  { %p8529_p0 = pnand %p8527_p13, %p8524_p12 }
  0x63   :  { %8532 = shalt.err (!%p8529_p0)
}
  0x64   :  { %s8533_s3 = scalar_lea.vmem %s80_s18, 256  ;;  %p8538_p2 = scmp.lt.s32.totalorder %s80_s18, %s80_s18 }
  0x65   :  { %p8534_p1 = scmp.ne.s32.totalorder %s80_s18, %s8533_s3  ;;  %p8539_p3 = scmp.lt.s32.totalorder %s8533_s3, %s8533_s3 }
  0x67   :  { %p8540_p4 = por %p8539_p3, %p8538_p2 }
  0x69   :  { %p8541_p5 = pnand %p8540_p4, %p8534_p1 }
  0x6b   :  { %8544 = shalt.err (!%p8541_p5)
}
  0x6c   :  { %85 = dma.hbm_to_vmem [thread:$0]  %s9113_s6, 256, %s80_s18, [#allocation9], %s8605_s26, %s8605_s26, %s8606_s27  }
  0x6d   :  { %s8545_s30 = scalar_lea.hbm %s9117_s10, 48 }
  0x6e   :  { %p8546_p6 = scmp.ne.s32.totalorder %s9117_s10, %s8545_s30  ;;  %p8549_p7 = scmp.lt.u32.totalorder %s8545_s30, %s9117_s10 }
  0x70   :  { %p8551_p8 = pnand %p8549_p7, %p8546_p6 }
  0x72   :  { %8554 = shalt.err (!%p8551_p8)
}
  0x73   :  { %s8555_s13 = scalar_lea.vmem %s108_s20, 48  ;;  %s8559_s14 = scalar_lea.vmem %s108_s20, 64 }
  0x74   :  { %p8556_p9 = scmp.ne.s32.totalorder %s108_s20, %s8555_s13  ;;  %p8560_p10 = scmp.lt.s32.totalorder %s108_s20, %s108_s20 }
  0x75   :  { %p8561_p11 = scmp.lt.s32.totalorder %s8559_s14, %s8555_s13 }
  0x77   :  { %p8562_p12 = por %p8561_p11, %p8560_p10 }
  0x79   :  { %p8563_p13 = pnand %p8562_p12, %p8556_p9 }
  0x7b   :  { %8566 = shalt.err (!%p8563_p13)
}
  0x7c   :  { %s8612_s6 = smov 16   ;;  %s8613_s26 = smov 1  }
  0x7d   :  { %113 = dma.hbm_to_vmem [thread:$0]  %s9117_s10, 48, %s108_s20, [#allocation12], %s8612_s6, %s8612_s6, %s8613_s26  }
  0x7e   :  { %s8614_s19 = smov [#allocation14]   ;;  %s8567_s23 = scalar_lea.hbm %s9118_s11, 48 }
  0x7f   :  { %s119_s7 = sshll.u32 %s8614_s19, 4  ;;  %p8568_p0 = scmp.ne.s32.totalorder %s9118_s11, %s8567_s23  ;;  %s120_s7 = int_to_ptr.vmem [resolvable:$true] %s119_s7 }
  0x80   :  { %p8571_p1 = scmp.lt.u32.totalorder %s8567_s23, %s9118_s11 }
  0x82   :  { %p8573_p2 = pnand %p8571_p1, %p8568_p0 }
  0x84   :  { %8576 = shalt.err (!%p8573_p2)
}
  0x85   :  { %s8577_s22 = scalar_lea.vmem %s120_s7, 48  ;;  %s8581_s10 = scalar_lea.vmem %s120_s7, 64 }
  0x86   :  { %p8578_p3 = scmp.ne.s32.totalorder %s120_s7, %s8577_s22  ;;  %p8582_p4 = scmp.lt.s32.totalorder %s120_s7, %s120_s7 }
  0x87   :  { %p8583_p5 = scmp.lt.s32.totalorder %s8581_s10, %s8577_s22 }
  0x89   :  { %p8584_p6 = por %p8583_p5, %p8582_p4 }
  0x8b   :  { %p8585_p7 = pnand %p8584_p6, %p8578_p3 }
  0x8d   :  { %8588 = shalt.err (!%p8585_p7)
}
  0x8e   :  { %125 = dma.hbm_to_vmem [thread:$0]  %s9118_s11, 48, %s120_s7, [#allocation15], %s8612_s6, %s8612_s6, %s8613_s26  }
  0x8f   :  { %8589 = dma.done.wait [#allocation4], 4800  }
  0x90   :  { %8590 = vsyncadd [#allocation4], 4294962496 }
  0x91   :  { %8591 = dma.done.wait [#allocation6], 69552  }
  0x92   :  { %8592 = vsyncadd [#allocation6], 4294897744 }
  0x93   :  { %8593 = dma.done.wait [#allocation9], 272  }
  0x94   :  { %8594 = vsyncadd [#allocation9], 4294967024 }
  0x95   :  { %8595 = dma.done.wait [#allocation12], 304  }
  0x96   :  { %8596 = vsyncadd [#allocation12], 4294966992 }
  0x97   :  { %8597 = dma.done.wait [#allocation15], 48  }
  0x98   :  { %8598 = vsyncadd [#allocation15], 4294967248  ;;  %v8615_v1 = vmov 0   ;;  %v7613_v2 = vld [vmem:[#allocation3 + $0x4] ss:$12 sps:$4 sm:$0xff]   ;;  %vm412_vm0 = vcmask 588800  }
  0x99   :  { %469 = vmatprep.subr.bf16.mxu1 %v8615_v1  ;;  %v7615_v3 = vld [vmem:[#allocation3] ss:$12 sps:$4 sm:$0xff]   ;;  %426 = vmatprep.subr.bf16.mxu0 %v7613_v2  ;;  %v7616_v4 = vld [vmem:[#allocation3 + $0x1c] ss:$12 sps:$4 sm:$0xff]   ;;  %v7618_v5 = vld [vmem:[#allocation3 + $0x18] ss:$12 sps:$4 sm:$0xff]  }
  0x9a   :  { %427 = vmatpush1.bf16.msra.mxu0 %v7615_v3  ;;  %v7619_v6 = vld [vmem:[#allocation3 + $0x34] ss:$12 sps:$4 sm:$0xff]   ;;  %v7621_v8 = vld [vmem:[#allocation3 + $0x30] ss:$12 sps:$4 sm:$0xff]   ;;  %v7622_v9 = vld [vmem:[#allocation3 + $0x4c] ss:$12 sps:$4 sm:$0xff]  }
  0x9b   :  { %428 = vmatprep.subr.bf16.mxu0 %v7616_v4  ;;  %v7625_v7 = vld [vmem:[#allocation3 + $0x8] ss:$12 sps:$4 sm:$0xff]   ;;  %v7629_v10 = vld [vmem:[#allocation3 + $0x20] ss:$12 sps:$4 sm:$0xff]   ;;  %v7626_v12 = vld [vmem:[#allocation3 + $0x64] ss:$12 sps:$4 sm:$0xff]  }
  0x9c   :  { %470 = vmatpush1.bf16.msra.mxu1 %v7625_v7  ;;  %v7624_v11 = vld [vmem:[#allocation3 + $0x48] ss:$12 sps:$4 sm:$0xff]   ;;  %v7633_v13 = vld [vmem:[#allocation3 + $0x38] ss:$12 sps:$4 sm:$0xff]   ;;  %v7628_v14 = vld [vmem:[#allocation3 + $0x60] ss:$12 sps:$4 sm:$0xff]  }
  0x9d   :  { %471 = vmatprep.subr.bf16.mxu1 %v8615_v1  ;;  %v7630_v15 = vld [vmem:[#allocation3 + $0x7c] ss:$12 sps:$4 sm:$0xff]   ;;  %v7632_v17 = vld [vmem:[#allocation3 + $0x78] ss:$12 sps:$4 sm:$0xff]   ;;  %v7634_v18 = vld [vmem:[#allocation3 + $0x94] ss:$12 sps:$4 sm:$0xff]  }
  0x9e   :  { %429 = vmatpush1.bf16.msra.mxu0 %v7618_v5  ;;  %v7637_v16 = vld [vmem:[#allocation3 + $0x50] ss:$12 sps:$4 sm:$0xff]   ;;  %v7641_v19 = vld [vmem:[#allocation3 + $0x68] ss:$12 sps:$4 sm:$0xff]   ;;  %v7638_v21 = vld [vmem:[#allocation3 + $0xac] ss:$12 sps:$4 sm:$0xff]  }
  0x9f   :  { %430 = vmatprep.subr.bf16.mxu0 %v7619_v6  ;;  %v7636_v20 = vld [vmem:[#allocation3 + $0x90] ss:$12 sps:$4 sm:$0xff]   ;;  %v7645_v22 = vld [vmem:[#allocation3 + $0x80] ss:$12 sps:$4 sm:$0xff]   ;;  %v7640_v23 = vld [vmem:[#allocation3 + $0xa8] ss:$12 sps:$4 sm:$0xff]  }
  0xa0   :  { %472 = vmatpush1.bf16.msra.mxu1 %v7629_v10  ;;  %v7662_v24 = vld [vmem:[%s9107_s0 + $0x4] ss:$8 sps:$4 sm:$0xff]   ;;  %v7653_v29 = vld [vmem:[#allocation3 + $0xb0] ss:$12 sps:$4 sm:$0xff]   ;;  %vm416_vm1 = vcmask 1043456   ;;  %vm8617_vm2 = vmmov 0  }
  0xa1   :  { %473 = vmatprep.subr.bf16.mxu1 %v8615_v1  ;;  %v7642_v25 = vld [vmem:[#allocation3 + $0xc4] ss:$12 sps:$4 sm:$0xff]   ;;  %6501 = vmatprep.mubr.msk.bf16.mxu0 %vm412_vm0, %v7662_v24  ;;  %v7644_v27 = vld [vmem:[#allocation3 + $0xc0] ss:$12 sps:$4 sm:$0xff]   ;;  %v7646_v28 = vld [vmem:[#allocation3 + $0xdc] ss:$12 sps:$4 sm:$0xff]  }
  0xa2   :  { %431 = vmatpush1.bf16.msra.mxu0 %v7621_v8  ;;  %v7649_v26 = vld [vmem:[#allocation3 + $0x98] ss:$12 sps:$4 sm:$0xff]   ;;  %6502 = vmatprep.mubr.msk.bf16.mxu1 %vm412_vm0, %v7662_v24  ;;  %v7650_v31 = vld [vmem:[#allocation3 + $0xf4] ss:$12 sps:$4 sm:$0xff]   ;;  %v7652_v33 = vld [vmem:[#allocation3 + $0xf0] ss:$12 sps:$4 sm:$0xff]  }
  0xa3   :  { %432 = vmatprep.subr.bf16.mxu0 %v7622_v9  ;;  %v7648_v30 = vld [vmem:[#allocation3 + $0xd8] ss:$12 sps:$4 sm:$0xff]   ;;  %v7657_v32 = vld [vmem:[#allocation3 + $0xc8] ss:$12 sps:$4 sm:$0xff]   ;;  %v7663_v35 = vld [vmem:[#allocation3 + $0xe0] ss:$12 sps:$4 sm:$0xff]  }
  0xa4   :  { %474 = vmatpush1.bf16.msra.mxu1 %v7633_v13  ;;  %v7654_v34 = vld [vmem:[#allocation3 + $0x10c] ss:$12 sps:$4 sm:$0xff]   ;;  %v201_v36 = vld [vmem:[#allocation3 + $0x120] sm:$0xff]  ;;  %v7656_v37 = vld [vmem:[#allocation3 + $0x108] ss:$12 sps:$4 sm:$0xff]   ;;  %vm936_vm3 = vcmask 523264  }
  0xa5   :  { %475 = vmatprep.subr.bf16.mxu1 %v8615_v1  ;;  %v6498_v38 = vcombine.high %v201_v36, %v201_v36  ;;  %v6497_v39 = vcombine.low %v201_v36, %v201_v36  ;;  %v7664_v40 = vld [vmem:[#allocation3 + $0xf8] ss:$12 sps:$4 sm:$0xff]   ;;  %v7666_v41 = vld [vmem:[#allocation3 + $0x128] ss:$0 sps:$4 sm:$0xff]   ;;  %v7665_v43 = vld [vmem:[#allocation3 + $0x110] ss:$12 sps:$4 sm:$0xff]  }
  0xa6   :  { %433 = vmatpush1.bf16.msra.mxu0 %v7624_v11  ;;  %v7669_v44 = vld [vmem:[#allocation5 + $0x4] ss:$12 sps:$4 sm:$0xff]   ;;  %v424_v46 = vsel %vm416_vm1, %v7666_v41, 0  ;;  %v7667_v47 = vld [vmem:[#allocation5] ss:$12 sps:$4 sm:$0xff]   ;;  %vm6179_vm4 = vcmask 261120  }
  0xa7   :  { %434 = vmatprep.subr.bf16.mxu0 %v7626_v12  ;;  %v418_v42 = vsel %vm416_vm1, %v6497_v39, 0  ;;  %v7660_v45 = vld [vmem:[%s9107_s0] ss:$8 sps:$4 sm:$0xff]   ;;  %v7699_v53 = vld [vmem:[#allocation5 + $0xe0] ss:$12 sps:$4 sm:$0xff]   ;;  %vm6225_vm5 = vcmask 1041409  }
  0xa8   :  { %476 = vmatpush1.bf16.msra.mxu1 %v7637_v16  ;;  %v7672_v48 = vld [vmem:[#allocation5 + $0x1c] ss:$12 sps:$4 sm:$0xff]   ;;  %v7670_v50 = vld [vmem:[#allocation5 + $0x18] ss:$12 sps:$4 sm:$0xff]   ;;  %v7675_v51 = vld [vmem:[#allocation5 + $0x34] ss:$12 sps:$4 sm:$0xff]  }
  0xa9   :  { %477 = vmatprep.subr.bf16.mxu1 %v8615_v1  ;;  %v7694_v49 = vld [vmem:[#allocation5 + $0xc8] ss:$12 sps:$4 sm:$0xff]   ;;  %v7673_v54 = vld [vmem:[#allocation5 + $0x30] ss:$12 sps:$4 sm:$0xff]   ;;  %v7678_v55 = vld [vmem:[#allocation5 + $0x4c] ss:$12 sps:$4 sm:$0xff]  }
  0xaa   :  { %435 = vmatpush1.bf16.msra.mxu0 %v7628_v14  ;;  %v7695_v52 = vld [vmem:[#allocation5 + $0x8] ss:$12 sps:$4 sm:$0xff]   ;;  %v7700_v56 = vld [vmem:[#allocation5 + $0x20] ss:$12 sps:$4 sm:$0xff]   ;;  %v7704_v57 = vld [vmem:[#allocation5 + $0xf8] ss:$12 sps:$4 sm:$0xff]  }
  0xab   :  { %436 = vmatprep.subr.bf16.mxu0 %v7630_v15  ;;  %v7676_v58 = vld [vmem:[#allocation5 + $0x48] ss:$12 sps:$4 sm:$0xff]   ;;  %v7681_v59 = vld [vmem:[#allocation5 + $0x64] ss:$12 sps:$4 sm:$0xff]   ;;  %v7679_v62 = vld [vmem:[#allocation5 + $0x60] ss:$12 sps:$4 sm:$0xff]  }
  0xac   :  { %478 = vmatpush1.bf16.msra.mxu1 %v7641_v19  ;;  %v7705_v60 = vld [vmem:[#allocation5 + $0x38] ss:$12 sps:$4 sm:$0xff]   ;;  %v7709_v61 = vld [vmem:[#allocation5 + $0x110] ss:$12 sps:$4 sm:$0xff]   ;;  %v7714_v2 = vld [vmem:[#allocation5 + $0x128] ss:$12 sps:$4 sm:$0xff]  }
  0xad   :  { %479 = vmatprep.subr.bf16.mxu1 %v8615_v1  ;;  %v7684_v63 = vld [vmem:[#allocation5 + $0x7c] ss:$12 sps:$4 sm:$0xff]   ;;  %v7682_v3 = vld [vmem:[#allocation5 + $0x78] ss:$12 sps:$4 sm:$0xff]   ;;  %v7687_v4 = vld [vmem:[#allocation5 + $0x94] ss:$12 sps:$4 sm:$0xff]  }
  0xae   :  { %437 = vmatpush1.bf16.msra.mxu0 %v7632_v17  ;;  %v7710_v0 = vld [vmem:[#allocation5 + $0x50] ss:$12 sps:$4 sm:$0xff]   ;;  %v7715_v5 = vld [vmem:[#allocation5 + $0x68] ss:$12 sps:$4 sm:$0xff]   ;;  %v7719_v6 = vld [vmem:[#allocation5 + $0x140] ss:$12 sps:$4 sm:$0xff]  }
  0xaf   :  { %438 = vmatprep.subr.bf16.mxu0 %v7634_v18  ;;  %v7685_v7 = vld [vmem:[#allocation5 + $0x90] ss:$12 sps:$4 sm:$0xff]   ;;  %v7690_v8 = vld [vmem:[#allocation5 + $0xac] ss:$12 sps:$4 sm:$0xff]   ;;  %v7688_v10 = vld [vmem:[#allocation5 + $0xa8] ss:$12 sps:$4 sm:$0xff]  }
  0xb0   :  { %480 = vmatpush1.bf16.msra.mxu1 %v7645_v22  ;;  %v7720_v9 = vld [vmem:[#allocation5 + $0x80] ss:$12 sps:$4 sm:$0xff]   ;;  %v7693_v11 = vld [vmem:[#allocation5 + $0xc4] ss:$12 sps:$4 sm:$0xff]   ;;  %v7698_v13 = vld [vmem:[#allocation5 + $0xdc] ss:$12 sps:$4 sm:$0xff]  }
  0xb1   :  { %481 = vmatprep.subr.bf16.mxu1 %v8615_v1  ;;  %v7691_v12 = vld [vmem:[#allocation5 + $0xc0] ss:$12 sps:$4 sm:$0xff]   ;;  %v7696_v14 = vld [vmem:[#allocation5 + $0xd8] ss:$12 sps:$4 sm:$0xff]   ;;  %v7701_v16 = vld [vmem:[#allocation5 + $0xf0] ss:$12 sps:$4 sm:$0xff]  }
  0xb2   :  { %439 = vmatpush1.bf16.msra.mxu0 %v7636_v20  ;;  %v7703_v15 = vld [vmem:[#allocation5 + $0xf4] ss:$12 sps:$4 sm:$0xff]   ;;  %v7708_v17 = vld [vmem:[#allocation5 + $0x10c] ss:$12 sps:$4 sm:$0xff]   ;;  %v7713_v19 = vld [vmem:[#allocation5 + $0x124] ss:$12 sps:$4 sm:$0xff]  }
  0xb3   :  { %440 = vmatprep.subr.bf16.mxu0 %v7638_v21  ;;  %v7706_v18 = vld [vmem:[#allocation5 + $0x108] ss:$12 sps:$4 sm:$0xff]   ;;  %v7711_v20 = vld [vmem:[#allocation5 + $0x120] ss:$12 sps:$4 sm:$0xff]   ;;  %v7716_v22 = vld [vmem:[#allocation5 + $0x138] ss:$12 sps:$4 sm:$0xff]  }
  0xb4   :  { %482 = vmatpush1.bf16.msra.mxu1 %v7649_v26  ;;  %v7718_v21 = vld [vmem:[#allocation5 + $0x13c] ss:$12 sps:$4 sm:$0xff]   ;;  %v7724_v24 = vld [vmem:[#allocation5 + $0x158] ss:$12 sps:$4 sm:$0xff]   ;;  %v7731_v41 = vld [vmem:[#allocation5 + $0x180] ss:$12 sps:$4 sm:$0xff]  }
  0xb5   :  { %483 = vmatprep.subr.bf16.mxu1 %v8615_v1  ;;  %v7725_v26 = vld [vmem:[#allocation5 + $0x98] ss:$12 sps:$4 sm:$0xff]   ;;  %vm6448_vm6 = vcmask 1024  }
  0xb6   :  { %441 = vmatpush1.bf16.msra.mxu0 %v7640_v23  ;;  %v7723_v23 = vld [vmem:[#allocation5 + $0x154] ss:$12 sps:$4 sm:$0xff]  }
  0xb7   :  { %442 = vmatprep.subr.bf16.mxu0 %v7642_v25  ;;  %v7721_v25 = vld [vmem:[#allocation5 + $0x150] ss:$12 sps:$4 sm:$0xff]  }
  0xb8   :  { %484 = vmatpush1.bf16.msra.mxu1 %v7653_v29  ;;  %v7726_v29 = vld [vmem:[#allocation5 + $0x168] ss:$12 sps:$4 sm:$0xff]  }
  0xb9   :  { %485 = vmatprep.subr.bf16.mxu1 %v8615_v1 }
  0xba   :  { %443 = vmatpush1.bf16.msra.mxu0 %v7644_v27  ;;  %v7728_v27 = vld [vmem:[#allocation5 + $0x16c] ss:$12 sps:$4 sm:$0xff]  }
  0xbb   :  { %444 = vmatprep.subr.bf16.mxu0 %v7646_v28  ;;  %v7729_v28 = vld [vmem:[#allocation5 + $0x170] ss:$12 sps:$4 sm:$0xff]  }
  0xbc   :  { %486 = vmatpush1.bf16.msra.mxu1 %v7657_v32  ;;  %v8616_v32 = vmov 0.0  }
  0xbd   :  { %487 = vmatprep.subr.bf16.mxu1 %v8615_v1 }
  0xbe   :  { %445 = vmatpush1.bf16.msra.mxu0 %v7648_v30  ;;  %v7730_v30 = vld [vmem:[#allocation5 + $0xb0] ss:$12 sps:$4 sm:$0xff]  }
  0xbf   :  { %446 = vmatprep.subr.bf16.mxu0 %v7650_v31  ;;  %v7733_v31 = vld [vmem:[#allocation5 + $0x184] ss:$12 sps:$4 sm:$0xff]  }
  0xc0   :  { %488 = vmatpush1.bf16.msra.mxu1 %v7663_v35 }
  0xc1   :  { %489 = vmatprep.subr.bf16.mxu1 %v8615_v1 }
  0xc2   :  { %447 = vmatpush1.bf16.msra.mxu0 %v7652_v33 }
  0xc3   :  { %448 = vmatprep.subr.bf16.mxu0 %v7654_v34 }
  0xc4   :  { %490 = vmatpush1.bf16.msra.mxu1 %v7664_v40 }
  0xc5   :  { %491 = vmatprep.subr.bf16.mxu1 %v8615_v1 }
  0xc6   :  { %449 = vmatpush1.bf16.msra.mxu0 %v7656_v37 }
  0xc7   :  { %6500 = vmatprep.subr.msk.bf16.mxu0 %vm416_vm1, %v6498_v38 }
  0xc8   :  { %492 = vmatpush1.bf16.msra.mxu1 %v7665_v43 }
  0xc9   :  { %493 = vmatprep.subr.bf16.mxu1 %v8615_v1 }
  0xca   :  { %451 = vmatpush1.bf16.msra.mxu0 %v418_v42  ;;  %v7734_v42 = vld [vmem:[#allocation5 + $0x188] ss:$12 sps:$4 sm:$0xff]  }
  0xcb   :  { %940 = vmatprep.subr.bf16.mxu0 %v7669_v44  ;;  %v7737_v44 = vld [vmem:[#allocation5 + $0x19c] ss:$12 sps:$4 sm:$0xff]  }
  0xcc   :  { %494 = vmatpush1.bf16.msra.mxu1 %v424_v46 }
  0xcd   :  { %459 = vmatmul.mubr.bf16.vlgmr.msra.gmra.mrb[0].mxu0 %v7660_v45  ;;  %7099 = vmatprep.subr.bf16.mxu1 %v7694_v49 }
  0xce   :  { %941 = vmatpush1.bf16.msra.mxu0 %v7667_v47 }
  0xcf   :  { %942 = vmatprep.subr.bf16.mxu0 %v7672_v48  ;;  %502 = vmatmul.mubr.bf16.vlgmr.msra.gmra.mrb[0].mxu1 %v7660_v45 }
  0xd0   :  { %7100 = vmatpush3.bf16.msra.mxu1 %v7695_v52 }
  0xd1   :  { %7101 = vmatprep.subr.bf16.mxu1 %v7699_v53 }
  0xd2   :  { %943 = vmatpush1.bf16.msra.mxu0 %v7670_v50  ;;  %v7735_v50 = vld [vmem:[#allocation5 + $0x198] ss:$12 sps:$4 sm:$0xff]  }
  0xd3   :  { %944 = vmatprep.subr.bf16.mxu0 %v7675_v51  ;;  %v7738_v51 = vld [vmem:[#allocation5 + $0x1a0] ss:$12 sps:$4 sm:$0xff]  }
  0xd4   :  { %7102 = vmatpush3.bf16.msra.mxu1 %v7700_v56  ;;  %v7739_v56 = vld [vmem:[#allocation5 + $0x1b0] ss:$12 sps:$4 sm:$0xff]  }
  0xd5   :  { %7103 = vmatprep.subr.bf16.mxu1 %v7704_v57  ;;  %v7742_v57 = vld [vmem:[#allocation5 + $0x1b8] ss:$12 sps:$4 sm:$0xff]  }
  0xd6   :  { %945 = vmatpush1.bf16.msra.mxu0 %v7673_v54  ;;  %v7741_v54 = vld [vmem:[#allocation5 + $0x1b4] ss:$12 sps:$4 sm:$0xff]  }
  0xd7   :  { %946 = vmatprep.subr.bf16.mxu0 %v7678_v55 }
  0xd8   :  { %7104 = vmatpush3.bf16.msra.mxu1 %v7705_v60  ;;  %v7746_v60 = vld [vmem:[#allocation5 + $0x1d0] ss:$12 sps:$4 sm:$0xff]  }
  0xd9   :  { %7105 = vmatprep.subr.bf16.mxu1 %v7709_v61  ;;  %v7749_v61 = vld [vmem:[#allocation5 + $0x1e4] ss:$12 sps:$4 sm:$0xff]  }
  0xda   :  { %947 = vmatpush1.bf16.msra.mxu0 %v7676_v58  ;;  %v7745_v58 = vld [vmem:[#allocation5 + $0x1cc] ss:$12 sps:$4 sm:$0xff]  }
  0xdb   :  { %948 = vmatprep.subr.bf16.mxu0 %v7681_v59  ;;  %v7743_v59 = vld [vmem:[#allocation5 + $0x1c8] ss:$12 sps:$4 sm:$0xff]  }
  0xdc   :  { %7106 = vmatpush3.bf16.msra.mxu1 %v7710_v0  ;;  %v7775_v0 = vld [vmem:[#allocation5 + $0x1e8] ss:$12 sps:$4 sm:$0xff]  }
  0xdd   :  { %7107 = vmatprep.subr.bf16.mxu1 %v7714_v2  ;;  %v7752_v2 = vld [vmem:[#allocation5 + $0x1fc] ss:$12 sps:$4 sm:$0xff]  }
  0xde   :  { %949 = vmatpush1.bf16.msra.mxu0 %v7679_v62  ;;  %v7774_v62 = vld [vmem:[#allocation5 + $0x2a8] ss:$12 sps:$4 sm:$0xff]  }
  0xdf   :  { %950 = vmatprep.subr.bf16.mxu0 %v7684_v63  ;;  %v7747_v63 = vld [vmem:[#allocation5 + $0x1e0] ss:$12 sps:$4 sm:$0xff]  }
  0xe0   :  { %7108 = vmatpush3.bf16.msra.mxu1 %v7715_v5  ;;  %v7780_v5 = vld [vmem:[#allocation5 + $0x200] ss:$12 sps:$4 sm:$0xff]  }
  0xe1   :  { %7109 = vmatprep.subr.bf16.mxu1 %v7719_v6  ;;  %v7755_v6 = vld [vmem:[#allocation5 + $0x214] ss:$12 sps:$4 sm:$0xff]  }
  0xe2   :  { %951 = vmatpush1.bf16.msra.mxu0 %v7682_v3  ;;  %v7779_v3 = vld [vmem:[#allocation5 + $0x2c0] ss:$12 sps:$4 sm:$0xff]  }
  0xe3   :  { %952 = vmatprep.subr.bf16.mxu0 %v7687_v4  ;;  %v7750_v4 = vld [vmem:[#allocation5 + $0x1f8] ss:$12 sps:$4 sm:$0xff]  }
  0xe4   :  { %7110 = vmatpush3.bf16.msra.mxu1 %v7720_v9  ;;  %v7756_v9 = vld [vmem:[#allocation5 + $0x228] ss:$12 sps:$4 sm:$0xff]  }
  0xe5   :  { %7111 = vmatprep.subr.bf16.mxu1 %v7724_v24  ;;  %v7781_v24 = vld [vmem:[#allocation5 + $0x2d0] ss:$12 sps:$4 sm:$0xff]  }
  0xe6   :  { %953 = vmatpush1.bf16.msra.mxu0 %v7685_v7  ;;  %v7753_v7 = vld [vmem:[#allocation5 + $0x210] ss:$12 sps:$4 sm:$0xff]  }
  0xe7   :  { %954 = vmatprep.subr.bf16.mxu0 %v7690_v8  ;;  %v7758_v8 = vld [vmem:[#allocation5 + $0x22c] ss:$12 sps:$4 sm:$0xff]  }
  0xe8   :  { %7112 = vmatpush3.bf16.msra.mxu1 %v7725_v26  ;;  %v7786_v26 = vld [vmem:[#allocation5 + $0x2e8] ss:$12 sps:$4 sm:$0xff]  }
  0xe9   :  { %7113 = vmatprep.subr.bf16.mxu1 %v7729_v28  ;;  %v7789_v28 = vld [vmem:[#allocation5 + $0x2f0] ss:$12 sps:$4 sm:$0xff]  }
  0xea   :  { %955 = vmatpush1.bf16.msra.mxu0 %v7688_v10  ;;  %v7761_v10 = vld [vmem:[#allocation5 + $0x244] ss:$12 sps:$4 sm:$0xff]  }
  0xeb   :  { %956 = vmatprep.subr.bf16.mxu0 %v7693_v11  ;;  %v7759_v11 = vld [vmem:[#allocation5 + $0x240] ss:$12 sps:$4 sm:$0xff]  }
  0xec   :  { %7114 = vmatpush3.bf16.msra.mxu1 %v7730_v30  ;;  %v7793_v30 = vld [vmem:[#allocation5 + $0x304] ss:$12 sps:$4 sm:$0xff]  }
  0xed   :  { %7378 = vmatprep.subr.bf16.mxu1 %v8616_v32 }
  0xee   :  { %957 = vmatpush1.bf16.msra.mxu0 %v7691_v12  ;;  %v7764_v12 = vld [vmem:[#allocation5 + $0x25c] ss:$12 sps:$4 sm:$0xff]  }
  0xef   :  { %958 = vmatprep.subr.bf16.mxu0 %v7698_v13  ;;  %v7762_v13 = vld [vmem:[#allocation5 + $0x258] ss:$12 sps:$4 sm:$0xff]  }
  0xf2   :  { %959 = vmatpush1.bf16.msra.mxu0 %v7696_v14  ;;  %v7767_v14 = vld [vmem:[#allocation5 + $0x274] ss:$12 sps:$4 sm:$0xff]  }
  0xf3   :  { %960 = vmatprep.subr.bf16.mxu0 %v7703_v15  ;;  %v7765_v15 = vld [vmem:[#allocation5 + $0x270] ss:$12 sps:$4 sm:$0xff]  }
  0xf6   :  { %961 = vmatpush1.bf16.msra.mxu0 %v7701_v16  ;;  %v7770_v16 = vld [vmem:[#allocation5 + $0x28c] ss:$12 sps:$4 sm:$0xff]  }
  0xf7   :  { %962 = vmatprep.subr.bf16.mxu0 %v7708_v17  ;;  %v7768_v17 = vld [vmem:[#allocation5 + $0x288] ss:$12 sps:$4 sm:$0xff]  }
  0xfa   :  { %963 = vmatpush1.bf16.msra.mxu0 %v7706_v18  ;;  %v7773_v18 = vld [vmem:[#allocation5 + $0x2a4] ss:$12 sps:$4 sm:$0xff]  }
  0xfb   :  { %964 = vmatprep.subr.bf16.mxu0 %v7713_v19  ;;  %v7771_v19 = vld [vmem:[#allocation5 + $0x2a0] ss:$12 sps:$4 sm:$0xff]  }
  0xfe   :  { %965 = vmatpush1.bf16.msra.mxu0 %v7711_v20  ;;  %v7778_v20 = vld [vmem:[#allocation5 + $0x2bc] ss:$12 sps:$4 sm:$0xff]  }
  0xff   :  { %966 = vmatprep.subr.bf16.mxu0 %v7718_v21  ;;  %v7776_v21 = vld [vmem:[#allocation5 + $0x2b8] ss:$12 sps:$4 sm:$0xff]  }
 0x102   :  { %967 = vmatpush1.bf16.msra.mxu0 %v7716_v22  ;;  %v7783_v22 = vld [vmem:[#allocation5 + $0x2d4] ss:$12 sps:$4 sm:$0xff]  }
 0x103   :  { %968 = vmatprep.subr.bf16.mxu0 %v7723_v23  ;;  %v7784_v23 = vld [vmem:[#allocation5 + $0x2d8] ss:$12 sps:$4 sm:$0xff]  }
 0x106   :  { %969 = vmatpush1.bf16.msra.mxu0 %v7721_v25  ;;  %v7785_v25 = vld [vmem:[#allocation5 + $0x218] ss:$12 sps:$4 sm:$0xff]  }
 0x107   :  { %970 = vmatprep.subr.bf16.mxu0 %v7728_v27  ;;  %v7788_v27 = vld [vmem:[#allocation5 + $0x2ec] ss:$12 sps:$4 sm:$0xff]  }
 0x10a   :  { %971 = vmatpush1.bf16.msra.mxu0 %v7726_v29  ;;  %v7790_v29 = vld [vmem:[#allocation5 + $0x230] ss:$12 sps:$4 sm:$0xff]  }
 0x10b   :  { %983 = vmatprep.subr.bf16.mxu0 %v7733_v31  ;;  %v7794_v31 = vld [vmem:[#allocation5 + $0x308] ss:$12 sps:$4 sm:$0xff]  }
 0x1a0   :  { %v8829_v33 = vpop.f32.mrb[0].mxu0 }
 0x1a1   :  { %v510_v34 = vmax.f32 %v8829_v33, 0.0  ;;  %v8832_v35 = vpop.f32.mrb[1].mxu0 }
 0x1a2   :  { %v511_v36 = vmax.f32 %v8832_v35, 0.0  ;;  %v8835_v37 = vpop.f32.mrb[2].mxu0  ;;  %v8841_v45 = vpop.f32.mrb[0].mxu1 }
 0x1a3   :  { %v513_v38 = vmax.f32 %v8835_v37, 0.0  ;;  %v8838_v39 = vpop.f32.mrb[3].mxu0  ;;  %v512_v47 = vmax.f32 %v8841_v45, 0.0  ;;  %v505_v48 = vpop.f32.mrb[1].mxu1 }
 0x1a4   :  { %v514_v40 = vmax.f32 %v8838_v39, 0.0  ;;  %v8844_v49 = vpop.f32.mrb[2].mxu1  ;;  %v7808_v48 = vld [vmem:[#allocation5 + $0x34c] ss:$12 sps:$4 sm:$0xff]  }
 0x1a5   :  { %v516_v43 = vpack.c.bf16 %v513_v38, %v510_v34  ;;  %v515_v52 = vmax.f32 %v8844_v49, 0.0  ;;  %v508_v53 = vpop.f32.mrb[3].mxu1  ;;  %v7791_v34 = vld [vmem:[#allocation5 + $0x300] ss:$12 sps:$4 sm:$0xff]   ;;  %v7798_v38 = vld [vmem:[#allocation5 + $0x31c] ss:$12 sps:$4 sm:$0xff]  }
 0x1a6   :  { %v517_v46 = vpack.c.bf16 %v514_v40, %v511_v36  ;;  %v7795_v36 = vld [vmem:[#allocation5 + $0x248] ss:$12 sps:$4 sm:$0xff]   ;;  %v7799_v40 = vld [vmem:[#allocation5 + $0x320] ss:$12 sps:$4 sm:$0xff]   ;;  %v7813_v53 = vld [vmem:[#allocation5 + $0x364] ss:$12 sps:$4 sm:$0xff]  }
 0x1a7   :  { %v518_v55 = vpack.c.bf16 %v515_v52, %v512_v47  ;;  %v7805_v47 = vld [vmem:[#allocation5 + $0x278] ss:$12 sps:$4 sm:$0xff]   ;;  %v7810_v52 = vld [vmem:[#allocation5 + $0x290] ss:$12 sps:$4 sm:$0xff]  }
 0x1a8   :  { %972 = vmatprep.mubr.bf16.mxu0 %v517_v46  ;;  %1058 = vmatprep.mubr.bf16.mxu1 %v517_v46  ;;  %v7801_v46 = vld [vmem:[#allocation5 + $0x330] ss:$12 sps:$4 sm:$0xff]  }
 0x1a9   :  { %973 = vmatmul.mubr.bf16.vlgmr.msra.gmra.mrb[4].mxu0 %v516_v43  ;;  %1059 = vmatmul.mubr.bf16.vlgmr.msra.gmra.mrb[4].mxu1 %v516_v43  ;;  %v7803_v43 = vld [vmem:[#allocation5 + $0x334] ss:$12 sps:$4 sm:$0xff]  }
 0x1aa   :  { %984 = vmatpush1.bf16.msra.mxu0 %v7731_v41  ;;  %7379 = vmatpush3.bf16.msra.mxu1 %v7734_v42  ;;  %v7796_v41 = vld [vmem:[#allocation5 + $0x318] ss:$12 sps:$4 sm:$0xff]   ;;  %v7800_v42 = vld [vmem:[#allocation5 + $0x260] ss:$12 sps:$4 sm:$0xff]  }
 0x1ab   :  { %985 = vmatprep.subr.bf16.mxu0 %v7737_v44  ;;  %7380 = vmatprep.subr.bf16.mxu1 %v8616_v32  ;;  %v7804_v44 = vld [vmem:[#allocation5 + $0x338] ss:$12 sps:$4 sm:$0xff]  }
 0x1ac   :  { %1015 = vmatprep.mubr.bf16.mxu0 %v8615_v1  ;;  %7386 = vmatprep.mubr.msk.bf16.mxu1 %vm8617_vm2, %v8616_v32 }
 0x1ae   :  { %986 = vmatpush1.bf16.msra.mxu0 %v7735_v50  ;;  %7381 = vmatpush3.bf16.msra.mxu1 %v7738_v51  ;;  %v7809_v50 = vld [vmem:[#allocation5 + $0x350] ss:$12 sps:$4 sm:$0xff]   ;;  %v7806_v51 = vld [vmem:[#allocation5 + $0x348] ss:$12 sps:$4 sm:$0xff]  }
 0x1af   :  { %987 = vmatprep.subr.bf16.mxu0 %v7741_v54  ;;  %7382 = vmatprep.subr.bf16.mxu1 %v8616_v32  ;;  %v601_v54 = vlaneseq }
 0x1b2   :  { %988 = vmatpush1.bf16.msra.mxu0 %v7739_v56  ;;  %7383 = vmatpush3.bf16.msra.mxu1 %v7742_v57 }
 0x1b3   :  { %989 = vmatprep.subr.bf16.mxu0 %v7745_v58  ;;  %7384 = vmatprep.subr.bf16.mxu1 %v8616_v32 }
 0x1b6   :  { %990 = vmatpush1.bf16.msra.mxu0 %v7743_v59  ;;  %7385 = vmatpush3.bf16.msra.mxu1 %v7746_v60  ;;  %v602_v60 = vshrl.u32 %v601_v54, 7  ;;  %v7859_v54 = vld [vmem:[#allocation5 + $0x4a0] ss:$12 sps:$4 sm:$0xff]  }
 0x1b7   :  { %1539 = vmatprep.subr.bf16.mxu1 %v7749_v61  ;;  %7126 = vmatprep.subr.bf16.mxu0 %v7774_v62 }
 0x1b8   :  { %v8856_v62 = vsub.s32 2, %v602_v60 }
 0x1b9   :  { %6563 = vmatmul.mubr.msk.bf16.vlgmr.msra.gmra.mrb[4].mxu0 %vm936_vm3, %v518_v55  ;;  %7387 = vmatmul.mubr.msk.bf16.vlgmr.msra.gmra.mrb[8].mxu1 %vm936_vm3, %v518_v55 }
 0x1ba   :  { %1540 = vmatpush1.bf16.msra.mxu1 %v7747_v63  ;;  %7127 = vmatpush3.bf16.msra.mxu0 %v7775_v0  ;;  %v599_v63 = vld [vmem:[#allocation7] sm:$0x7]  ;;  %v8858_v0 = vsub.s32 0, %v602_v60 }
 0x1bb   :  { %1541 = vmatprep.subr.bf16.mxu1 %v7752_v2  ;;  %7128 = vmatprep.subr.bf16.mxu0 %v7779_v3  ;;  %v8860_v2 = vsub.s32 1, %v602_v60  ;;  %v612_v3 = vrot.slane %v599_v63, %v8856_v62  ;;  %v7836_v60 = vld [vmem:[#allocation5 + $0x408] ss:$12 sps:$4 sm:$0xff]  }
 0x1be   :  { %1542 = vmatpush1.bf16.msra.mxu1 %v7750_v4  ;;  %7129 = vmatpush3.bf16.msra.mxu0 %v7780_v5  ;;  %v604_v4 = vrot.slane %v599_v63, %v8858_v0  ;;  %v608_v5 = vrot.slane %v599_v63, %v8860_v2  ;;  %v7839_v63 = vld [vmem:[#allocation5 + $0x420] ss:$12 sps:$4 sm:$0xff]  }
 0x1bf   :  { %1543 = vmatprep.subr.bf16.mxu1 %v7755_v6  ;;  %7130 = vmatprep.subr.bf16.mxu0 %v7784_v23 }
 0x1c2   :  { %1544 = vmatpush1.bf16.msra.mxu1 %v7753_v7  ;;  %7131 = vmatpush3.bf16.msra.mxu0 %v7785_v25 }
 0x1c3   :  { %1545 = vmatprep.subr.bf16.mxu1 %v7758_v8  ;;  %7132 = vmatprep.subr.bf16.mxu0 %v7789_v28 }
 0x1c6   :  { %1546 = vmatpush1.bf16.msra.mxu1 %v7756_v9  ;;  %7133 = vmatpush3.bf16.msra.mxu0 %v7790_v29 }
 0x1c7   :  { %1547 = vmatprep.subr.bf16.mxu1 %v7761_v10  ;;  %7134 = vmatprep.subr.bf16.mxu0 %v7794_v31  ;;  %v7811_v31 = vld [vmem:[#allocation5 + $0x360] ss:$12 sps:$4 sm:$0xff]  }
 0x1ca   :  { %1548 = vmatpush1.bf16.msra.mxu1 %v7759_v11  ;;  %7135 = vmatpush3.bf16.msra.mxu0 %v7795_v36  ;;  %v7817_v36 = vld [vmem:[#allocation5 + $0x37c] ss:$12 sps:$4 sm:$0xff]  }
 0x1cb   :  { %1549 = vmatprep.subr.bf16.mxu1 %v7764_v12  ;;  %7136 = vmatprep.subr.bf16.mxu0 %v7799_v40  ;;  %v7818_v40 = vld [vmem:[#allocation5 + $0x380] ss:$12 sps:$4 sm:$0xff]  }
 0x1ce   :  { %1550 = vmatpush1.bf16.msra.mxu1 %v7762_v13  ;;  %7137 = vmatpush3.bf16.msra.mxu0 %v7800_v42  ;;  %v7819_v42 = vld [vmem:[#allocation5 + $0x390] ss:$12 sps:$4 sm:$0xff]  }
 0x1cf   :  { %1551 = vmatprep.subr.bf16.mxu1 %v7767_v14  ;;  %7138 = vmatprep.subr.bf16.mxu0 %v7804_v44  ;;  %v7825_v44 = vld [vmem:[#allocation5 + $0x3ac] ss:$12 sps:$4 sm:$0xff]  }
 0x1d2   :  { %1552 = vmatpush1.bf16.msra.mxu1 %v7765_v15  ;;  %7139 = vmatpush3.bf16.msra.mxu0 %v7805_v47  ;;  %v7826_v47 = vld [vmem:[#allocation5 + $0x3b0] ss:$12 sps:$4 sm:$0xff]  }
 0x1d3   :  { %1553 = vmatprep.subr.bf16.mxu1 %v7770_v16  ;;  %7140 = vmatprep.subr.bf16.mxu0 %v7809_v50  ;;  %v7854_v50 = vld [vmem:[#allocation5 + $0x488] ss:$12 sps:$4 sm:$0xff]  }
 0x1d6   :  { %1554 = vmatpush1.bf16.msra.mxu1 %v7768_v17  ;;  %7141 = vmatpush3.bf16.msra.mxu0 %v7810_v52  ;;  %v7855_v52 = vld [vmem:[#allocation5 + $0x3c8] ss:$12 sps:$4 sm:$0xff]  }
 0x1d7   :  { %1555 = vmatprep.subr.bf16.mxu1 %v7773_v18  ;;  %7390 = vmatprep.subr.bf16.mxu0 %v8616_v32 }
 0x1da   :  { %1556 = vmatpush1.bf16.msra.mxu1 %v7771_v19 }
 0x1db   :  { %1557 = vmatprep.subr.bf16.mxu1 %v7778_v20 }
 0x1de   :  { %1558 = vmatpush1.bf16.msra.mxu1 %v7776_v21 }
 0x1df   :  { %1559 = vmatprep.subr.bf16.mxu1 %v7783_v22 }
 0x1e2   :  { %1560 = vmatpush1.bf16.msra.mxu1 %v7781_v24 }
 0x1e3   :  { %1561 = vmatprep.subr.bf16.mxu1 %v7788_v27 }
 0x1e6   :  { %1562 = vmatpush1.bf16.msra.mxu1 %v7786_v26 }
 0x1e7   :  { %1563 = vmatprep.subr.bf16.mxu1 %v7793_v30 }
 0x1ea   :  { %1564 = vmatpush1.bf16.msra.mxu1 %v7791_v34  ;;  %v7814_v34 = vld [vmem:[#allocation5 + $0x368] ss:$12 sps:$4 sm:$0xff]  }
 0x1eb   :  { %1565 = vmatprep.subr.bf16.mxu1 %v7798_v38  ;;  %v7815_v38 = vld [vmem:[#allocation5 + $0x378] ss:$12 sps:$4 sm:$0xff]  }
 0x1ee   :  { %1566 = vmatpush1.bf16.msra.mxu1 %v7796_v41  ;;  %v7821_v41 = vld [vmem:[#allocation5 + $0x394] ss:$12 sps:$4 sm:$0xff]  }
 0x1ef   :  { %1567 = vmatprep.subr.bf16.mxu1 %v7803_v43  ;;  %v7822_v43 = vld [vmem:[#allocation5 + $0x398] ss:$12 sps:$4 sm:$0xff]  }
 0x1f2   :  { %1568 = vmatpush1.bf16.msra.mxu1 %v7801_v46  ;;  %v7823_v46 = vld [vmem:[#allocation5 + $0x3a8] ss:$12 sps:$4 sm:$0xff]  }
 0x1f3   :  { %1569 = vmatprep.subr.bf16.mxu1 %v7808_v48  ;;  %v7829_v48 = vld [vmem:[#allocation5 + $0x3c4] ss:$12 sps:$4 sm:$0xff]  }
 0x1f6   :  { %1570 = vmatpush1.bf16.msra.mxu1 %v7806_v51  ;;  %v7827_v51 = vld [vmem:[#allocation5 + $0x3c0] ss:$12 sps:$4 sm:$0xff]  }
 0x1f7   :  { %1582 = vmatprep.subr.bf16.mxu1 %v7813_v53  ;;  %v7832_v53 = vld [vmem:[#allocation5 + $0x3dc] ss:$12 sps:$4 sm:$0xff]  }
 0x27c   :  { %v7115_v55 = vpop.f32.mrb[4].mxu1 }
 0x27d   :  { %v7116_v56 = vpop.f32.mrb[5].mxu1 }
 0x27e   :  { %v7117_v57 = vadd.f32 %v7116_v56, %v7115_v55  ;;  %v7118_v58 = vpop.f32.mrb[6].mxu1  ;;  %v7830_v55 = vld [vmem:[#allocation5 + $0x3d8] ss:$12 sps:$4 sm:$0xff]   ;;  %v7860_v56 = vld [vmem:[#allocation5 + $0x3e0] ss:$12 sps:$4 sm:$0xff]  }
 0x27f   :  { %v7119_v59 = vpop.f32.mrb[7].mxu1 }
 0x280   :  { %v7120_v61 = vadd.f32 %v7119_v59, %v7118_v58  ;;  %v1061_v6 = vadd.f32 %v7117_v57, %v612_v3  ;;  %v7835_v57 = vld [vmem:[#allocation5 + $0x3f4] ss:$12 sps:$4 sm:$0xff]   ;;  %v7833_v58 = vld [vmem:[#allocation5 + $0x3f0] ss:$12 sps:$4 sm:$0xff]   ;;  %v7838_v59 = vld [vmem:[#allocation5 + $0x40c] ss:$12 sps:$4 sm:$0xff]  }
 0x282   :  { %v1064_v13 = vadd.f32 %v7120_v61, %v612_v3  ;;  %v7841_v61 = vld [vmem:[#allocation5 + $0x424] ss:$12 sps:$4 sm:$0xff]   ;;  %v7844_v3 = vld [vmem:[#allocation5 + $0x43c] ss:$12 sps:$4 sm:$0xff]  }
 0x28c   :  { %v1017_v7 = vpop.f32.mrb[4].mxu0  ;;  %v1101_v8 = vpop.f32.mrb[8].mxu1 }
 0x28d   :  { %v7522_v9 = vadd.f32 %v1017_v7, %v604_v4  ;;  %v1102_v10 = vadd.f32 %v1101_v8, %v1061_v6  ;;  %v1019_v11 = vpop.f32.mrb[5].mxu0  ;;  %v7388_v12 = vpop.f32.mrb[9].mxu1  ;;  %v7845_v6 = vld [vmem:[#allocation5 + $0x450] ss:$12 sps:$4 sm:$0xff]   ;;  %v7850_v7 = vld [vmem:[#allocation5 + $0x46c] ss:$12 sps:$4 sm:$0xff]  }
 0x28e   :  { %v7523_v14 = vadd.f32 %v1019_v11, %v608_v5  ;;  %v1021_v15 = vpop.f32.mrb[6].mxu0  ;;  %v1104_v16 = vpop.f32.mrb[10].mxu1  ;;  %v7848_v8 = vld [vmem:[#allocation5 + $0x468] ss:$12 sps:$4 sm:$0xff]   ;;  %v7856_v12 = vld [vmem:[#allocation5 + $0x498] ss:$12 sps:$4 sm:$0xff]  }
 0x28f   :  { %v7524_v17 = vadd.f32 %v1021_v15, %v604_v4  ;;  %v1105_v18 = vadd.f32 %v1104_v16, %v1064_v13  ;;  %v1023_v19 = vpop.f32.mrb[7].mxu0  ;;  %v7389_v20 = vpop.f32.mrb[11].mxu1  ;;  %v1108_v22 = vmax.f32 %v7522_v9, 0.0  ;;  %v1110_v23 = vmax.f32 %v1102_v10, 0.0  ;;  %v7842_v4 = vld [vmem:[#allocation5 + $0x438] ss:$12 sps:$4 sm:$0xff]  }
 0x290   :  { %v7525_v21 = vadd.f32 %v1023_v19, %v608_v5  ;;  %v1109_v26 = vmax.f32 %v7523_v14, 0.0  ;;  %v7847_v5 = vld [vmem:[#allocation5 + $0x454] ss:$12 sps:$4 sm:$0xff]   ;;  %v7853_v9 = vld [vmem:[#allocation5 + $0x484] ss:$12 sps:$4 sm:$0xff]  }
 0x291   :  { %v1111_v24 = vmax.f32 %v7524_v17, 0.0  ;;  %v1113_v25 = vmax.f32 %v1105_v18, 0.0  ;;  %v7851_v10 = vld [vmem:[#allocation5 + $0x480] ss:$12 sps:$4 sm:$0xff]   ;;  %v7858_v11 = vld [vmem:[#allocation5 + $0x49c] ss:$12 sps:$4 sm:$0xff]  }
 0x292   :  { %v1112_v27 = vmax.f32 %v7525_v21, 0.0  ;;  %v7863_v13 = vld [vmem:[#allocation5 + $0x4b4] ss:$12 sps:$4 sm:$0xff]   ;;  %v7864_v14 = vld [vmem:[#allocation5 + $0x4b8] ss:$12 sps:$4 sm:$0xff]  }
 0x293   :  { %v1114_v28 = vpack.c.bf16 %v1111_v24, %v1108_v22  ;;  %v1116_v29 = vpack.c.bf16 %v1113_v25, %v1110_v23  ;;  %v7861_v15 = vld [vmem:[#allocation5 + $0x4b0] ss:$12 sps:$4 sm:$0xff]   ;;  %v7865_v16 = vld [vmem:[#allocation5 + $0x3f8] ss:$12 sps:$4 sm:$0xff]   ;;  %v7866_v17 = vld [vmem:[#allocation5 + $0x4c8] ss:$12 sps:$4 sm:$0xff]  }
 0x294   :  { %v1115_v30 = vpack.c.bf16 %v1112_v27, %v1109_v26  ;;  %v7868_v18 = vld [vmem:[#allocation5 + $0x4cc] ss:$12 sps:$4 sm:$0xff]   ;;  %v7869_v19 = vld [vmem:[#allocation5 + $0x4d0] ss:$12 sps:$4 sm:$0xff]   ;;  %v7874_v22 = vld [vmem:[#allocation5 + $0x4e8] ss:$12 sps:$4 sm:$0xff]  }
 0x295   :  { %v7870_v20 = vld [vmem:[#allocation5 + $0x410] ss:$12 sps:$4 sm:$0xff]   ;;  %v7871_v23 = vld [vmem:[#allocation5 + $0x4e0] ss:$12 sps:$4 sm:$0xff]   ;;  %v7875_v24 = vld [vmem:[#allocation5 + $0x428] ss:$12 sps:$4 sm:$0xff]  }
 0x296   :  { %1571 = vmatprep.mubr.bf16.mxu1 %v1115_v30  ;;  %1657 = vmatprep.mubr.bf16.mxu0 %v1115_v30  ;;  %v7873_v21 = vld [vmem:[#allocation5 + $0x4e4] ss:$12 sps:$4 sm:$0xff]   ;;  %v7878_v25 = vld [vmem:[#allocation5 + $0x4fc] ss:$12 sps:$4 sm:$0xff]   ;;  %v7879_v26 = vld [vmem:[#allocation5 + $0x500] ss:$12 sps:$4 sm:$0xff]  }
 0x297   :  { %1572 = vmatmul.mubr.bf16.vlgmr.msra.gmra.mrb[12].mxu1 %v1114_v28  ;;  %1658 = vmatmul.mubr.bf16.vlgmr.msra.gmra.mrb[8].mxu0 %v1114_v28  ;;  %v7876_v27 = vld [vmem:[#allocation5 + $0x4f8] ss:$12 sps:$4 sm:$0xff]   ;;  %v7880_v28 = vld [vmem:[#allocation5 + $0x440] ss:$12 sps:$4 sm:$0xff]  }
 0x298   :  { %1583 = vmatpush1.bf16.msra.mxu1 %v7811_v31  ;;  %7391 = vmatpush3.bf16.msra.mxu0 %v7814_v34  ;;  %v7884_v30 = vld [vmem:[#allocation5 + $0x518] ss:$12 sps:$4 sm:$0xff]   ;;  %v7881_v31 = vld [vmem:[#allocation5 + $0x510] ss:$12 sps:$4 sm:$0xff]  }
 0x299   :  { %1584 = vmatprep.subr.bf16.mxu1 %v7817_v36  ;;  %7392 = vmatprep.subr.bf16.mxu0 %v8616_v32  ;;  %v7885_v34 = vld [vmem:[#allocation5 + $0x458] ss:$12 sps:$4 sm:$0xff]  }
 0x29a   :  { %1614 = vmatprep.mubr.bf16.mxu1 %v8615_v1  ;;  %7398 = vmatprep.mubr.msk.bf16.mxu0 %vm8617_vm2, %v8616_v32  ;;  %v7888_v36 = vld [vmem:[#allocation5 + $0x52c] ss:$12 sps:$4 sm:$0xff]  }
 0x29c   :  { %1585 = vmatpush1.bf16.msra.mxu1 %v7815_v38  ;;  %7393 = vmatpush3.bf16.msra.mxu0 %v7818_v40  ;;  %v7889_v38 = vld [vmem:[#allocation5 + $0x530] ss:$12 sps:$4 sm:$0xff]   ;;  %v7886_v40 = vld [vmem:[#allocation5 + $0x528] ss:$12 sps:$4 sm:$0xff]  }
 0x29d   :  { %1586 = vmatprep.subr.bf16.mxu1 %v7821_v41  ;;  %7394 = vmatprep.subr.bf16.mxu0 %v8616_v32  ;;  %v7890_v41 = vld [vmem:[#allocation5 + $0x470] ss:$12 sps:$4 sm:$0xff]  }
 0x2a0   :  { %1587 = vmatpush1.bf16.msra.mxu1 %v7819_v42  ;;  %7395 = vmatpush3.bf16.msra.mxu0 %v7822_v43  ;;  %v7893_v42 = vld [vmem:[#allocation5 + $0x544] ss:$12 sps:$4 sm:$0xff]  }
 0x2a1   :  { %1588 = vmatprep.subr.bf16.mxu1 %v7825_v44  ;;  %7396 = vmatprep.subr.bf16.mxu0 %v8616_v32 }
 0x2a4   :  { %1589 = vmatpush1.bf16.msra.mxu1 %v7823_v46  ;;  %7397 = vmatpush3.bf16.msra.mxu0 %v7826_v47 }
 0x2a5   :  { %2138 = vmatprep.subr.bf16.mxu0 %v7829_v48  ;;  %7153 = vmatprep.subr.bf16.mxu1 %v7854_v50 }
 0x2a7   :  { %6625 = vmatmul.mubr.msk.bf16.vlgmr.msra.gmra.mrb[12].mxu1 %vm936_vm3, %v1116_v29  ;;  %7399 = vmatmul.mubr.msk.bf16.vlgmr.msra.gmra.mrb[12].mxu0 %vm936_vm3, %v1116_v29  ;;  %v7883_v29 = vld [vmem:[#allocation5 + $0x514] ss:$12 sps:$4 sm:$0xff]  }
 0x2a8   :  { %2139 = vmatpush1.bf16.msra.mxu0 %v7827_v51  ;;  %7154 = vmatpush3.bf16.msra.mxu1 %v7855_v52  ;;  %v1199_v51 = vld [vmem:[#allocation7 + $0x3] sm:$0x7] }
 0x2a9   :  { %2140 = vmatprep.subr.bf16.mxu0 %v7832_v53  ;;  %7155 = vmatprep.subr.bf16.mxu1 %v7859_v54  ;;  %v1212_v52 = vrot.slane %v1199_v51, %v8856_v62  ;;  %v1204_v53 = vrot.slane %v1199_v51, %v8858_v0  ;;  %v1208_v54 = vrot.slane %v1199_v51, %v8860_v2  ;;  %v7924_v51 = vld [vmem:[#allocation5 + $0x61c] ss:$12 sps:$4 sm:$0xff]  }
 0x2ac   :  { %2141 = vmatpush1.bf16.msra.mxu0 %v7830_v55  ;;  %7156 = vmatpush3.bf16.msra.mxu1 %v7860_v56 }
 0x2ad   :  { %2142 = vmatprep.subr.bf16.mxu0 %v7835_v57  ;;  %7157 = vmatprep.subr.bf16.mxu1 %v7864_v14 }
 0x2b0   :  { %2143 = vmatpush1.bf16.msra.mxu0 %v7833_v58  ;;  %7158 = vmatpush3.bf16.msra.mxu1 %v7865_v16 }
 0x2b1   :  { %2144 = vmatprep.subr.bf16.mxu0 %v7838_v59  ;;  %7159 = vmatprep.subr.bf16.mxu1 %v7869_v19 }
 0x2b4   :  { %2145 = vmatpush1.bf16.msra.mxu0 %v7836_v60  ;;  %7160 = vmatpush3.bf16.msra.mxu1 %v7870_v20  ;;  %v7891_v20 = vld [vmem:[#allocation5 + $0x540] ss:$12 sps:$4 sm:$0xff]  }
 0x2b5   :  { %2146 = vmatprep.subr.bf16.mxu0 %v7841_v61  ;;  %7161 = vmatprep.subr.bf16.mxu1 %v7874_v22  ;;  %v7897_v22 = vld [vmem:[#allocation5 + $0x55c] ss:$12 sps:$4 sm:$0xff]  }
 0x2b8   :  { %2147 = vmatpush1.bf16.msra.mxu0 %v7839_v63  ;;  %7162 = vmatpush3.bf16.msra.mxu1 %v7875_v24  ;;  %v7898_v24 = vld [vmem:[#allocation5 + $0x560] ss:$12 sps:$4 sm:$0xff]  }
 0x2b9   :  { %2148 = vmatprep.subr.bf16.mxu0 %v7844_v3  ;;  %7163 = vmatprep.subr.bf16.mxu1 %v7879_v26  ;;  %v7899_v26 = vld [vmem:[#allocation5 + $0x570] ss:$12 sps:$4 sm:$0xff]  }
 0x2bc   :  { %2149 = vmatpush1.bf16.msra.mxu0 %v7842_v4  ;;  %7164 = vmatpush3.bf16.msra.mxu1 %v7880_v28  ;;  %v7905_v28 = vld [vmem:[#allocation5 + $0x58c] ss:$12 sps:$4 sm:$0xff]  }
 0x2bd   :  { %2150 = vmatprep.subr.bf16.mxu0 %v7847_v5  ;;  %7165 = vmatprep.subr.bf16.mxu1 %v7884_v30  ;;  %v7906_v30 = vld [vmem:[#allocation5 + $0x590] ss:$12 sps:$4 sm:$0xff]  }
 0x2c0   :  { %2151 = vmatpush1.bf16.msra.mxu0 %v7845_v6  ;;  %7166 = vmatpush3.bf16.msra.mxu1 %v7885_v34  ;;  %v7934_v34 = vld [vmem:[#allocation5 + $0x668] ss:$12 sps:$4 sm:$0xff]  }
 0x2c1   :  { %2152 = vmatprep.subr.bf16.mxu0 %v7850_v7  ;;  %7167 = vmatprep.subr.bf16.mxu1 %v7889_v38  ;;  %v7935_v38 = vld [vmem:[#allocation5 + $0x5a8] ss:$12 sps:$4 sm:$0xff]  }
 0x2c4   :  { %2153 = vmatpush1.bf16.msra.mxu0 %v7848_v8  ;;  %7168 = vmatpush3.bf16.msra.mxu1 %v7890_v41  ;;  %v7939_v41 = vld [vmem:[#allocation5 + $0x680] ss:$12 sps:$4 sm:$0xff]  }
 0x2c5   :  { %2154 = vmatprep.subr.bf16.mxu0 %v7853_v9  ;;  %7402 = vmatprep.subr.bf16.mxu1 %v8616_v32 }
 0x2c8   :  { %2155 = vmatpush1.bf16.msra.mxu0 %v7851_v10 }
 0x2c9   :  { %2156 = vmatprep.subr.bf16.mxu0 %v7858_v11 }
 0x2cc   :  { %2157 = vmatpush1.bf16.msra.mxu0 %v7856_v12 }
 0x2cd   :  { %2158 = vmatprep.subr.bf16.mxu0 %v7863_v13 }
 0x2d0   :  { %2159 = vmatpush1.bf16.msra.mxu0 %v7861_v15 }
 0x2d1   :  { %2160 = vmatprep.subr.bf16.mxu0 %v7868_v18 }
 0x2d4   :  { %2161 = vmatpush1.bf16.msra.mxu0 %v7866_v17 }
 0x2d5   :  { %2162 = vmatprep.subr.bf16.mxu0 %v7873_v21  ;;  %v7894_v21 = vld [vmem:[#allocation5 + $0x548] ss:$12 sps:$4 sm:$0xff]  }
 0x2d8   :  { %2163 = vmatpush1.bf16.msra.mxu0 %v7871_v23  ;;  %v7895_v23 = vld [vmem:[#allocation5 + $0x558] ss:$12 sps:$4 sm:$0xff]  }
 0x2d9   :  { %2164 = vmatprep.subr.bf16.mxu0 %v7878_v25  ;;  %v7901_v25 = vld [vmem:[#allocation5 + $0x574] ss:$12 sps:$4 sm:$0xff]  }
 0x2dc   :  { %2165 = vmatpush1.bf16.msra.mxu0 %v7876_v27  ;;  %v7902_v27 = vld [vmem:[#allocation5 + $0x578] ss:$12 sps:$4 sm:$0xff]  }
 0x2dd   :  { %2166 = vmatprep.subr.bf16.mxu0 %v7883_v29  ;;  %v7903_v29 = vld [vmem:[#allocation5 + $0x588] ss:$12 sps:$4 sm:$0xff]  }
 0x2e0   :  { %2167 = vmatpush1.bf16.msra.mxu0 %v7881_v31  ;;  %v7909_v31 = vld [vmem:[#allocation5 + $0x5a4] ss:$12 sps:$4 sm:$0xff]  }
 0x2e1   :  { %2168 = vmatprep.subr.bf16.mxu0 %v7888_v36  ;;  %v7907_v36 = vld [vmem:[#allocation5 + $0x5a0] ss:$12 sps:$4 sm:$0xff]  }
 0x2e4   :  { %2169 = vmatpush1.bf16.msra.mxu0 %v7886_v40  ;;  %v7912_v40 = vld [vmem:[#allocation5 + $0x5bc] ss:$12 sps:$4 sm:$0xff]  }
 0x2e5   :  { %2181 = vmatprep.subr.bf16.mxu0 %v7893_v42  ;;  %v7910_v42 = vld [vmem:[#allocation5 + $0x5b8] ss:$12 sps:$4 sm:$0xff]  }
 0x36a   :  { %v7142_v43 = vpop.f32.mrb[8].mxu0 }
 0x36b   :  { %v7143_v44 = vpop.f32.mrb[9].mxu0 }
 0x36c   :  { %v7144_v46 = vadd.f32 %v7143_v44, %v7142_v43  ;;  %v7145_v47 = vpop.f32.mrb[10].mxu0  ;;  %v7915_v43 = vld [vmem:[#allocation5 + $0x5d4] ss:$12 sps:$4 sm:$0xff]   ;;  %v7913_v44 = vld [vmem:[#allocation5 + $0x5d0] ss:$12 sps:$4 sm:$0xff]  }
 0x36d   :  { %v7146_v48 = vpop.f32.mrb[11].mxu0 }
 0x36e   :  { %v7147_v50 = vadd.f32 %v7146_v48, %v7145_v47  ;;  %v1660_v55 = vadd.f32 %v7144_v46, %v1212_v52  ;;  %v7918_v46 = vld [vmem:[#allocation5 + $0x5ec] ss:$12 sps:$4 sm:$0xff]   ;;  %v7916_v47 = vld [vmem:[#allocation5 + $0x5e8] ss:$12 sps:$4 sm:$0xff]   ;;  %v7921_v48 = vld [vmem:[#allocation5 + $0x604] ss:$12 sps:$4 sm:$0xff]  }
 0x370   :  { %v1663_v63 = vadd.f32 %v7147_v50, %v1212_v52  ;;  %v7919_v50 = vld [vmem:[#allocation5 + $0x600] ss:$12 sps:$4 sm:$0xff]   ;;  %v7922_v52 = vld [vmem:[#allocation5 + $0x618] ss:$12 sps:$4 sm:$0xff]  }
 0x37a   :  { %v1616_v56 = vpop.f32.mrb[12].mxu1  ;;  %v1700_v57 = vpop.f32.mrb[12].mxu0 }
 0x37b   :  { %v7526_v58 = vadd.f32 %v1616_v56, %v1204_v53  ;;  %v1701_v59 = vadd.f32 %v1700_v57, %v1660_v55  ;;  %v1618_v60 = vpop.f32.mrb[13].mxu1  ;;  %v7400_v61 = vpop.f32.mrb[13].mxu0  ;;  %v7930_v55 = vld [vmem:[#allocation5 + $0x64c] ss:$12 sps:$4 sm:$0xff]   ;;  %v7928_v56 = vld [vmem:[#allocation5 + $0x648] ss:$12 sps:$4 sm:$0xff]  }
 0x37c   :  { %v7527_v3 = vadd.f32 %v1618_v60, %v1208_v54  ;;  %v1620_v4 = vpop.f32.mrb[14].mxu1  ;;  %v1703_v5 = vpop.f32.mrb[14].mxu0  ;;  %v7933_v57 = vld [vmem:[#allocation5 + $0x664] ss:$12 sps:$4 sm:$0xff]   ;;  %v7940_v61 = vld [vmem:[#allocation5 + $0x5c0] ss:$12 sps:$4 sm:$0xff]  }
 0x37d   :  { %v7528_v6 = vadd.f32 %v1620_v4, %v1204_v53  ;;  %v1704_v7 = vadd.f32 %v1703_v5, %v1663_v63  ;;  %v1622_v8 = vpop.f32.mrb[15].mxu1  ;;  %v7401_v9 = vpop.f32.mrb[15].mxu0  ;;  %v1707_v11 = vmax.f32 %v7526_v58, 0.0  ;;  %v1709_v12 = vmax.f32 %v1701_v59, 0.0  ;;  %v7927_v53 = vld [vmem:[#allocation5 + $0x634] ss:$12 sps:$4 sm:$0xff]  }
 0x37e   :  { %v7529_v10 = vadd.f32 %v1622_v8, %v1208_v54  ;;  %v1708_v15 = vmax.f32 %v7527_v3, 0.0  ;;  %v7925_v54 = vld [vmem:[#allocation5 + $0x630] ss:$12 sps:$4 sm:$0xff]   ;;  %v7931_v58 = vld [vmem:[#allocation5 + $0x660] ss:$12 sps:$4 sm:$0xff]  }
 0x37f   :  { %v1710_v13 = vmax.f32 %v7528_v6, 0.0  ;;  %v1712_v14 = vmax.f32 %v1704_v7, 0.0  ;;  %v7938_v59 = vld [vmem:[#allocation5 + $0x67c] ss:$12 sps:$4 sm:$0xff]   ;;  %v7936_v60 = vld [vmem:[#allocation5 + $0x678] ss:$12 sps:$4 sm:$0xff]  }
 0x380   :  { %v1711_v16 = vmax.f32 %v7529_v10, 0.0  ;;  %v7943_v63 = vld [vmem:[#allocation5 + $0x694] ss:$12 sps:$4 sm:$0xff]   ;;  %v7944_v3 = vld [vmem:[#allocation5 + $0x698] ss:$12 sps:$4 sm:$0xff]  }
 0x381   :  { %v1713_v17 = vpack.c.bf16 %v1710_v13, %v1707_v11  ;;  %v1715_v18 = vpack.c.bf16 %v1712_v14, %v1709_v12  ;;  %v7941_v4 = vld [vmem:[#allocation5 + $0x690] ss:$12 sps:$4 sm:$0xff]   ;;  %v7945_v5 = vld [vmem:[#allocation5 + $0x5d8] ss:$12 sps:$4 sm:$0xff]   ;;  %v7946_v8 = vld [vmem:[#allocation5 + $0x6a8] ss:$12 sps:$4 sm:$0xff]  }
 0x382   :  { %v1714_v19 = vpack.c.bf16 %v1711_v16, %v1708_v15  ;;  %v7948_v6 = vld [vmem:[#allocation5 + $0x6ac] ss:$12 sps:$4 sm:$0xff]   ;;  %v7949_v7 = vld [vmem:[#allocation5 + $0x6b0] ss:$12 sps:$4 sm:$0xff]   ;;  %v7954_v11 = vld [vmem:[#allocation5 + $0x6c8] ss:$12 sps:$4 sm:$0xff]  }
 0x383   :  { %v7950_v9 = vld [vmem:[#allocation5 + $0x5f0] ss:$12 sps:$4 sm:$0xff]   ;;  %v7951_v12 = vld [vmem:[#allocation5 + $0x6c0] ss:$12 sps:$4 sm:$0xff]   ;;  %v7955_v13 = vld [vmem:[#allocation5 + $0x608] ss:$12 sps:$4 sm:$0xff]  }
 0x384   :  { %2170 = vmatprep.mubr.bf16.mxu0 %v1714_v19  ;;  %2256 = vmatprep.mubr.bf16.mxu1 %v1714_v19  ;;  %v7953_v10 = vld [vmem:[#allocation5 + $0x6c4] ss:$12 sps:$4 sm:$0xff]   ;;  %v7958_v14 = vld [vmem:[#allocation5 + $0x6dc] ss:$12 sps:$4 sm:$0xff]   ;;  %v7959_v15 = vld [vmem:[#allocation5 + $0x6e0] ss:$12 sps:$4 sm:$0xff]  }
 0x385   :  { %2171 = vmatmul.mubr.bf16.vlgmr.msra.gmra.mrb[16].mxu0 %v1713_v17  ;;  %2257 = vmatmul.mubr.bf16.vlgmr.msra.gmra.mrb[16].mxu1 %v1713_v17  ;;  %v7956_v16 = vld [vmem:[#allocation5 + $0x6d8] ss:$12 sps:$4 sm:$0xff]   ;;  %v7960_v17 = vld [vmem:[#allocation5 + $0x620] ss:$12 sps:$4 sm:$0xff]  }
 0x386   :  { %2182 = vmatpush1.bf16.msra.mxu0 %v7891_v20  ;;  %7403 = vmatpush3.bf16.msra.mxu1 %v7894_v21  ;;  %v7964_v19 = vld [vmem:[#allocation5 + $0x6f8] ss:$12 sps:$4 sm:$0xff]   ;;  %v7961_v20 = vld [vmem:[#allocation5 + $0x6f0] ss:$12 sps:$4 sm:$0xff]  }
 0x387   :  { %2183 = vmatprep.subr.bf16.mxu0 %v7897_v22  ;;  %7404 = vmatprep.subr.bf16.mxu1 %v8616_v32  ;;  %v7965_v21 = vld [vmem:[#allocation5 + $0x638] ss:$12 sps:$4 sm:$0xff]  }
 0x388   :  { %2213 = vmatprep.mubr.bf16.mxu0 %v8615_v1  ;;  %7410 = vmatprep.mubr.msk.bf16.mxu1 %vm8617_vm2, %v8616_v32  ;;  %v7968_v22 = vld [vmem:[#allocation5 + $0x70c] ss:$12 sps:$4 sm:$0xff]  }
 0x38a   :  { %2184 = vmatpush1.bf16.msra.mxu0 %v7895_v23  ;;  %7405 = vmatpush3.bf16.msra.mxu1 %v7898_v24  ;;  %v7969_v23 = vld [vmem:[#allocation5 + $0x710] ss:$12 sps:$4 sm:$0xff]   ;;  %v7966_v24 = vld [vmem:[#allocation5 + $0x708] ss:$12 sps:$4 sm:$0xff]  }
 0x38b   :  { %2185 = vmatprep.subr.bf16.mxu0 %v7901_v25  ;;  %7406 = vmatprep.subr.bf16.mxu1 %v8616_v32  ;;  %v7970_v25 = vld [vmem:[#allocation5 + $0x650] ss:$12 sps:$4 sm:$0xff]  }
 0x38e   :  { %2186 = vmatpush1.bf16.msra.mxu0 %v7899_v26  ;;  %7407 = vmatpush3.bf16.msra.mxu1 %v7902_v27  ;;  %v7973_v26 = vld [vmem:[#allocation5 + $0x724] ss:$12 sps:$4 sm:$0xff]  }
 0x38f   :  { %2187 = vmatprep.subr.bf16.mxu0 %v7905_v28  ;;  %7408 = vmatprep.subr.bf16.mxu1 %v8616_v32 }
 0x392   :  { %2188 = vmatpush1.bf16.msra.mxu0 %v7903_v29  ;;  %7409 = vmatpush3.bf16.msra.mxu1 %v7906_v30 }
 0x393   :  { %2743 = vmatprep.subr.bf16.mxu1 %v7909_v31  ;;  %7180 = vmatprep.subr.bf16.mxu0 %v7934_v34 }
 0x395   :  { %6687 = vmatmul.mubr.msk.bf16.vlgmr.msra.gmra.mrb[16].mxu0 %vm936_vm3, %v1715_v18  ;;  %7411 = vmatmul.mubr.msk.bf16.vlgmr.msra.gmra.mrb[20].mxu1 %vm936_vm3, %v1715_v18  ;;  %v7963_v18 = vld [vmem:[#allocation5 + $0x6f4] ss:$12 sps:$4 sm:$0xff]  }
 0x396   :  { %2744 = vmatpush1.bf16.msra.mxu1 %v7907_v36  ;;  %7181 = vmatpush3.bf16.msra.mxu0 %v7935_v38  ;;  %v1798_v36 = vld [vmem:[#allocation7 + $0x6] sm:$0x7] }
 0x397   :  { %2745 = vmatprep.subr.bf16.mxu1 %v7912_v40  ;;  %7182 = vmatprep.subr.bf16.mxu0 %v7939_v41  ;;  %v1811_v38 = vrot.slane %v1798_v36, %v8856_v62  ;;  %v1803_v40 = vrot.slane %v1798_v36, %v8858_v0  ;;  %v1807_v41 = vrot.slane %v1798_v36, %v8860_v2  ;;  %v7999_v36 = vld [vmem:[#allocation5 + $0x7e0] ss:$12 sps:$4 sm:$0xff]  }
 0x39a   :  { %2746 = vmatpush1.bf16.msra.mxu1 %v7910_v42  ;;  %7183 = vmatpush3.bf16.msra.mxu0 %v7940_v61 }
 0x39b   :  { %2747 = vmatprep.subr.bf16.mxu1 %v7915_v43  ;;  %7184 = vmatprep.subr.bf16.mxu0 %v7944_v3 }
 0x39e   :  { %2748 = vmatpush1.bf16.msra.mxu1 %v7913_v44  ;;  %7185 = vmatpush3.bf16.msra.mxu0 %v7945_v5 }
 0x39f   :  { %2749 = vmatprep.subr.bf16.mxu1 %v7918_v46  ;;  %7186 = vmatprep.subr.bf16.mxu0 %v7949_v7 }
 0x3a2   :  { %2750 = vmatpush1.bf16.msra.mxu1 %v7916_v47  ;;  %7187 = vmatpush3.bf16.msra.mxu0 %v7950_v9  ;;  %v7974_v9 = vld [vmem:[#allocation5 + $0x728] ss:$12 sps:$4 sm:$0xff]  }
 0x3a3   :  { %2751 = vmatprep.subr.bf16.mxu1 %v7921_v48  ;;  %7188 = vmatprep.subr.bf16.mxu0 %v7954_v11  ;;  %v7981_v11 = vld [vmem:[#allocation5 + $0x754] ss:$12 sps:$4 sm:$0xff]  }
 0x3a6   :  { %2752 = vmatpush1.bf16.msra.mxu1 %v7919_v50  ;;  %7189 = vmatpush3.bf16.msra.mxu0 %v7955_v13  ;;  %v7982_v13 = vld [vmem:[#allocation5 + $0x758] ss:$12 sps:$4 sm:$0xff]  }
 0x3a7   :  { %2753 = vmatprep.subr.bf16.mxu1 %v7924_v51  ;;  %7190 = vmatprep.subr.bf16.mxu0 %v7959_v15  ;;  %v7983_v15 = vld [vmem:[#allocation5 + $0x768] ss:$12 sps:$4 sm:$0xff]  }
 0x3aa   :  { %2754 = vmatpush1.bf16.msra.mxu1 %v7922_v52  ;;  %7191 = vmatpush3.bf16.msra.mxu0 %v7960_v17 }
 0x3ab   :  { %2755 = vmatprep.subr.bf16.mxu1 %v7927_v53  ;;  %7192 = vmatprep.subr.bf16.mxu0 %v7964_v19  ;;  %v8014_v19 = vld [vmem:[#allocation5 + $0x848] ss:$12 sps:$4 sm:$0xff]  }
 0x3ae   :  { %2756 = vmatpush1.bf16.msra.mxu1 %v7925_v54  ;;  %7193 = vmatpush3.bf16.msra.mxu0 %v7965_v21  ;;  %v7987_v21 = vld [vmem:[#allocation5 + $0x780] ss:$12 sps:$4 sm:$0xff]  }
 0x3af   :  { %2757 = vmatprep.subr.bf16.mxu1 %v7930_v55  ;;  %7194 = vmatprep.subr.bf16.mxu0 %v7969_v23 }
 0x3b2   :  { %2758 = vmatpush1.bf16.msra.mxu1 %v7928_v56  ;;  %7195 = vmatpush3.bf16.msra.mxu0 %v7970_v25  ;;  %v8019_v25 = vld [vmem:[#allocation5 + $0x860] ss:$12 sps:$4 sm:$0xff]  }
 0x3b3   :  { %2759 = vmatprep.subr.bf16.mxu1 %v7933_v57  ;;  %7414 = vmatprep.subr.bf16.mxu0 %v8616_v32 }
 0x3b6   :  { %2760 = vmatpush1.bf16.msra.mxu1 %v7931_v58 }
 0x3b7   :  { %2761 = vmatprep.subr.bf16.mxu1 %v7938_v59 }
 0x3ba   :  { %2762 = vmatpush1.bf16.msra.mxu1 %v7936_v60 }
 0x3bb   :  { %2763 = vmatprep.subr.bf16.mxu1 %v7943_v63 }
 0x3be   :  { %2764 = vmatpush1.bf16.msra.mxu1 %v7941_v4 }
 0x3bf   :  { %2765 = vmatprep.subr.bf16.mxu1 %v7948_v6 }
 0x3c2   :  { %2766 = vmatpush1.bf16.msra.mxu1 %v7946_v8  ;;  %v7971_v8 = vld [vmem:[#allocation5 + $0x720] ss:$12 sps:$4 sm:$0xff]  }
 0x3c3   :  { %2767 = vmatprep.subr.bf16.mxu1 %v7953_v10 }
 0x3c6   :  { %2768 = vmatpush1.bf16.msra.mxu1 %v7951_v12  ;;  %v7979_v12 = vld [vmem:[#allocation5 + $0x750] ss:$12 sps:$4 sm:$0xff]  }
 0x3c7   :  { %2769 = vmatprep.subr.bf16.mxu1 %v7958_v14  ;;  %v7985_v14 = vld [vmem:[#allocation5 + $0x76c] ss:$12 sps:$4 sm:$0xff]  }
 0x3ca   :  { %2770 = vmatpush1.bf16.msra.mxu1 %v7956_v16  ;;  %v7986_v16 = vld [vmem:[#allocation5 + $0x770] ss:$12 sps:$4 sm:$0xff]  }
 0x3cb   :  { %2771 = vmatprep.subr.bf16.mxu1 %v7963_v18  ;;  %v7989_v18 = vld [vmem:[#allocation5 + $0x784] ss:$12 sps:$4 sm:$0xff]  }
 0x3ce   :  { %2772 = vmatpush1.bf16.msra.mxu1 %v7961_v20 }
 0x3cf   :  { %2773 = vmatprep.subr.bf16.mxu1 %v7968_v22  ;;  %v8015_v22 = vld [vmem:[#allocation5 + $0x788] ss:$12 sps:$4 sm:$0xff]  }
 0x3d2   :  { %2774 = vmatpush1.bf16.msra.mxu1 %v7966_v24  ;;  %v7992_v24 = vld [vmem:[#allocation5 + $0x79c] ss:$12 sps:$4 sm:$0xff]  }
 0x3d3   :  { %2786 = vmatprep.subr.bf16.mxu1 %v7973_v26  ;;  %v7990_v26 = vld [vmem:[#allocation5 + $0x798] ss:$12 sps:$4 sm:$0xff]  }
 0x458   :  { %v7169_v27 = vpop.f32.mrb[16].mxu1 }
 0x459   :  { %v7170_v28 = vpop.f32.mrb[17].mxu1 }
 0x45a   :  { %v7171_v29 = vadd.f32 %v7170_v28, %v7169_v27  ;;  %v7172_v30 = vpop.f32.mrb[18].mxu1  ;;  %v8020_v27 = vld [vmem:[#allocation5 + $0x7a0] ss:$12 sps:$4 sm:$0xff]  }
 0x45b   :  { %v7173_v31 = vpop.f32.mrb[19].mxu1  ;;  %v7995_v28 = vld [vmem:[#allocation5 + $0x7b4] ss:$12 sps:$4 sm:$0xff]  }
 0x45c   :  { %v7174_v34 = vadd.f32 %v7173_v31, %v7172_v30  ;;  %v2259_v42 = vadd.f32 %v7171_v29, %v1811_v38  ;;  %v7993_v29 = vld [vmem:[#allocation5 + $0x7b0] ss:$12 sps:$4 sm:$0xff]   ;;  %v7998_v30 = vld [vmem:[#allocation5 + $0x7cc] ss:$12 sps:$4 sm:$0xff]   ;;  %v7996_v31 = vld [vmem:[#allocation5 + $0x7c8] ss:$12 sps:$4 sm:$0xff]  }
 0x45e   :  { %v2262_v51 = vadd.f32 %v7174_v34, %v1811_v38  ;;  %v8001_v34 = vld [vmem:[#allocation5 + $0x7e4] ss:$12 sps:$4 sm:$0xff]   ;;  %v8004_v38 = vld [vmem:[#allocation5 + $0x7fc] ss:$12 sps:$4 sm:$0xff]  }
 0x468   :  { %v2215_v43 = vpop.f32.mrb[16].mxu0  ;;  %v2299_v44 = vpop.f32.mrb[20].mxu1 }
 0x469   :  { %v7530_v46 = vadd.f32 %v2215_v43, %v1803_v40  ;;  %v2300_v47 = vadd.f32 %v2299_v44, %v2259_v42  ;;  %v2217_v48 = vpop.f32.mrb[17].mxu0  ;;  %v7412_v50 = vpop.f32.mrb[21].mxu1  ;;  %v8005_v42 = vld [vmem:[#allocation5 + $0x810] ss:$12 sps:$4 sm:$0xff]   ;;  %v8010_v43 = vld [vmem:[#allocation5 + $0x82c] ss:$12 sps:$4 sm:$0xff]  }
 0x46a   :  { %v7531_v52 = vadd.f32 %v2217_v48, %v1807_v41  ;;  %v2219_v53 = vpop.f32.mrb[18].mxu0  ;;  %v2302_v54 = vpop.f32.mrb[22].mxu1  ;;  %v8008_v44 = vld [vmem:[#allocation5 + $0x828] ss:$12 sps:$4 sm:$0xff]   ;;  %v8016_v50 = vld [vmem:[#allocation5 + $0x858] ss:$12 sps:$4 sm:$0xff]  }
 0x46b   :  { %v8890_v55 = vadd.f32 %v7530_v46, %v8829_v33  ;;  %v8893_v56 = vadd.f32 %v2300_v47, %v8841_v45  ;;  %v7532_v57 = vadd.f32 %v2219_v53, %v1803_v40  ;;  %v2303_v58 = vadd.f32 %v2302_v54, %v2262_v51  ;;  %v2221_v59 = vpop.f32.mrb[19].mxu0  ;;  %v7413_v60 = vpop.f32.mrb[23].mxu1  ;;  %v8002_v40 = vld [vmem:[#allocation5 + $0x7f8] ss:$12 sps:$4 sm:$0xff]   ;;  %v8011_v47 = vld [vmem:[#allocation5 + $0x840] ss:$12 sps:$4 sm:$0xff]  }
 0x46c   :  { %v8896_v61 = vadd.f32 %v7531_v52, %v8832_v35  ;;  %v7533_v63 = vadd.f32 %v2221_v59, %v1807_v41  ;;  %v8007_v41 = vld [vmem:[#allocation5 + $0x814] ss:$12 sps:$4 sm:$0xff]   ;;  %v8013_v46 = vld [vmem:[#allocation5 + $0x844] ss:$12 sps:$4 sm:$0xff]   ;;  %v8018_v48 = vld [vmem:[#allocation5 + $0x85c] ss:$12 sps:$4 sm:$0xff]  }
 0x46d   :  { %v8899_v3 = vadd.f32 %v7532_v57, %v8835_v37  ;;  %v8902_v4 = vadd.f32 %v2303_v58, %v8844_v49  ;;  %v2312_v7 = vmax.f32 %v8890_v55, 0.0  ;;  %v7977_v37 = vld [vmem:[#allocation5 + $0x73c] ss:$12 sps:$4 sm:$0xff]   ;;  %v7978_v49 = vld [vmem:[#allocation5 + $0x740] ss:$12 sps:$4 sm:$0xff]   ;;  %v2314_v20 = vmax.f32 %v8893_v56, 0.0 }
 0x46e   :  { %v8905_v33 = vadd.f32 %v7533_v63, %v8838_v39  ;;  %v2313_v5 = vmax.f32 %v8896_v61, 0.0  ;;  %v7975_v39 = vld [vmem:[#allocation5 + $0x738] ss:$12 sps:$4 sm:$0xff]   ;;  %v8023_v51 = vld [vmem:[#allocation5 + $0x874] ss:$12 sps:$4 sm:$0xff]  }
 0x46f   :  { %v2315_v45 = vmax.f32 %v8899_v3, 0.0  ;;  %v2317_v17 = vmax.f32 %v8902_v4, 0.0  ;;  %v8024_v52 = vld [vmem:[#allocation5 + $0x878] ss:$12 sps:$4 sm:$0xff]   ;;  %v8021_v53 = vld [vmem:[#allocation5 + $0x870] ss:$12 sps:$4 sm:$0xff]  }
 0x470   :  { %v2316_v6 = vmax.f32 %v8905_v33, 0.0  ;;  %v8025_v54 = vld [vmem:[#allocation5 + $0x7b8] ss:$12 sps:$4 sm:$0xff]   ;;  %v8026_v57 = vld [vmem:[#allocation5 + $0x888] ss:$12 sps:$4 sm:$0xff]  }
 0x471   :  { %v2318_v10 = vpack.c.bf16 %v2315_v45, %v2312_v7  ;;  %v2320_v23 = vpack.c.bf16 %v2317_v17, %v2314_v20  ;;  %v8028_v58 = vld [vmem:[#allocation5 + $0x88c] ss:$12 sps:$4 sm:$0xff]   ;;  %v8029_v59 = vld [vmem:[#allocation5 + $0x890] ss:$12 sps:$4 sm:$0xff]   ;;  %v8034_v45 = vld [vmem:[#allocation5 + $0x8a8] ss:$12 sps:$4 sm:$0xff]  }
 0x472   :  { %v2319_v35 = vpack.c.bf16 %v2316_v6, %v2313_v5  ;;  %v8030_v60 = vld [vmem:[#allocation5 + $0x7d0] ss:$12 sps:$4 sm:$0xff]   ;;  %v8031_v5 = vld [vmem:[#allocation5 + $0x8a0] ss:$12 sps:$4 sm:$0xff]   ;;  %v8035_v6 = vld [vmem:[#allocation5 + $0x7e8] ss:$12 sps:$4 sm:$0xff]  }
 0x473   :  { %v8033_v63 = vld [vmem:[#allocation5 + $0x8a4] ss:$12 sps:$4 sm:$0xff]   ;;  %v8038_v7 = vld [vmem:[#allocation5 + $0x8bc] ss:$12 sps:$4 sm:$0xff]  }
 0x474   :  { %2775 = vmatprep.mubr.bf16.mxu1 %v2319_v35  ;;  %2861 = vmatprep.mubr.bf16.mxu0 %v2319_v35  ;;  %v8039_v35 = vld [vmem:[#allocation5 + $0x8c0] ss:$12 sps:$4 sm:$0xff]  }
 0x475   :  { %2776 = vmatmul.mubr.bf16.vlgmr.msra.gmra.mrb[24].mxu1 %v2318_v10  ;;  %2862 = vmatmul.mubr.bf16.vlgmr.msra.gmra.mrb[20].mxu0 %v2318_v10  ;;  %v8043_v10 = vld [vmem:[#allocation5 + $0x8d4] ss:$12 sps:$4 sm:$0xff]  }
 0x476   :  { %2787 = vmatpush1.bf16.msra.mxu1 %v7971_v8  ;;  %7415 = vmatpush3.bf16.msra.mxu0 %v7974_v9  ;;  %v8036_v8 = vld [vmem:[#allocation5 + $0x8b8] ss:$12 sps:$4 sm:$0xff]   ;;  %v8040_v9 = vld [vmem:[#allocation5 + $0x800] ss:$12 sps:$4 sm:$0xff]  }
 0x477   :  { %2788 = vmatprep.subr.bf16.mxu1 %v7977_v37  ;;  %7416 = vmatprep.subr.bf16.mxu0 %v8616_v32  ;;  %v8044_v37 = vld [vmem:[#allocation5 + $0x8d8] ss:$12 sps:$4 sm:$0xff]  }
 0x478   :  { %2818 = vmatprep.mubr.bf16.mxu1 %v8615_v1  ;;  %7422 = vmatprep.mubr.msk.bf16.mxu0 %vm8617_vm2, %v8616_v32 }
 0x47a   :  { %2789 = vmatpush1.bf16.msra.mxu1 %v7975_v39  ;;  %7417 = vmatpush3.bf16.msra.mxu0 %v7978_v49  ;;  %v8041_v39 = vld [vmem:[#allocation5 + $0x8d0] ss:$12 sps:$4 sm:$0xff]   ;;  %v8045_v49 = vld [vmem:[#allocation5 + $0x818] ss:$12 sps:$4 sm:$0xff]  }
 0x47b   :  { %2790 = vmatprep.subr.bf16.mxu1 %v7981_v11  ;;  %7418 = vmatprep.subr.bf16.mxu0 %v8616_v32  ;;  %v8048_v11 = vld [vmem:[#allocation5 + $0x8ec] ss:$12 sps:$4 sm:$0xff]  }
 0x47e   :  { %2791 = vmatpush1.bf16.msra.mxu1 %v7979_v12  ;;  %7419 = vmatpush3.bf16.msra.mxu0 %v7982_v13  ;;  %v8049_v12 = vld [vmem:[#allocation5 + $0x8f0] ss:$12 sps:$4 sm:$0xff]   ;;  %v8046_v13 = vld [vmem:[#allocation5 + $0x8e8] ss:$12 sps:$4 sm:$0xff]  }
 0x47f   :  { %2792 = vmatprep.subr.bf16.mxu1 %v7985_v14  ;;  %7420 = vmatprep.subr.bf16.mxu0 %v8616_v32  ;;  %v8050_v14 = vld [vmem:[#allocation5 + $0x830] ss:$12 sps:$4 sm:$0xff]  }
 0x482   :  { %2793 = vmatpush1.bf16.msra.mxu1 %v7983_v15  ;;  %7421 = vmatpush3.bf16.msra.mxu0 %v7986_v16  ;;  %v8053_v15 = vld [vmem:[#allocation5 + $0x904] ss:$12 sps:$4 sm:$0xff]  }
 0x483   :  { %3342 = vmatprep.subr.bf16.mxu0 %v7989_v18  ;;  %7207 = vmatprep.subr.bf16.mxu1 %v8014_v19 }
 0x485   :  { %6749 = vmatmul.mubr.msk.bf16.vlgmr.msra.gmra.mrb[24].mxu1 %vm936_vm3, %v2320_v23  ;;  %7423 = vmatmul.mubr.msk.bf16.vlgmr.msra.gmra.mrb[24].mxu0 %vm936_vm3, %v2320_v23 }
 0x486   :  { %3343 = vmatpush1.bf16.msra.mxu0 %v7987_v21  ;;  %7208 = vmatpush3.bf16.msra.mxu1 %v8015_v22  ;;  %v2403_v22 = vld [vmem:[#allocation7 + $0x9] sm:$0x7] }
 0x487   :  { %3344 = vmatprep.subr.bf16.mxu0 %v7992_v24  ;;  %7209 = vmatprep.subr.bf16.mxu1 %v8019_v25  ;;  %v2416_v23 = vrot.slane %v2403_v22, %v8856_v62  ;;  %v2408_v24 = vrot.slane %v2403_v22, %v8858_v0  ;;  %v2412_v25 = vrot.slane %v2403_v22, %v8860_v2  ;;  %v8079_v22 = vld [vmem:[#allocation5 + $0x9c0] ss:$12 sps:$4 sm:$0xff]  }
 0x48a   :  { %3345 = vmatpush1.bf16.msra.mxu0 %v7990_v26  ;;  %7210 = vmatpush3.bf16.msra.mxu1 %v8020_v27 }
 0x48b   :  { %3346 = vmatprep.subr.bf16.mxu0 %v7995_v28  ;;  %7211 = vmatprep.subr.bf16.mxu1 %v8024_v52 }
 0x48e   :  { %3347 = vmatpush1.bf16.msra.mxu0 %v7993_v29  ;;  %7212 = vmatpush3.bf16.msra.mxu1 %v8025_v54 }
 0x48f   :  { %3348 = vmatprep.subr.bf16.mxu0 %v7998_v30  ;;  %7213 = vmatprep.subr.bf16.mxu1 %v8029_v59 }
 0x492   :  { %3349 = vmatpush1.bf16.msra.mxu0 %v7996_v31  ;;  %7214 = vmatpush3.bf16.msra.mxu1 %v8030_v60  ;;  %v8051_v60 = vld [vmem:[#allocation5 + $0x900] ss:$12 sps:$4 sm:$0xff]  }
 0x493   :  { %3350 = vmatprep.subr.bf16.mxu0 %v8001_v34  ;;  %7215 = vmatprep.subr.bf16.mxu1 %v8034_v45  ;;  %v8057_v45 = vld [vmem:[#allocation5 + $0x91c] ss:$12 sps:$4 sm:$0xff]  }
 0x496   :  { %3351 = vmatpush1.bf16.msra.mxu0 %v7999_v36  ;;  %7216 = vmatpush3.bf16.msra.mxu1 %v8035_v6  ;;  %v8058_v6 = vld [vmem:[#allocation5 + $0x920] ss:$12 sps:$4 sm:$0xff]  }
 0x497   :  { %3352 = vmatprep.subr.bf16.mxu0 %v8004_v38  ;;  %7217 = vmatprep.subr.bf16.mxu1 %v8039_v35  ;;  %v8059_v35 = vld [vmem:[#allocation5 + $0x930] ss:$12 sps:$4 sm:$0xff]  }
 0x49a   :  { %3353 = vmatpush1.bf16.msra.mxu0 %v8002_v40  ;;  %7218 = vmatpush3.bf16.msra.mxu1 %v8040_v9  ;;  %v8065_v9 = vld [vmem:[#allocation5 + $0x94c] ss:$12 sps:$4 sm:$0xff]  }
 0x49b   :  { %3354 = vmatprep.subr.bf16.mxu0 %v8007_v41  ;;  %7219 = vmatprep.subr.bf16.mxu1 %v8044_v37  ;;  %v8066_v37 = vld [vmem:[#allocation5 + $0x950] ss:$12 sps:$4 sm:$0xff]  }
 0x49e   :  { %3355 = vmatpush1.bf16.msra.mxu0 %v8005_v42  ;;  %7220 = vmatpush3.bf16.msra.mxu1 %v8045_v49  ;;  %v8094_v49 = vld [vmem:[#allocation5 + $0xa28] ss:$12 sps:$4 sm:$0xff]  }
 0x49f   :  { %3356 = vmatprep.subr.bf16.mxu0 %v8010_v43  ;;  %7221 = vmatprep.subr.bf16.mxu1 %v8049_v12  ;;  %v8095_v12 = vld [vmem:[#allocation5 + $0x968] ss:$12 sps:$4 sm:$0xff]  }
 0x4a2   :  { %3357 = vmatpush1.bf16.msra.mxu0 %v8008_v44  ;;  %7222 = vmatpush3.bf16.msra.mxu1 %v8050_v14  ;;  %v8099_v14 = vld [vmem:[#allocation5 + $0xa40] ss:$12 sps:$4 sm:$0xff]  }
 0x4a3   :  { %3358 = vmatprep.subr.bf16.mxu0 %v8013_v46  ;;  %7426 = vmatprep.subr.bf16.mxu1 %v8616_v32 }
 0x4a6   :  { %3359 = vmatpush1.bf16.msra.mxu0 %v8011_v47 }
 0x4a7   :  { %3360 = vmatprep.subr.bf16.mxu0 %v8018_v48 }
 0x4aa   :  { %3361 = vmatpush1.bf16.msra.mxu0 %v8016_v50 }
 0x4ab   :  { %3362 = vmatprep.subr.bf16.mxu0 %v8023_v51 }
 0x4ae   :  { %3363 = vmatpush1.bf16.msra.mxu0 %v8021_v53 }
 0x4af   :  { %3364 = vmatprep.subr.bf16.mxu0 %v8028_v58 }
 0x4b2   :  { %3365 = vmatpush1.bf16.msra.mxu0 %v8026_v57 }
 0x4b3   :  { %3366 = vmatprep.subr.bf16.mxu0 %v8033_v63  ;;  %v8054_v63 = vld [vmem:[#allocation5 + $0x908] ss:$12 sps:$4 sm:$0xff]  }
 0x4b6   :  { %3367 = vmatpush1.bf16.msra.mxu0 %v8031_v5  ;;  %v8055_v5 = vld [vmem:[#allocation5 + $0x918] ss:$12 sps:$4 sm:$0xff]  }
 0x4b7   :  { %3368 = vmatprep.subr.bf16.mxu0 %v8038_v7  ;;  %v8061_v7 = vld [vmem:[#allocation5 + $0x934] ss:$12 sps:$4 sm:$0xff]  }
 0x4ba   :  { %3369 = vmatpush1.bf16.msra.mxu0 %v8036_v8  ;;  %v8062_v8 = vld [vmem:[#allocation5 + $0x938] ss:$12 sps:$4 sm:$0xff]  }
 0x4bb   :  { %3370 = vmatprep.subr.bf16.mxu0 %v8043_v10  ;;  %v8063_v10 = vld [vmem:[#allocation5 + $0x948] ss:$12 sps:$4 sm:$0xff]  }
 0x4be   :  { %3371 = vmatpush1.bf16.msra.mxu0 %v8041_v39  ;;  %v8069_v39 = vld [vmem:[#allocation5 + $0x964] ss:$12 sps:$4 sm:$0xff]  }
 0x4bf   :  { %3372 = vmatprep.subr.bf16.mxu0 %v8048_v11  ;;  %v8067_v11 = vld [vmem:[#allocation5 + $0x960] ss:$12 sps:$4 sm:$0xff]  }
 0x4c2   :  { %3373 = vmatpush1.bf16.msra.mxu0 %v8046_v13  ;;  %v8072_v13 = vld [vmem:[#allocation5 + $0x97c] ss:$12 sps:$4 sm:$0xff]  }
 0x4c3   :  { %3385 = vmatprep.subr.bf16.mxu0 %v8053_v15  ;;  %v8070_v15 = vld [vmem:[#allocation5 + $0x978] ss:$12 sps:$4 sm:$0xff]  }
 0x548   :  { %v7196_v16 = vpop.f32.mrb[20].mxu0 }
 0x549   :  { %v7197_v17 = vpop.f32.mrb[21].mxu0 }
 0x54a   :  { %v7198_v18 = vadd.f32 %v7197_v17, %v7196_v16  ;;  %v7199_v19 = vpop.f32.mrb[22].mxu0  ;;  %v8100_v16 = vld [vmem:[#allocation5 + $0x980] ss:$12 sps:$4 sm:$0xff]  }
 0x54b   :  { %v7200_v20 = vpop.f32.mrb[23].mxu0  ;;  %v8075_v17 = vld [vmem:[#allocation5 + $0x994] ss:$12 sps:$4 sm:$0xff]  }
 0x54c   :  { %v7201_v21 = vadd.f32 %v7200_v20, %v7199_v19  ;;  %v2864_v26 = vadd.f32 %v7198_v18, %v2416_v23  ;;  %v8073_v18 = vld [vmem:[#allocation5 + $0x990] ss:$12 sps:$4 sm:$0xff]   ;;  %v8078_v19 = vld [vmem:[#allocation5 + $0x9ac] ss:$12 sps:$4 sm:$0xff]   ;;  %v8076_v20 = vld [vmem:[#allocation5 + $0x9a8] ss:$12 sps:$4 sm:$0xff]  }
 0x54e   :  { %v2867_v36 = vadd.f32 %v7201_v21, %v2416_v23  ;;  %v8081_v21 = vld [vmem:[#allocation5 + $0x9c4] ss:$12 sps:$4 sm:$0xff]   ;;  %v8084_v23 = vld [vmem:[#allocation5 + $0x9dc] ss:$12 sps:$4 sm:$0xff]  }
 0x558   :  { %v2820_v27 = vpop.f32.mrb[24].mxu1  ;;  %v2904_v28 = vpop.f32.mrb[24].mxu0 }
 0x559   :  { %v7534_v29 = vadd.f32 %v2820_v27, %v2408_v24  ;;  %v2905_v30 = vadd.f32 %v2904_v28, %v2864_v26  ;;  %v2822_v31 = vpop.f32.mrb[25].mxu1  ;;  %v7424_v34 = vpop.f32.mrb[25].mxu0  ;;  %v8085_v26 = vld [vmem:[#allocation5 + $0x9f0] ss:$12 sps:$4 sm:$0xff]   ;;  %v8090_v27 = vld [vmem:[#allocation5 + $0xa0c] ss:$12 sps:$4 sm:$0xff]  }
 0x55a   :  { %v7535_v38 = vadd.f32 %v2822_v31, %v2412_v25  ;;  %v2824_v40 = vpop.f32.mrb[26].mxu1  ;;  %v2907_v41 = vpop.f32.mrb[26].mxu0  ;;  %v8088_v28 = vld [vmem:[#allocation5 + $0xa08] ss:$12 sps:$4 sm:$0xff]   ;;  %v8096_v34 = vld [vmem:[#allocation5 + $0xa38] ss:$12 sps:$4 sm:$0xff]  }
 0x55b   :  { %v7536_v42 = vadd.f32 %v2824_v40, %v2408_v24  ;;  %v2908_v43 = vadd.f32 %v2907_v41, %v2867_v36  ;;  %v2826_v44 = vpop.f32.mrb[27].mxu1  ;;  %v7425_v46 = vpop.f32.mrb[27].mxu0  ;;  %v2911_v48 = vmax.f32 %v7534_v29, 0.0  ;;  %v2913_v50 = vmax.f32 %v2905_v30, 0.0  ;;  %v8082_v24 = vld [vmem:[#allocation5 + $0x9d8] ss:$12 sps:$4 sm:$0xff]  }
 0x55c   :  { %v7537_v47 = vadd.f32 %v2826_v44, %v2412_v25  ;;  %v2912_v53 = vmax.f32 %v7535_v38, 0.0  ;;  %v8087_v25 = vld [vmem:[#allocation5 + $0x9f4] ss:$12 sps:$4 sm:$0xff]   ;;  %v8093_v29 = vld [vmem:[#allocation5 + $0xa24] ss:$12 sps:$4 sm:$0xff]  }
 0x55d   :  { %v2914_v51 = vmax.f32 %v7536_v42, 0.0  ;;  %v2916_v52 = vmax.f32 %v2908_v43, 0.0  ;;  %v8091_v30 = vld [vmem:[#allocation5 + $0xa20] ss:$12 sps:$4 sm:$0xff]   ;;  %v8098_v31 = vld [vmem:[#allocation5 + $0xa3c] ss:$12 sps:$4 sm:$0xff]  }
 0x55e   :  { %v2915_v54 = vmax.f32 %v7537_v47, 0.0  ;;  %v8103_v36 = vld [vmem:[#allocation5 + $0xa54] ss:$12 sps:$4 sm:$0xff]   ;;  %v8104_v38 = vld [vmem:[#allocation5 + $0xa58] ss:$12 sps:$4 sm:$0xff]  }
 0x55f   :  { %v2917_v57 = vpack.c.bf16 %v2914_v51, %v2911_v48  ;;  %v2919_v58 = vpack.c.bf16 %v2916_v52, %v2913_v50  ;;  %v8101_v40 = vld [vmem:[#allocation5 + $0xa50] ss:$12 sps:$4 sm:$0xff]   ;;  %v8105_v41 = vld [vmem:[#allocation5 + $0x998] ss:$12 sps:$4 sm:$0xff]   ;;  %v8106_v42 = vld [vmem:[#allocation5 + $0xa68] ss:$12 sps:$4 sm:$0xff]  }
 0x560   :  { %v2918_v59 = vpack.c.bf16 %v2915_v54, %v2912_v53  ;;  %v8108_v43 = vld [vmem:[#allocation5 + $0xa6c] ss:$12 sps:$4 sm:$0xff]   ;;  %v8109_v44 = vld [vmem:[#allocation5 + $0xa70] ss:$12 sps:$4 sm:$0xff]   ;;  %v8114_v48 = vld [vmem:[#allocation5 + $0xa88] ss:$12 sps:$4 sm:$0xff]  }
 0x561   :  { %v8110_v46 = vld [vmem:[#allocation5 + $0x9b0] ss:$12 sps:$4 sm:$0xff]   ;;  %v8111_v50 = vld [vmem:[#allocation5 + $0xa80] ss:$12 sps:$4 sm:$0xff]   ;;  %v8115_v51 = vld [vmem:[#allocation5 + $0x9c8] ss:$12 sps:$4 sm:$0xff]  }
 0x562   :  { %3374 = vmatprep.mubr.bf16.mxu0 %v2918_v59  ;;  %3460 = vmatprep.mubr.bf16.mxu1 %v2918_v59  ;;  %v8113_v47 = vld [vmem:[#allocation5 + $0xa84] ss:$12 sps:$4 sm:$0xff]   ;;  %v8118_v52 = vld [vmem:[#allocation5 + $0xa9c] ss:$12 sps:$4 sm:$0xff]   ;;  %v8119_v53 = vld [vmem:[#allocation5 + $0xaa0] ss:$12 sps:$4 sm:$0xff]  }
 0x563   :  { %3375 = vmatmul.mubr.bf16.vlgmr.msra.gmra.mrb[28].mxu0 %v2917_v57  ;;  %3461 = vmatmul.mubr.bf16.vlgmr.msra.gmra.mrb[28].mxu1 %v2917_v57  ;;  %v8116_v54 = vld [vmem:[#allocation5 + $0xa98] ss:$12 sps:$4 sm:$0xff]   ;;  %v8120_v57 = vld [vmem:[#allocation5 + $0x9e0] ss:$12 sps:$4 sm:$0xff]  }
 0x564   :  { %3386 = vmatpush1.bf16.msra.mxu0 %v8051_v60  ;;  %7427 = vmatpush3.bf16.msra.mxu1 %v8054_v63  ;;  %v8124_v59 = vld [vmem:[#allocation5 + $0xab8] ss:$12 sps:$4 sm:$0xff]   ;;  %v8121_v60 = vld [vmem:[#allocation5 + $0xab0] ss:$12 sps:$4 sm:$0xff]  }
 0x565   :  { %3387 = vmatprep.subr.bf16.mxu0 %v8057_v45  ;;  %7428 = vmatprep.subr.bf16.mxu1 %v8616_v32  ;;  %v8125_v63 = vld [vmem:[#allocation5 + $0x9f8] ss:$12 sps:$4 sm:$0xff]  }
 0x566   :  { %3417 = vmatprep.mubr.bf16.mxu0 %v8615_v1  ;;  %7434 = vmatprep.mubr.msk.bf16.mxu1 %vm8617_vm2, %v8616_v32  ;;  %v8128_v45 = vld [vmem:[#allocation5 + $0xacc] ss:$12 sps:$4 sm:$0xff]  }
 0x568   :  { %3388 = vmatpush1.bf16.msra.mxu0 %v8055_v5  ;;  %7429 = vmatpush3.bf16.msra.mxu1 %v8058_v6  ;;  %v8129_v5 = vld [vmem:[#allocation5 + $0xad0] ss:$12 sps:$4 sm:$0xff]   ;;  %v8126_v6 = vld [vmem:[#allocation5 + $0xac8] ss:$12 sps:$4 sm:$0xff]  }
 0x569   :  { %3389 = vmatprep.subr.bf16.mxu0 %v8061_v7  ;;  %7430 = vmatprep.subr.bf16.mxu1 %v8616_v32  ;;  %v8130_v7 = vld [vmem:[#allocation5 + $0xa10] ss:$12 sps:$4 sm:$0xff]  }
 0x56c   :  { %3390 = vmatpush1.bf16.msra.mxu0 %v8059_v35  ;;  %7431 = vmatpush3.bf16.msra.mxu1 %v8062_v8  ;;  %v8133_v35 = vld [vmem:[#allocation5 + $0xae4] ss:$12 sps:$4 sm:$0xff]  }
 0x56d   :  { %3391 = vmatprep.subr.bf16.mxu0 %v8065_v9  ;;  %7432 = vmatprep.subr.bf16.mxu1 %v8616_v32 }
 0x570   :  { %3392 = vmatpush1.bf16.msra.mxu0 %v8063_v10  ;;  %7433 = vmatpush3.bf16.msra.mxu1 %v8066_v37 }
 0x571   :  { %3941 = vmatprep.subr.bf16.mxu1 %v8069_v39  ;;  %7234 = vmatprep.subr.bf16.mxu0 %v8094_v49 }
 0x573   :  { %6811 = vmatmul.mubr.msk.bf16.vlgmr.msra.gmra.mrb[28].mxu0 %vm936_vm3, %v2919_v58  ;;  %7435 = vmatmul.mubr.msk.bf16.vlgmr.msra.gmra.mrb[32].mxu1 %vm936_vm3, %v2919_v58  ;;  %v8123_v58 = vld [vmem:[#allocation5 + $0xab4] ss:$12 sps:$4 sm:$0xff]  }
 0x574   :  { %3942 = vmatpush1.bf16.msra.mxu1 %v8067_v11  ;;  %7235 = vmatpush3.bf16.msra.mxu0 %v8095_v12  ;;  %v3002_v11 = vld [vmem:[#allocation7 + $0xc] sm:$0x7] }
 0x575   :  { %3943 = vmatprep.subr.bf16.mxu1 %v8072_v13  ;;  %7236 = vmatprep.subr.bf16.mxu0 %v8099_v14  ;;  %v3015_v12 = vrot.slane %v3002_v11, %v8856_v62  ;;  %v3007_v13 = vrot.slane %v3002_v11, %v8858_v0  ;;  %v3011_v14 = vrot.slane %v3002_v11, %v8860_v2  ;;  %v8164_v11 = vld [vmem:[#allocation5 + $0xbbc] ss:$12 sps:$4 sm:$0xff]  }
 0x578   :  { %3944 = vmatpush1.bf16.msra.mxu1 %v8070_v15  ;;  %7237 = vmatpush3.bf16.msra.mxu0 %v8100_v16 }
 0x579   :  { %3945 = vmatprep.subr.bf16.mxu1 %v8075_v17  ;;  %7238 = vmatprep.subr.bf16.mxu0 %v8104_v38 }
 0x57c   :  { %3946 = vmatpush1.bf16.msra.mxu1 %v8073_v18  ;;  %7239 = vmatpush3.bf16.msra.mxu0 %v8105_v41 }
 0x57d   :  { %3947 = vmatprep.subr.bf16.mxu1 %v8078_v19  ;;  %7240 = vmatprep.subr.bf16.mxu0 %v8109_v44 }
 0x580   :  { %3948 = vmatpush1.bf16.msra.mxu1 %v8076_v20  ;;  %7241 = vmatpush3.bf16.msra.mxu0 %v8110_v46  ;;  %v8131_v46 = vld [vmem:[#allocation5 + $0xae0] ss:$12 sps:$4 sm:$0xff]  }
 0x581   :  { %3949 = vmatprep.subr.bf16.mxu1 %v8081_v21  ;;  %7242 = vmatprep.subr.bf16.mxu0 %v8114_v48  ;;  %v8137_v48 = vld [vmem:[#allocation5 + $0xafc] ss:$12 sps:$4 sm:$0xff]  }
 0x584   :  { %3950 = vmatpush1.bf16.msra.mxu1 %v8079_v22  ;;  %7243 = vmatpush3.bf16.msra.mxu0 %v8115_v51  ;;  %v8138_v51 = vld [vmem:[#allocation5 + $0xb00] ss:$12 sps:$4 sm:$0xff]  }
 0x585   :  { %3951 = vmatprep.subr.bf16.mxu1 %v8084_v23  ;;  %7244 = vmatprep.subr.bf16.mxu0 %v8119_v53  ;;  %v8139_v53 = vld [vmem:[#allocation5 + $0xb10] ss:$12 sps:$4 sm:$0xff]  }
 0x588   :  { %3952 = vmatpush1.bf16.msra.mxu1 %v8082_v24  ;;  %7245 = vmatpush3.bf16.msra.mxu0 %v8120_v57  ;;  %v8145_v57 = vld [vmem:[#allocation5 + $0xb2c] ss:$12 sps:$4 sm:$0xff]  }
 0x589   :  { %3953 = vmatprep.subr.bf16.mxu1 %v8087_v25  ;;  %7246 = vmatprep.subr.bf16.mxu0 %v8124_v59  ;;  %v8146_v59 = vld [vmem:[#allocation5 + $0xb30] ss:$12 sps:$4 sm:$0xff]  }
 0x58c   :  { %3954 = vmatpush1.bf16.msra.mxu1 %v8085_v26  ;;  %7247 = vmatpush3.bf16.msra.mxu0 %v8125_v63  ;;  %v8174_v63 = vld [vmem:[#allocation5 + $0xc08] ss:$12 sps:$4 sm:$0xff]  }
 0x58d   :  { %3955 = vmatprep.subr.bf16.mxu1 %v8090_v27  ;;  %7248 = vmatprep.subr.bf16.mxu0 %v8129_v5  ;;  %v8175_v5 = vld [vmem:[#allocation5 + $0xb48] ss:$12 sps:$4 sm:$0xff]  }
 0x590   :  { %3956 = vmatpush1.bf16.msra.mxu1 %v8088_v28  ;;  %7249 = vmatpush3.bf16.msra.mxu0 %v8130_v7  ;;  %v8179_v7 = vld [vmem:[#allocation5 + $0xc20] ss:$12 sps:$4 sm:$0xff]  }
 0x591   :  { %3957 = vmatprep.subr.bf16.mxu1 %v8093_v29  ;;  %7438 = vmatprep.subr.bf16.mxu0 %v8616_v32 }
 0x594   :  { %3958 = vmatpush1.bf16.msra.mxu1 %v8091_v30 }
 0x595   :  { %3959 = vmatprep.subr.bf16.mxu1 %v8098_v31 }
 0x598   :  { %3960 = vmatpush1.bf16.msra.mxu1 %v8096_v34 }
 0x599   :  { %3961 = vmatprep.subr.bf16.mxu1 %v8103_v36 }
 0x59c   :  { %3962 = vmatpush1.bf16.msra.mxu1 %v8101_v40 }
 0x59d   :  { %3963 = vmatprep.subr.bf16.mxu1 %v8108_v43 }
 0x5a0   :  { %3964 = vmatpush1.bf16.msra.mxu1 %v8106_v42 }
 0x5a1   :  { %3965 = vmatprep.subr.bf16.mxu1 %v8113_v47  ;;  %v8134_v47 = vld [vmem:[#allocation5 + $0xae8] ss:$12 sps:$4 sm:$0xff]  }
 0x5a4   :  { %3966 = vmatpush1.bf16.msra.mxu1 %v8111_v50  ;;  %v8135_v50 = vld [vmem:[#allocation5 + $0xaf8] ss:$12 sps:$4 sm:$0xff]  }
 0x5a5   :  { %3967 = vmatprep.subr.bf16.mxu1 %v8118_v52  ;;  %v8141_v52 = vld [vmem:[#allocation5 + $0xb14] ss:$12 sps:$4 sm:$0xff]  }
 0x5a8   :  { %3968 = vmatpush1.bf16.msra.mxu1 %v8116_v54  ;;  %v8142_v54 = vld [vmem:[#allocation5 + $0xb18] ss:$12 sps:$4 sm:$0xff]  }
 0x5a9   :  { %3969 = vmatprep.subr.bf16.mxu1 %v8123_v58  ;;  %v8143_v58 = vld [vmem:[#allocation5 + $0xb28] ss:$12 sps:$4 sm:$0xff]  }
 0x5ac   :  { %3970 = vmatpush1.bf16.msra.mxu1 %v8121_v60  ;;  %v8149_v60 = vld [vmem:[#allocation5 + $0xb44] ss:$12 sps:$4 sm:$0xff]  }
 0x5ad   :  { %3971 = vmatprep.subr.bf16.mxu1 %v8128_v45  ;;  %v8147_v45 = vld [vmem:[#allocation5 + $0xb40] ss:$12 sps:$4 sm:$0xff]  }
 0x5b0   :  { %3972 = vmatpush1.bf16.msra.mxu1 %v8126_v6  ;;  %v8152_v6 = vld [vmem:[#allocation5 + $0xb5c] ss:$12 sps:$4 sm:$0xff]  }
 0x5b1   :  { %3984 = vmatprep.subr.bf16.mxu1 %v8133_v35  ;;  %v8150_v35 = vld [vmem:[#allocation5 + $0xb58] ss:$12 sps:$4 sm:$0xff]  }
 0x636   :  { %v7223_v8 = vpop.f32.mrb[28].mxu1 }
 0x637   :  { %v7224_v9 = vpop.f32.mrb[29].mxu1 }
 0x638   :  { %v7225_v10 = vadd.f32 %v7224_v9, %v7223_v8  ;;  %v7226_v37 = vpop.f32.mrb[30].mxu1  ;;  %v8155_v8 = vld [vmem:[#allocation5 + $0xb74] ss:$12 sps:$4 sm:$0xff]   ;;  %v8153_v9 = vld [vmem:[#allocation5 + $0xb70] ss:$12 sps:$4 sm:$0xff]  }
 0x639   :  { %v7227_v39 = vpop.f32.mrb[31].mxu1 }
 0x63a   :  { %v7228_v49 = vadd.f32 %v7227_v39, %v7226_v37  ;;  %v3463_v15 = vadd.f32 %v7225_v10, %v3015_v12  ;;  %v8158_v10 = vld [vmem:[#allocation5 + $0xb8c] ss:$12 sps:$4 sm:$0xff]   ;;  %v8156_v37 = vld [vmem:[#allocation5 + $0xb88] ss:$12 sps:$4 sm:$0xff]   ;;  %v8161_v39 = vld [vmem:[#allocation5 + $0xba4] ss:$12 sps:$4 sm:$0xff]  }
 0x63c   :  { %v3466_v22 = vadd.f32 %v7228_v49, %v3015_v12  ;;  %v8159_v49 = vld [vmem:[#allocation5 + $0xba0] ss:$12 sps:$4 sm:$0xff]   ;;  %v8162_v12 = vld [vmem:[#allocation5 + $0xbb8] ss:$12 sps:$4 sm:$0xff]  }
 0x646   :  { %v3419_v16 = vpop.f32.mrb[28].mxu0  ;;  %v3503_v17 = vpop.f32.mrb[32].mxu1 }
 0x647   :  { %v7538_v18 = vadd.f32 %v3419_v16, %v3007_v13  ;;  %v3504_v19 = vadd.f32 %v3503_v17, %v3463_v15  ;;  %v3421_v20 = vpop.f32.mrb[29].mxu0  ;;  %v7436_v21 = vpop.f32.mrb[33].mxu1  ;;  %v8170_v15 = vld [vmem:[#allocation5 + $0xbec] ss:$12 sps:$4 sm:$0xff]   ;;  %v8168_v16 = vld [vmem:[#allocation5 + $0xbe8] ss:$12 sps:$4 sm:$0xff]  }
 0x648   :  { %v7539_v23 = vadd.f32 %v3421_v20, %v3011_v14  ;;  %v3423_v24 = vpop.f32.mrb[30].mxu0  ;;  %v3506_v25 = vpop.f32.mrb[34].mxu1  ;;  %v8173_v17 = vld [vmem:[#allocation5 + $0xc04] ss:$12 sps:$4 sm:$0xff]   ;;  %v8180_v21 = vld [vmem:[#allocation5 + $0xb60] ss:$12 sps:$4 sm:$0xff]  }
 0x649   :  { %v7540_v26 = vadd.f32 %v3423_v24, %v3007_v13  ;;  %v3507_v27 = vadd.f32 %v3506_v25, %v3466_v22  ;;  %v3425_v28 = vpop.f32.mrb[31].mxu0  ;;  %v7437_v29 = vpop.f32.mrb[35].mxu1  ;;  %v3510_v31 = vmax.f32 %v7538_v18, 0.0  ;;  %v3512_v34 = vmax.f32 %v3504_v19, 0.0  ;;  %v8167_v13 = vld [vmem:[#allocation5 + $0xbd4] ss:$12 sps:$4 sm:$0xff]  }
 0x64a   :  { %v7541_v30 = vadd.f32 %v3425_v28, %v3011_v14  ;;  %v3511_v40 = vmax.f32 %v7539_v23, 0.0  ;;  %v8165_v14 = vld [vmem:[#allocation5 + $0xbd0] ss:$12 sps:$4 sm:$0xff]   ;;  %v8171_v18 = vld [vmem:[#allocation5 + $0xc00] ss:$12 sps:$4 sm:$0xff]  }
 0x64b   :  { %v3513_v36 = vmax.f32 %v7540_v26, 0.0  ;;  %v3515_v38 = vmax.f32 %v3507_v27, 0.0  ;;  %v8178_v19 = vld [vmem:[#allocation5 + $0xc1c] ss:$12 sps:$4 sm:$0xff]   ;;  %v8176_v20 = vld [vmem:[#allocation5 + $0xc18] ss:$12 sps:$4 sm:$0xff]  }
 0x64c   :  { %v3514_v41 = vmax.f32 %v7541_v30, 0.0  ;;  %v8183_v22 = vld [vmem:[#allocation5 + $0xc34] ss:$12 sps:$4 sm:$0xff]   ;;  %v8184_v23 = vld [vmem:[#allocation5 + $0xc38] ss:$12 sps:$4 sm:$0xff]  }
 0x64d   :  { %v3516_v42 = vpack.c.bf16 %v3513_v36, %v3510_v31  ;;  %v3518_v43 = vpack.c.bf16 %v3515_v38, %v3512_v34  ;;  %v8181_v24 = vld [vmem:[#allocation5 + $0xc30] ss:$12 sps:$4 sm:$0xff]   ;;  %v8185_v25 = vld [vmem:[#allocation5 + $0xb78] ss:$12 sps:$4 sm:$0xff]   ;;  %v8186_v28 = vld [vmem:[#allocation5 + $0xc48] ss:$12 sps:$4 sm:$0xff]  }
 0x64e   :  { %v3517_v44 = vpack.c.bf16 %v3514_v41, %v3511_v40  ;;  %v8188_v26 = vld [vmem:[#allocation5 + $0xc4c] ss:$12 sps:$4 sm:$0xff]   ;;  %v8189_v27 = vld [vmem:[#allocation5 + $0xc50] ss:$12 sps:$4 sm:$0xff]   ;;  %v8194_v31 = vld [vmem:[#allocation5 + $0xc68] ss:$12 sps:$4 sm:$0xff]  }
 0x64f   :  { %v8190_v29 = vld [vmem:[#allocation5 + $0xb90] ss:$12 sps:$4 sm:$0xff]   ;;  %v8191_v34 = vld [vmem:[#allocation5 + $0xc60] ss:$12 sps:$4 sm:$0xff]   ;;  %v8195_v36 = vld [vmem:[#allocation5 + $0xba8] ss:$12 sps:$4 sm:$0xff]  }
 0x650   :  { %3973 = vmatprep.mubr.bf16.mxu1 %v3517_v44  ;;  %4059 = vmatprep.mubr.bf16.mxu0 %v3517_v44  ;;  %v8193_v30 = vld [vmem:[#allocation5 + $0xc64] ss:$12 sps:$4 sm:$0xff]   ;;  %v8198_v38 = vld [vmem:[#allocation5 + $0xc7c] ss:$12 sps:$4 sm:$0xff]   ;;  %v8199_v40 = vld [vmem:[#allocation5 + $0xc80] ss:$12 sps:$4 sm:$0xff]  }
 0x651   :  { %3974 = vmatmul.mubr.bf16.vlgmr.msra.gmra.mrb[36].mxu1 %v3516_v42  ;;  %4060 = vmatmul.mubr.bf16.vlgmr.msra.gmra.mrb[32].mxu0 %v3516_v42  ;;  %v8196_v41 = vld [vmem:[#allocation5 + $0xc78] ss:$12 sps:$4 sm:$0xff]   ;;  %v8200_v42 = vld [vmem:[#allocation5 + $0xbc0] ss:$12 sps:$4 sm:$0xff]  }
 0x652   :  { %3985 = vmatpush1.bf16.msra.mxu1 %v8131_v46  ;;  %7439 = vmatpush3.bf16.msra.mxu0 %v8134_v47  ;;  %v8204_v44 = vld [vmem:[#allocation5 + $0xc98] ss:$12 sps:$4 sm:$0xff]   ;;  %v8201_v46 = vld [vmem:[#allocation5 + $0xc90] ss:$12 sps:$4 sm:$0xff]  }
 0x653   :  { %3986 = vmatprep.subr.bf16.mxu1 %v8137_v48  ;;  %7440 = vmatprep.subr.bf16.mxu0 %v8616_v32  ;;  %v8205_v47 = vld [vmem:[#allocation5 + $0xbd8] ss:$12 sps:$4 sm:$0xff]  }
 0x654   :  { %4016 = vmatprep.mubr.bf16.mxu1 %v8615_v1  ;;  %7446 = vmatprep.mubr.msk.bf16.mxu0 %vm8617_vm2, %v8616_v32  ;;  %v8208_v48 = vld [vmem:[#allocation5 + $0xcac] ss:$12 sps:$4 sm:$0xff]  }
 0x656   :  { %3987 = vmatpush1.bf16.msra.mxu1 %v8135_v50  ;;  %7441 = vmatpush3.bf16.msra.mxu0 %v8138_v51  ;;  %v8209_v50 = vld [vmem:[#allocation5 + $0xcb0] ss:$12 sps:$4 sm:$0xff]   ;;  %v8206_v51 = vld [vmem:[#allocation5 + $0xca8] ss:$12 sps:$4 sm:$0xff]  }
 0x657   :  { %3988 = vmatprep.subr.bf16.mxu1 %v8141_v52  ;;  %7442 = vmatprep.subr.bf16.mxu0 %v8616_v32  ;;  %v8210_v52 = vld [vmem:[#allocation5 + $0xbf0] ss:$12 sps:$4 sm:$0xff]  }
 0x65a   :  { %3989 = vmatpush1.bf16.msra.mxu1 %v8139_v53  ;;  %7443 = vmatpush3.bf16.msra.mxu0 %v8142_v54  ;;  %v8213_v53 = vld [vmem:[#allocation5 + $0xcc4] ss:$12 sps:$4 sm:$0xff]  }
 0x65b   :  { %3990 = vmatprep.subr.bf16.mxu1 %v8145_v57  ;;  %7444 = vmatprep.subr.bf16.mxu0 %v8616_v32 }
 0x65e   :  { %3991 = vmatpush1.bf16.msra.mxu1 %v8143_v58  ;;  %7445 = vmatpush3.bf16.msra.mxu0 %v8146_v59 }
 0x65f   :  { %4546 = vmatprep.subr.bf16.mxu0 %v8149_v60  ;;  %7261 = vmatprep.subr.bf16.mxu1 %v8174_v63 }
 0x661   :  { %6873 = vmatmul.mubr.msk.bf16.vlgmr.msra.gmra.mrb[36].mxu1 %vm936_vm3, %v3518_v43  ;;  %7447 = vmatmul.mubr.msk.bf16.vlgmr.msra.gmra.mrb[36].mxu0 %vm936_vm3, %v3518_v43  ;;  %v8203_v43 = vld [vmem:[#allocation5 + $0xc94] ss:$12 sps:$4 sm:$0xff]  }
 0x662   :  { %4547 = vmatpush1.bf16.msra.mxu0 %v8147_v45  ;;  %7262 = vmatpush3.bf16.msra.mxu1 %v8175_v5  ;;  %v3601_v45 = vld [vmem:[#allocation7 + $0xf] sm:$0x7] }
 0x663   :  { %4548 = vmatprep.subr.bf16.mxu0 %v8152_v6  ;;  %7263 = vmatprep.subr.bf16.mxu1 %v8179_v7  ;;  %v3614_v5 = vrot.slane %v3601_v45, %v8856_v62  ;;  %v3606_v6 = vrot.slane %v3601_v45, %v8858_v0  ;;  %v3610_v7 = vrot.slane %v3601_v45, %v8860_v2  ;;  %v8239_v45 = vld [vmem:[#allocation5 + $0xd80] ss:$12 sps:$4 sm:$0xff]  }
 0x666   :  { %4549 = vmatpush1.bf16.msra.mxu0 %v8150_v35  ;;  %7264 = vmatpush3.bf16.msra.mxu1 %v8180_v21 }
 0x667   :  { %4550 = vmatprep.subr.bf16.mxu0 %v8155_v8  ;;  %7265 = vmatprep.subr.bf16.mxu1 %v8184_v23 }
 0x66a   :  { %4551 = vmatpush1.bf16.msra.mxu0 %v8153_v9  ;;  %7266 = vmatpush3.bf16.msra.mxu1 %v8185_v25 }
 0x66b   :  { %4552 = vmatprep.subr.bf16.mxu0 %v8158_v10  ;;  %7267 = vmatprep.subr.bf16.mxu1 %v8189_v27 }
 0x66e   :  { %4553 = vmatpush1.bf16.msra.mxu0 %v8156_v37  ;;  %7268 = vmatpush3.bf16.msra.mxu1 %v8190_v29  ;;  %v8214_v29 = vld [vmem:[#allocation5 + $0xcc8] ss:$12 sps:$4 sm:$0xff]  }
 0x66f   :  { %4554 = vmatprep.subr.bf16.mxu0 %v8161_v39  ;;  %7269 = vmatprep.subr.bf16.mxu1 %v8194_v31  ;;  %v8221_v31 = vld [vmem:[#allocation5 + $0xcf4] ss:$12 sps:$4 sm:$0xff]  }
 0x672   :  { %4555 = vmatpush1.bf16.msra.mxu0 %v8159_v49  ;;  %7270 = vmatpush3.bf16.msra.mxu1 %v8195_v36  ;;  %v8222_v36 = vld [vmem:[#allocation5 + $0xcf8] ss:$12 sps:$4 sm:$0xff]  }
 0x673   :  { %4556 = vmatprep.subr.bf16.mxu0 %v8164_v11  ;;  %7271 = vmatprep.subr.bf16.mxu1 %v8199_v40  ;;  %v8225_v40 = vld [vmem:[#allocation5 + $0xd0c] ss:$12 sps:$4 sm:$0xff]  }
 0x676   :  { %4557 = vmatpush1.bf16.msra.mxu0 %v8162_v12  ;;  %7272 = vmatpush3.bf16.msra.mxu1 %v8200_v42  ;;  %v8223_v42 = vld [vmem:[#allocation5 + $0xd08] ss:$12 sps:$4 sm:$0xff]  }
 0x677   :  { %4558 = vmatprep.subr.bf16.mxu0 %v8167_v13  ;;  %7273 = vmatprep.subr.bf16.mxu1 %v8204_v44 }
 0x67a   :  { %4559 = vmatpush1.bf16.msra.mxu0 %v8165_v14  ;;  %7274 = vmatpush3.bf16.msra.mxu1 %v8205_v47  ;;  %v8254_v47 = vld [vmem:[#allocation5 + $0xde8] ss:$12 sps:$4 sm:$0xff]  }
 0x67b   :  { %4560 = vmatprep.subr.bf16.mxu0 %v8170_v15  ;;  %7275 = vmatprep.subr.bf16.mxu1 %v8209_v50  ;;  %v8255_v50 = vld [vmem:[#allocation5 + $0xd28] ss:$12 sps:$4 sm:$0xff]  }
 0x67e   :  { %4561 = vmatpush1.bf16.msra.mxu0 %v8168_v16  ;;  %7276 = vmatpush3.bf16.msra.mxu1 %v8210_v52  ;;  %v8259_v52 = vld [vmem:[#allocation5 + $0xe00] ss:$12 sps:$4 sm:$0xff]  }
 0x67f   :  { %4562 = vmatprep.subr.bf16.mxu0 %v8173_v17  ;;  %7450 = vmatprep.subr.bf16.mxu1 %v8616_v32 }
 0x682   :  { %4563 = vmatpush1.bf16.msra.mxu0 %v8171_v18 }
 0x683   :  { %4564 = vmatprep.subr.bf16.mxu0 %v8178_v19 }
 0x686   :  { %4565 = vmatpush1.bf16.msra.mxu0 %v8176_v20 }
 0x687   :  { %4566 = vmatprep.subr.bf16.mxu0 %v8183_v22 }
 0x68a   :  { %4567 = vmatpush1.bf16.msra.mxu0 %v8181_v24 }
 0x68b   :  { %4568 = vmatprep.subr.bf16.mxu0 %v8188_v26 }
 0x68e   :  { %4569 = vmatpush1.bf16.msra.mxu0 %v8186_v28  ;;  %v8211_v28 = vld [vmem:[#allocation5 + $0xcc0] ss:$12 sps:$4 sm:$0xff]  }
 0x68f   :  { %4570 = vmatprep.subr.bf16.mxu0 %v8193_v30 }
 0x692   :  { %4571 = vmatpush1.bf16.msra.mxu0 %v8191_v34  ;;  %v8219_v34 = vld [vmem:[#allocation5 + $0xcf0] ss:$12 sps:$4 sm:$0xff]  }
 0x693   :  { %4572 = vmatprep.subr.bf16.mxu0 %v8198_v38 }
 0x696   :  { %4573 = vmatpush1.bf16.msra.mxu0 %v8196_v41 }
 0x697   :  { %4574 = vmatprep.subr.bf16.mxu0 %v8203_v43  ;;  %v8226_v43 = vld [vmem:[#allocation5 + $0xd10] ss:$12 sps:$4 sm:$0xff]  }
 0x69a   :  { %4575 = vmatpush1.bf16.msra.mxu0 %v8201_v46  ;;  %v8229_v46 = vld [vmem:[#allocation5 + $0xd24] ss:$12 sps:$4 sm:$0xff]  }
 0x69b   :  { %4576 = vmatprep.subr.bf16.mxu0 %v8208_v48  ;;  %v8227_v48 = vld [vmem:[#allocation5 + $0xd20] ss:$12 sps:$4 sm:$0xff]  }
 0x69e   :  { %4577 = vmatpush1.bf16.msra.mxu0 %v8206_v51 }
 0x69f   :  { %4589 = vmatprep.subr.bf16.mxu0 %v8213_v53  ;;  %v8230_v53 = vld [vmem:[#allocation5 + $0xd38] ss:$12 sps:$4 sm:$0xff]  }
 0x724   :  { %v7250_v54 = vpop.f32.mrb[32].mxu0 }
 0x725   :  { %v7251_v57 = vpop.f32.mrb[33].mxu0 }
 0x726   :  { %v7252_v58 = vadd.f32 %v7251_v57, %v7250_v54  ;;  %v7253_v59 = vpop.f32.mrb[34].mxu0  ;;  %v8260_v54 = vld [vmem:[#allocation5 + $0xd40] ss:$12 sps:$4 sm:$0xff]  }
 0x727   :  { %v7254_v60 = vpop.f32.mrb[35].mxu0  ;;  %v8235_v57 = vld [vmem:[#allocation5 + $0xd54] ss:$12 sps:$4 sm:$0xff]  }
 0x728   :  { %v7255_v63 = vadd.f32 %v7254_v60, %v7253_v59  ;;  %v4062_v35 = vadd.f32 %v7252_v58, %v3614_v5  ;;  %v8233_v58 = vld [vmem:[#allocation5 + $0xd50] ss:$12 sps:$4 sm:$0xff]   ;;  %v8238_v59 = vld [vmem:[#allocation5 + $0xd6c] ss:$12 sps:$4 sm:$0xff]   ;;  %v8236_v60 = vld [vmem:[#allocation5 + $0xd68] ss:$12 sps:$4 sm:$0xff]  }
 0x72a   :  { %v4065_v11 = vadd.f32 %v7255_v63, %v3614_v5  ;;  %v8241_v63 = vld [vmem:[#allocation5 + $0xd84] ss:$12 sps:$4 sm:$0xff]   ;;  %v8244_v5 = vld [vmem:[#allocation5 + $0xd9c] ss:$12 sps:$4 sm:$0xff]  }
 0x734   :  { %v4018_v8 = vpop.f32.mrb[36].mxu1  ;;  %v4102_v9 = vpop.f32.mrb[36].mxu0 }
 0x735   :  { %v7542_v10 = vadd.f32 %v4018_v8, %v3606_v6  ;;  %v4103_v37 = vadd.f32 %v4102_v9, %v4062_v35  ;;  %v4020_v39 = vpop.f32.mrb[37].mxu1  ;;  %v7448_v49 = vpop.f32.mrb[37].mxu0  ;;  %v8245_v35 = vld [vmem:[#allocation5 + $0xdb0] ss:$12 sps:$4 sm:$0xff]   ;;  %v8250_v8 = vld [vmem:[#allocation5 + $0xdcc] ss:$12 sps:$4 sm:$0xff]  }
 0x736   :  { %v7543_v12 = vadd.f32 %v4020_v39, %v3610_v7  ;;  %v4022_v13 = vpop.f32.mrb[38].mxu1  ;;  %v4105_v14 = vpop.f32.mrb[38].mxu0  ;;  %v8248_v9 = vld [vmem:[#allocation5 + $0xdc8] ss:$12 sps:$4 sm:$0xff]   ;;  %v8256_v49 = vld [vmem:[#allocation5 + $0xdf8] ss:$12 sps:$4 sm:$0xff]  }
 0x737   :  { %v7544_v15 = vadd.f32 %v4022_v13, %v3606_v6  ;;  %v4106_v16 = vadd.f32 %v4105_v14, %v4065_v11  ;;  %v4024_v17 = vpop.f32.mrb[39].mxu1  ;;  %v7449_v18 = vpop.f32.mrb[39].mxu0  ;;  %v8953_v21 = vadd.f32 %v7542_v10, %v8890_v55  ;;  %v8217_v55 = vld [vmem:[#allocation5 + $0xcdc] ss:$12 sps:$4 sm:$0xff]   ;;  %v8974_v41 = vadd.f32 %v4103_v37, %v8893_v56  ;;  %v8242_v6 = vld [vmem:[#allocation5 + $0xd98] ss:$12 sps:$4 sm:$0xff]  }
 0x738   :  { %v8950_v19 = vadd.f32 %v7543_v12, %v8896_v61  ;;  %v7545_v20 = vadd.f32 %v4024_v17, %v3610_v7  ;;  %v8232_v56 = vld [vmem:[#allocation5 + $0xd3c] ss:$12 sps:$4 sm:$0xff]   ;;  %v8247_v7 = vld [vmem:[#allocation5 + $0xdb4] ss:$12 sps:$4 sm:$0xff]   ;;  %v8253_v10 = vld [vmem:[#allocation5 + $0xde4] ss:$12 sps:$4 sm:$0xff]  }
 0x739   :  { %v8956_v22 = vadd.f32 %v7544_v15, %v8899_v3  ;;  %v4115_v27 = vmax.f32 %v8953_v21, 0.0  ;;  %v8215_v3 = vld [vmem:[#allocation5 + $0xcd8] ss:$12 sps:$4 sm:$0xff]   ;;  %v8970_v38 = vadd.f32 %v4106_v16, %v8902_v4  ;;  %v4117_v4 = vmax.f32 %v8974_v41, 0.0  ;;  %v8251_v37 = vld [vmem:[#allocation5 + $0xde0] ss:$12 sps:$4 sm:$0xff]  }
 0x73a   :  { %v8959_v23 = vadd.f32 %v7545_v20, %v8905_v33  ;;  %v4116_v25 = vmax.f32 %v8950_v19, 0.0  ;;  %v8218_v33 = vld [vmem:[#allocation5 + $0xce0] ss:$12 sps:$4 sm:$0xff]   ;;  %v8258_v39 = vld [vmem:[#allocation5 + $0xdfc] ss:$12 sps:$4 sm:$0xff]  }
 0x73b   :  { %v4118_v24 = vmax.f32 %v8956_v22, 0.0  ;;  %v4120_v44 = vmax.f32 %v8970_v38, 0.0  ;;  %v8263_v11 = vld [vmem:[#allocation5 + $0xe14] ss:$12 sps:$4 sm:$0xff]   ;;  %v8264_v12 = vld [vmem:[#allocation5 + $0xe18] ss:$12 sps:$4 sm:$0xff]  }
 0x73c   :  { %v4119_v26 = vmax.f32 %v8959_v23, 0.0  ;;  %v8261_v13 = vld [vmem:[#allocation5 + $0xe10] ss:$12 sps:$4 sm:$0xff]   ;;  %v8265_v14 = vld [vmem:[#allocation5 + $0xd58] ss:$12 sps:$4 sm:$0xff]  }
 0x73d   :  { %v4121_v30 = vpack.c.bf16 %v4118_v24, %v4115_v27  ;;  %v4123_v51 = vpack.c.bf16 %v4120_v44, %v4117_v4  ;;  %v8266_v15 = vld [vmem:[#allocation5 + $0xe28] ss:$12 sps:$4 sm:$0xff]   ;;  %v8268_v16 = vld [vmem:[#allocation5 + $0xe2c] ss:$12 sps:$4 sm:$0xff]   ;;  %v8269_v17 = vld [vmem:[#allocation5 + $0xe30] ss:$12 sps:$4 sm:$0xff]  }
 0x73e   :  { %v4122_v61 = vpack.c.bf16 %v4119_v26, %v4116_v25  ;;  %v8270_v18 = vld [vmem:[#allocation5 + $0xd70] ss:$12 sps:$4 sm:$0xff]   ;;  %v8274_v24 = vld [vmem:[#allocation5 + $0xe48] ss:$12 sps:$4 sm:$0xff]   ;;  %v8271_v25 = vld [vmem:[#allocation5 + $0xe40] ss:$12 sps:$4 sm:$0xff]  }
 0x73f   :  { %v8273_v20 = vld [vmem:[#allocation5 + $0xe44] ss:$12 sps:$4 sm:$0xff]   ;;  %v8275_v26 = vld [vmem:[#allocation5 + $0xd88] ss:$12 sps:$4 sm:$0xff]  }
 0x740   :  { %4578 = vmatprep.mubr.bf16.mxu0 %v4122_v61  ;;  %4664 = vmatprep.mubr.bf16.mxu1 %v4122_v61  ;;  %v8278_v27 = vld [vmem:[#allocation5 + $0xe5c] ss:$12 sps:$4 sm:$0xff]   ;;  %v8279_v61 = vld [vmem:[#allocation5 + $0xe60] ss:$12 sps:$4 sm:$0xff]  }
 0x741   :  { %4579 = vmatmul.mubr.bf16.vlgmr.msra.gmra.mrb[40].mxu0 %v4121_v30  ;;  %4665 = vmatmul.mubr.bf16.vlgmr.msra.gmra.mrb[40].mxu1 %v4121_v30  ;;  %v8283_v30 = vld [vmem:[#allocation5 + $0xe74] ss:$12 sps:$4 sm:$0xff]  }
 0x742   :  { %4590 = vmatpush1.bf16.msra.mxu0 %v8211_v28  ;;  %7451 = vmatpush3.bf16.msra.mxu1 %v8214_v29  ;;  %v8276_v28 = vld [vmem:[#allocation5 + $0xe58] ss:$12 sps:$4 sm:$0xff]   ;;  %v8280_v29 = vld [vmem:[#allocation5 + $0xda0] ss:$12 sps:$4 sm:$0xff]  }
 0x743   :  { %4591 = vmatprep.subr.bf16.mxu0 %v8217_v55  ;;  %7452 = vmatprep.subr.bf16.mxu1 %v8616_v32  ;;  %v8284_v55 = vld [vmem:[#allocation5 + $0xe78] ss:$12 sps:$4 sm:$0xff]  }
 0x744   :  { %4621 = vmatprep.mubr.bf16.mxu0 %v8615_v1  ;;  %7458 = vmatprep.mubr.msk.bf16.mxu1 %vm8617_vm2, %v8616_v32 }
 0x746   :  { %4592 = vmatpush1.bf16.msra.mxu0 %v8215_v3  ;;  %7453 = vmatpush3.bf16.msra.mxu1 %v8218_v33  ;;  %v8281_v3 = vld [vmem:[#allocation5 + $0xe70] ss:$12 sps:$4 sm:$0xff]   ;;  %v8285_v33 = vld [vmem:[#allocation5 + $0xdb8] ss:$12 sps:$4 sm:$0xff]  }
 0x747   :  { %4593 = vmatprep.subr.bf16.mxu0 %v8221_v31  ;;  %7454 = vmatprep.subr.bf16.mxu1 %v8616_v32  ;;  %v8288_v31 = vld [vmem:[#allocation5 + $0xe8c] ss:$12 sps:$4 sm:$0xff]  }
 0x74a   :  { %4594 = vmatpush1.bf16.msra.mxu0 %v8219_v34  ;;  %7455 = vmatpush3.bf16.msra.mxu1 %v8222_v36  ;;  %v8289_v34 = vld [vmem:[#allocation5 + $0xe90] ss:$12 sps:$4 sm:$0xff]   ;;  %v8286_v36 = vld [vmem:[#allocation5 + $0xe88] ss:$12 sps:$4 sm:$0xff]  }
 0x74b   :  { %4595 = vmatprep.subr.bf16.mxu0 %v8225_v40  ;;  %7456 = vmatprep.subr.bf16.mxu1 %v8616_v32  ;;  %v8290_v40 = vld [vmem:[#allocation5 + $0xdd0] ss:$12 sps:$4 sm:$0xff]  }
 0x74e   :  { %4596 = vmatpush1.bf16.msra.mxu0 %v8223_v42  ;;  %7457 = vmatpush3.bf16.msra.mxu1 %v8226_v43  ;;  %v8293_v42 = vld [vmem:[#allocation5 + $0xea4] ss:$12 sps:$4 sm:$0xff]  }
 0x74f   :  { %5145 = vmatprep.subr.bf16.mxu1 %v8229_v46  ;;  %7288 = vmatprep.subr.bf16.mxu0 %v8254_v47 }
 0x751   :  { %6935 = vmatmul.mubr.msk.bf16.vlgmr.msra.gmra.mrb[40].mxu0 %vm936_vm3, %v4123_v51  ;;  %7459 = vmatmul.mubr.msk.bf16.vlgmr.msra.gmra.mrb[44].mxu1 %vm936_vm3, %v4123_v51 }
 0x752   :  { %5146 = vmatpush1.bf16.msra.mxu1 %v8227_v48  ;;  %7289 = vmatpush3.bf16.msra.mxu0 %v8255_v50  ;;  %v4206_v50 = vld [vmem:[#allocation7 + $0x12] sm:$0x7] }
 0x753   :  { %5147 = vmatprep.subr.bf16.mxu1 %v8232_v56  ;;  %7290 = vmatprep.subr.bf16.mxu0 %v8259_v52  ;;  %v4219_v51 = vrot.slane %v4206_v50, %v8856_v62  ;;  %v4211_v56 = vrot.slane %v4206_v50, %v8858_v0  ;;  %v4215_v52 = vrot.slane %v4206_v50, %v8860_v2  ;;  %v8319_v50 = vld [vmem:[#allocation5 + $0xf60] ss:$12 sps:$4 sm:$0xff]  }
 0x756   :  { %5148 = vmatpush1.bf16.msra.mxu1 %v8230_v53  ;;  %7291 = vmatpush3.bf16.msra.mxu0 %v8260_v54 }
 0x757   :  { %5149 = vmatprep.subr.bf16.mxu1 %v8235_v57  ;;  %7292 = vmatprep.subr.bf16.mxu0 %v8264_v12 }
 0x75a   :  { %5150 = vmatpush1.bf16.msra.mxu1 %v8233_v58  ;;  %7293 = vmatpush3.bf16.msra.mxu0 %v8265_v14 }
 0x75b   :  { %5151 = vmatprep.subr.bf16.mxu1 %v8238_v59  ;;  %7294 = vmatprep.subr.bf16.mxu0 %v8269_v17 }
 0x75e   :  { %5152 = vmatpush1.bf16.msra.mxu1 %v8236_v60  ;;  %7295 = vmatpush3.bf16.msra.mxu0 %v8270_v18  ;;  %v8291_v18 = vld [vmem:[#allocation5 + $0xea0] ss:$12 sps:$4 sm:$0xff]  }
 0x75f   :  { %5153 = vmatprep.subr.bf16.mxu1 %v8241_v63  ;;  %7296 = vmatprep.subr.bf16.mxu0 %v8274_v24  ;;  %v8297_v24 = vld [vmem:[#allocation5 + $0xebc] ss:$12 sps:$4 sm:$0xff]  }
 0x762   :  { %5154 = vmatpush1.bf16.msra.mxu1 %v8239_v45  ;;  %7297 = vmatpush3.bf16.msra.mxu0 %v8275_v26  ;;  %v8298_v26 = vld [vmem:[#allocation5 + $0xec0] ss:$12 sps:$4 sm:$0xff]  }
 0x763   :  { %5155 = vmatprep.subr.bf16.mxu1 %v8244_v5  ;;  %7298 = vmatprep.subr.bf16.mxu0 %v8279_v61  ;;  %v8299_v61 = vld [vmem:[#allocation5 + $0xed0] ss:$12 sps:$4 sm:$0xff]  }
 0x766   :  { %5156 = vmatpush1.bf16.msra.mxu1 %v8242_v6  ;;  %7299 = vmatpush3.bf16.msra.mxu0 %v8280_v29  ;;  %v8305_v29 = vld [vmem:[#allocation5 + $0xeec] ss:$12 sps:$4 sm:$0xff]  }
 0x767   :  { %5157 = vmatprep.subr.bf16.mxu1 %v8247_v7  ;;  %7300 = vmatprep.subr.bf16.mxu0 %v8284_v55  ;;  %v8306_v55 = vld [vmem:[#allocation5 + $0xef0] ss:$12 sps:$4 sm:$0xff]  }
 0x76a   :  { %5158 = vmatpush1.bf16.msra.mxu1 %v8245_v35  ;;  %7301 = vmatpush3.bf16.msra.mxu0 %v8285_v33  ;;  %v8334_v33 = vld [vmem:[#allocation5 + $0xfc8] ss:$12 sps:$4 sm:$0xff]  }
 0x76b   :  { %5159 = vmatprep.subr.bf16.mxu1 %v8250_v8  ;;  %7302 = vmatprep.subr.bf16.mxu0 %v8289_v34  ;;  %v8335_v34 = vld [vmem:[#allocation5 + $0xf08] ss:$12 sps:$4 sm:$0xff]  }
 0x76e   :  { %5160 = vmatpush1.bf16.msra.mxu1 %v8248_v9  ;;  %7303 = vmatpush3.bf16.msra.mxu0 %v8290_v40  ;;  %v8339_v40 = vld [vmem:[#allocation5 + $0xfe0] ss:$12 sps:$4 sm:$0xff]  }
 0x76f   :  { %5161 = vmatprep.subr.bf16.mxu1 %v8253_v10  ;;  %7462 = vmatprep.subr.bf16.mxu0 %v8616_v32 }
 0x772   :  { %5162 = vmatpush1.bf16.msra.mxu1 %v8251_v37 }
 0x773   :  { %5163 = vmatprep.subr.bf16.mxu1 %v8258_v39 }
 0x776   :  { %5164 = vmatpush1.bf16.msra.mxu1 %v8256_v49 }
 0x777   :  { %5165 = vmatprep.subr.bf16.mxu1 %v8263_v11 }
 0x77a   :  { %5166 = vmatpush1.bf16.msra.mxu1 %v8261_v13 }
 0x77b   :  { %5167 = vmatprep.subr.bf16.mxu1 %v8268_v16 }
 0x77e   :  { %5168 = vmatpush1.bf16.msra.mxu1 %v8266_v15 }
 0x77f   :  { %5169 = vmatprep.subr.bf16.mxu1 %v8273_v20  ;;  %v8294_v20 = vld [vmem:[#allocation5 + $0xea8] ss:$12 sps:$4 sm:$0xff]  }
 0x782   :  { %5170 = vmatpush1.bf16.msra.mxu1 %v8271_v25  ;;  %v8295_v25 = vld [vmem:[#allocation5 + $0xeb8] ss:$12 sps:$4 sm:$0xff]  }
 0x783   :  { %5171 = vmatprep.subr.bf16.mxu1 %v8278_v27  ;;  %v8301_v27 = vld [vmem:[#allocation5 + $0xed4] ss:$12 sps:$4 sm:$0xff]  }
 0x786   :  { %5172 = vmatpush1.bf16.msra.mxu1 %v8276_v28  ;;  %v8302_v28 = vld [vmem:[#allocation5 + $0xed8] ss:$12 sps:$4 sm:$0xff]  }
 0x787   :  { %5173 = vmatprep.subr.bf16.mxu1 %v8283_v30  ;;  %v8303_v30 = vld [vmem:[#allocation5 + $0xee8] ss:$12 sps:$4 sm:$0xff]  }
 0x78a   :  { %5174 = vmatpush1.bf16.msra.mxu1 %v8281_v3  ;;  %v8309_v3 = vld [vmem:[#allocation5 + $0xf04] ss:$12 sps:$4 sm:$0xff]  }
 0x78b   :  { %5175 = vmatprep.subr.bf16.mxu1 %v8288_v31  ;;  %v8307_v31 = vld [vmem:[#allocation5 + $0xf00] ss:$12 sps:$4 sm:$0xff]  }
 0x78e   :  { %5176 = vmatpush1.bf16.msra.mxu1 %v8286_v36  ;;  %v8312_v36 = vld [vmem:[#allocation5 + $0xf1c] ss:$12 sps:$4 sm:$0xff]  }
 0x78f   :  { %5188 = vmatprep.subr.bf16.mxu1 %v8293_v42  ;;  %v8310_v42 = vld [vmem:[#allocation5 + $0xf18] ss:$12 sps:$4 sm:$0xff]  }
 0x814   :  { %v7277_v43 = vpop.f32.mrb[40].mxu1 }
 0x815   :  { %v7278_v44 = vpop.f32.mrb[41].mxu1 }
 0x816   :  { %v7279_v46 = vadd.f32 %v7278_v44, %v7277_v43  ;;  %v7280_v47 = vpop.f32.mrb[42].mxu1  ;;  %v8340_v43 = vld [vmem:[#allocation5 + $0xf20] ss:$12 sps:$4 sm:$0xff]  }
 0x817   :  { %v7281_v4 = vpop.f32.mrb[43].mxu1  ;;  %v8315_v44 = vld [vmem:[#allocation5 + $0xf34] ss:$12 sps:$4 sm:$0xff]  }
 0x818   :  { %v7282_v48 = vadd.f32 %v7281_v4, %v7280_v47  ;;  %v4667_v53 = vadd.f32 %v7279_v46, %v4219_v51  ;;  %v8313_v46 = vld [vmem:[#allocation5 + $0xf30] ss:$12 sps:$4 sm:$0xff]   ;;  %v8318_v47 = vld [vmem:[#allocation5 + $0xf4c] ss:$12 sps:$4 sm:$0xff]   ;;  %v8316_v4 = vld [vmem:[#allocation5 + $0xf48] ss:$12 sps:$4 sm:$0xff]  }
 0x81a   :  { %v4670_v45 = vadd.f32 %v7282_v48, %v4219_v51  ;;  %v8321_v48 = vld [vmem:[#allocation5 + $0xf64] ss:$12 sps:$4 sm:$0xff]   ;;  %v8324_v51 = vld [vmem:[#allocation5 + $0xf7c] ss:$12 sps:$4 sm:$0xff]  }
 0x824   :  { %v4623_v54 = vpop.f32.mrb[40].mxu0  ;;  %v4707_v57 = vpop.f32.mrb[44].mxu1 }
 0x825   :  { %v7546_v58 = vadd.f32 %v4623_v54, %v4211_v56  ;;  %v4708_v59 = vadd.f32 %v4707_v57, %v4667_v53  ;;  %v4625_v60 = vpop.f32.mrb[41].mxu0  ;;  %v7460_v63 = vpop.f32.mrb[45].mxu1  ;;  %v8325_v53 = vld [vmem:[#allocation5 + $0xf90] ss:$12 sps:$4 sm:$0xff]   ;;  %v8330_v54 = vld [vmem:[#allocation5 + $0xfac] ss:$12 sps:$4 sm:$0xff]  }
 0x826   :  { %v7547_v5 = vadd.f32 %v4625_v60, %v4215_v52  ;;  %v4627_v6 = vpop.f32.mrb[42].mxu0  ;;  %v4710_v7 = vpop.f32.mrb[46].mxu1  ;;  %v8328_v57 = vld [vmem:[#allocation5 + $0xfa8] ss:$12 sps:$4 sm:$0xff]   ;;  %v8336_v63 = vld [vmem:[#allocation5 + $0xfd8] ss:$12 sps:$4 sm:$0xff]  }
 0x827   :  { %v7548_v35 = vadd.f32 %v4627_v6, %v4211_v56  ;;  %v4711_v8 = vadd.f32 %v4710_v7, %v4670_v45  ;;  %v4629_v9 = vpop.f32.mrb[43].mxu0  ;;  %v7461_v10 = vpop.f32.mrb[47].mxu1  ;;  %v4714_v39 = vmax.f32 %v7546_v58, 0.0  ;;  %v4716_v49 = vmax.f32 %v4708_v59, 0.0  ;;  %v8322_v56 = vld [vmem:[#allocation5 + $0xf78] ss:$12 sps:$4 sm:$0xff]  }
 0x828   :  { %v7549_v37 = vadd.f32 %v4629_v9, %v4215_v52  ;;  %v4715_v13 = vmax.f32 %v7547_v5, 0.0  ;;  %v8327_v52 = vld [vmem:[#allocation5 + $0xf94] ss:$12 sps:$4 sm:$0xff]   ;;  %v8333_v58 = vld [vmem:[#allocation5 + $0xfc4] ss:$12 sps:$4 sm:$0xff]  }
 0x829   :  { %v4717_v11 = vmax.f32 %v7548_v35, 0.0  ;;  %v4719_v12 = vmax.f32 %v4711_v8, 0.0  ;;  %v8331_v59 = vld [vmem:[#allocation5 + $0xfc0] ss:$12 sps:$4 sm:$0xff]   ;;  %v8338_v60 = vld [vmem:[#allocation5 + $0xfdc] ss:$12 sps:$4 sm:$0xff]  }
 0x82a   :  { %v4718_v14 = vmax.f32 %v7549_v37, 0.0  ;;  %v8343_v45 = vld [vmem:[#allocation5 + $0xff4] ss:$12 sps:$4 sm:$0xff]   ;;  %v8344_v5 = vld [vmem:[#allocation5 + $0xff8] ss:$12 sps:$4 sm:$0xff]  }
 0x82b   :  { %v4720_v15 = vpack.c.bf16 %v4717_v11, %v4714_v39  ;;  %v4722_v16 = vpack.c.bf16 %v4719_v12, %v4716_v49  ;;  %v8341_v6 = vld [vmem:[#allocation5 + $0xff0] ss:$12 sps:$4 sm:$0xff]   ;;  %v8345_v7 = vld [vmem:[#allocation5 + $0xf38] ss:$12 sps:$4 sm:$0xff]   ;;  %v8346_v35 = vld [vmem:[#allocation5 + $0x1008] ss:$12 sps:$4 sm:$0xff]  }
 0x82c   :  { %v4721_v17 = vpack.c.bf16 %v4718_v14, %v4715_v13  ;;  %v8348_v8 = vld [vmem:[#allocation5 + $0x100c] ss:$12 sps:$4 sm:$0xff]   ;;  %v8349_v9 = vld [vmem:[#allocation5 + $0x1010] ss:$12 sps:$4 sm:$0xff]   ;;  %v8354_v39 = vld [vmem:[#allocation5 + $0x1028] ss:$12 sps:$4 sm:$0xff]  }
 0x82d   :  { %v8350_v10 = vld [vmem:[#allocation5 + $0xf50] ss:$12 sps:$4 sm:$0xff]   ;;  %v8351_v49 = vld [vmem:[#allocation5 + $0x1020] ss:$12 sps:$4 sm:$0xff]   ;;  %v8355_v11 = vld [vmem:[#allocation5 + $0xf68] ss:$12 sps:$4 sm:$0xff]  }
 0x82e   :  { %5177 = vmatprep.mubr.bf16.mxu1 %v4721_v17  ;;  %5263 = vmatprep.mubr.bf16.mxu0 %v4721_v17  ;;  %v8353_v37 = vld [vmem:[#allocation5 + $0x1024] ss:$12 sps:$4 sm:$0xff]   ;;  %v8358_v12 = vld [vmem:[#allocation5 + $0x103c] ss:$12 sps:$4 sm:$0xff]   ;;  %v8359_v13 = vld [vmem:[#allocation5 + $0x1040] ss:$12 sps:$4 sm:$0xff]  }
 0x82f   :  { %5178 = vmatmul.mubr.bf16.vlgmr.msra.gmra.mrb[48].mxu1 %v4720_v15  ;;  %5264 = vmatmul.mubr.bf16.vlgmr.msra.gmra.mrb[44].mxu0 %v4720_v15  ;;  %v8356_v14 = vld [vmem:[#allocation5 + $0x1038] ss:$12 sps:$4 sm:$0xff]   ;;  %v8360_v15 = vld [vmem:[#allocation5 + $0xf80] ss:$12 sps:$4 sm:$0xff]  }
 0x830   :  { %5189 = vmatpush1.bf16.msra.mxu1 %v8291_v18  ;;  %7463 = vmatpush3.bf16.msra.mxu0 %v8294_v20  ;;  %v8364_v17 = vld [vmem:[#allocation5 + $0x1058] ss:$12 sps:$4 sm:$0xff]   ;;  %v8361_v18 = vld [vmem:[#allocation5 + $0x1050] ss:$12 sps:$4 sm:$0xff]  }
 0x831   :  { %5190 = vmatprep.subr.bf16.mxu1 %v8297_v24  ;;  %7464 = vmatprep.subr.bf16.mxu0 %v8616_v32  ;;  %v8365_v20 = vld [vmem:[#allocation5 + $0xf98] ss:$12 sps:$4 sm:$0xff]  }
 0x832   :  { %5220 = vmatprep.mubr.bf16.mxu1 %v8615_v1  ;;  %7470 = vmatprep.mubr.msk.bf16.mxu0 %vm8617_vm2, %v8616_v32  ;;  %v8368_v24 = vld [vmem:[#allocation5 + $0x106c] ss:$12 sps:$4 sm:$0xff]  }
 0x834   :  { %5191 = vmatpush1.bf16.msra.mxu1 %v8295_v25  ;;  %7465 = vmatpush3.bf16.msra.mxu0 %v8298_v26  ;;  %v8369_v25 = vld [vmem:[#allocation5 + $0x1070] ss:$12 sps:$4 sm:$0xff]   ;;  %v8366_v26 = vld [vmem:[#allocation5 + $0x1068] ss:$12 sps:$4 sm:$0xff]  }
 0x835   :  { %5192 = vmatprep.subr.bf16.mxu1 %v8301_v27  ;;  %7466 = vmatprep.subr.bf16.mxu0 %v8616_v32  ;;  %v8370_v27 = vld [vmem:[#allocation5 + $0xfb0] ss:$12 sps:$4 sm:$0xff]  }
 0x838   :  { %5193 = vmatpush1.bf16.msra.mxu1 %v8299_v61  ;;  %7467 = vmatpush3.bf16.msra.mxu0 %v8302_v28  ;;  %v8373_v61 = vld [vmem:[#allocation5 + $0x1084] ss:$12 sps:$4 sm:$0xff]  }
 0x839   :  { %5194 = vmatprep.subr.bf16.mxu1 %v8305_v29  ;;  %7468 = vmatprep.subr.bf16.mxu0 %v8616_v32 }
 0x83c   :  { %5195 = vmatpush1.bf16.msra.mxu1 %v8303_v30  ;;  %7469 = vmatpush3.bf16.msra.mxu0 %v8306_v55 }
 0x83d   :  { %5744 = vmatprep.subr.bf16.mxu0 %v8309_v3  ;;  %7315 = vmatprep.subr.bf16.mxu1 %v8334_v33 }
 0x83f   :  { %6997 = vmatmul.mubr.msk.bf16.vlgmr.msra.gmra.mrb[48].mxu1 %vm936_vm3, %v4722_v16  ;;  %7471 = vmatmul.mubr.msk.bf16.vlgmr.msra.gmra.mrb[48].mxu0 %vm936_vm3, %v4722_v16  ;;  %v8363_v16 = vld [vmem:[#allocation5 + $0x1054] ss:$12 sps:$4 sm:$0xff]  }
 0x840   :  { %5745 = vmatpush1.bf16.msra.mxu0 %v8307_v31  ;;  %7316 = vmatpush3.bf16.msra.mxu1 %v8335_v34  ;;  %v4805_v31 = vld [vmem:[#allocation7 + $0x15] sm:$0x7] }
 0x841   :  { %5746 = vmatprep.subr.bf16.mxu0 %v8312_v36  ;;  %7317 = vmatprep.subr.bf16.mxu1 %v8339_v40  ;;  %v4818_v34 = vrot.slane %v4805_v31, %v8856_v62  ;;  %v4810_v36 = vrot.slane %v4805_v31, %v8858_v0  ;;  %v4814_v40 = vrot.slane %v4805_v31, %v8860_v2  ;;  %v8401_v31 = vld [vmem:[%s9111_s4 + $0x90] sm:$0xff]  }
 0x844   :  { %5747 = vmatpush1.bf16.msra.mxu0 %v8310_v42  ;;  %7318 = vmatpush3.bf16.msra.mxu1 %v8340_v43 }
 0x845   :  { %5748 = vmatprep.subr.bf16.mxu0 %v8315_v44  ;;  %7319 = vmatprep.subr.bf16.mxu1 %v8344_v5 }
 0x848   :  { %5749 = vmatpush1.bf16.msra.mxu0 %v8313_v46  ;;  %7320 = vmatpush3.bf16.msra.mxu1 %v8345_v7 }
 0x849   :  { %5750 = vmatprep.subr.bf16.mxu0 %v8318_v47  ;;  %7321 = vmatprep.subr.bf16.mxu1 %v8349_v9 }
 0x84c   :  { %5751 = vmatpush1.bf16.msra.mxu0 %v8316_v4  ;;  %7322 = vmatpush3.bf16.msra.mxu1 %v8350_v10  ;;  %v8371_v10 = vld [vmem:[#allocation5 + $0x1080] ss:$12 sps:$4 sm:$0xff]  }
 0x84d   :  { %5752 = vmatprep.subr.bf16.mxu0 %v8321_v48  ;;  %7323 = vmatprep.subr.bf16.mxu1 %v8354_v39  ;;  %v8377_v39 = vld [vmem:[#allocation5 + $0x109c] ss:$12 sps:$4 sm:$0xff]  }
 0x850   :  { %5753 = vmatpush1.bf16.msra.mxu0 %v8319_v50  ;;  %7324 = vmatpush3.bf16.msra.mxu1 %v8355_v11  ;;  %v8378_v11 = vld [vmem:[#allocation5 + $0x10a0] ss:$12 sps:$4 sm:$0xff]  }
 0x851   :  { %5754 = vmatprep.subr.bf16.mxu0 %v8324_v51  ;;  %7325 = vmatprep.subr.bf16.mxu1 %v8359_v13  ;;  %v8379_v13 = vld [vmem:[#allocation5 + $0x10b0] ss:$12 sps:$4 sm:$0xff]  }
 0x854   :  { %5755 = vmatpush1.bf16.msra.mxu0 %v8322_v56  ;;  %7326 = vmatpush3.bf16.msra.mxu1 %v8360_v15  ;;  %v8385_v15 = vld [vmem:[#allocation5 + $0x10cc] ss:$12 sps:$4 sm:$0xff]  }
 0x855   :  { %5756 = vmatprep.subr.bf16.mxu0 %v8327_v52  ;;  %7327 = vmatprep.subr.bf16.mxu1 %v8364_v17  ;;  %v8386_v17 = vld [vmem:[#allocation5 + $0x10d0] ss:$12 sps:$4 sm:$0xff]  }
 0x858   :  { %5757 = vmatpush1.bf16.msra.mxu0 %v8325_v53  ;;  %7328 = vmatpush3.bf16.msra.mxu1 %v8365_v20  ;;  %v8389_v20 = vld [vmem:[%s9111_s4 + $0x48] sm:$0xff]  }
 0x859   :  { %5758 = vmatprep.subr.bf16.mxu0 %v8330_v54  ;;  %7329 = vmatprep.subr.bf16.mxu1 %v8369_v25  ;;  %v8391_v25 = vld [vmem:[%s9111_s4 + $0x50] sm:$0xff]  }
 0x85c   :  { %5759 = vmatpush1.bf16.msra.mxu0 %v8328_v57  ;;  %7330 = vmatpush3.bf16.msra.mxu1 %v8370_v27  ;;  %v8393_v27 = vld [vmem:[%s9111_s4 + $0x58] sm:$0xff]  }
 0x85d   :  { %5760 = vmatprep.subr.bf16.mxu0 %v8333_v58  ;;  %7474 = vmatprep.subr.bf16.mxu1 %v8616_v32 }
 0x860   :  { %5761 = vmatpush1.bf16.msra.mxu0 %v8331_v59 }
 0x861   :  { %5762 = vmatprep.subr.bf16.mxu0 %v8338_v60 }
 0x864   :  { %5763 = vmatpush1.bf16.msra.mxu0 %v8336_v63 }
 0x865   :  { %5764 = vmatprep.subr.bf16.mxu0 %v8343_v45 }
 0x868   :  { %5765 = vmatpush1.bf16.msra.mxu0 %v8341_v6 }
 0x869   :  { %5766 = vmatprep.subr.bf16.mxu0 %v8348_v8 }
 0x86c   :  { %5767 = vmatpush1.bf16.msra.mxu0 %v8346_v35 }
 0x86d   :  { %5768 = vmatprep.subr.bf16.mxu0 %v8353_v37  ;;  %v8374_v37 = vld [vmem:[#allocation5 + $0x1088] ss:$12 sps:$4 sm:$0xff]  }
 0x870   :  { %5769 = vmatpush1.bf16.msra.mxu0 %v8351_v49  ;;  %v8375_v49 = vld [vmem:[#allocation5 + $0x1098] ss:$12 sps:$4 sm:$0xff]  }
 0x871   :  { %5770 = vmatprep.subr.bf16.mxu0 %v8358_v12  ;;  %v8381_v12 = vld [vmem:[#allocation5 + $0x10b4] ss:$12 sps:$4 sm:$0xff]  }
 0x874   :  { %5771 = vmatpush1.bf16.msra.mxu0 %v8356_v14  ;;  %v8382_v14 = vld [vmem:[#allocation5 + $0x10b8] ss:$12 sps:$4 sm:$0xff]  }
 0x875   :  { %5772 = vmatprep.subr.bf16.mxu0 %v8363_v16  ;;  %v8383_v16 = vld [vmem:[#allocation5 + $0x10c8] ss:$12 sps:$4 sm:$0xff]  }
 0x878   :  { %5773 = vmatpush1.bf16.msra.mxu0 %v8361_v18  ;;  %v8388_v18 = vld [vmem:[%s9111_s4] sm:$0xff]  }
 0x879   :  { %5774 = vmatprep.subr.bf16.mxu0 %v8368_v24  ;;  %v8390_v24 = vld [vmem:[%s9111_s4 + $0x8] sm:$0xff]  }
 0x87c   :  { %5775 = vmatpush1.bf16.msra.mxu0 %v8366_v26  ;;  %v8392_v26 = vld [vmem:[%s9111_s4 + $0x10] sm:$0xff]  }
 0x87d   :  { %5787 = vmatprep.subr.bf16.mxu0 %v8373_v61  ;;  %v8395_v61 = vld [vmem:[%s9111_s4 + $0x80] sm:$0xff]  }
 0x902   :  { %v7304_v28 = vpop.f32.mrb[44].mxu0 }
 0x903   :  { %v7305_v29 = vpop.f32.mrb[45].mxu0 }
 0x904   :  { %v7306_v30 = vadd.f32 %v7305_v29, %v7304_v28  ;;  %v7307_v55 = vpop.f32.mrb[46].mxu0  ;;  %v8394_v28 = vld [vmem:[%s9111_s4 + $0x18] sm:$0xff]   ;;  %v8396_v29 = vld [vmem:[%s9111_s4 + $0x60] sm:$0xff]  }
 0x905   :  { %v7308_v3 = vpop.f32.mrb[47].mxu0 }
 0x906   :  { %v7309_v33 = vadd.f32 %v7308_v3, %v7307_v55  ;;  %v5266_v42 = vadd.f32 %v7306_v30, %v4818_v34  ;;  %v8397_v30 = vld [vmem:[%s9111_s4 + $0x20] sm:$0xff]   ;;  %v8398_v55 = vld [vmem:[%s9111_s4 + $0x88] sm:$0xff]  }
 0x907   :  { %v8399_v3 = vld [vmem:[%s9111_s4 + $0x68] sm:$0xff]  }
 0x908   :  { %v5269_v50 = vadd.f32 %v7309_v33, %v4818_v34  ;;  %v8400_v33 = vld [vmem:[%s9111_s4 + $0x28] sm:$0xff]   ;;  %v8402_v34 = vld [vmem:[%s9111_s4 + $0x70] sm:$0xff]  }
 0x912   :  { %v5222_v43 = vpop.f32.mrb[48].mxu1  ;;  %v5306_v44 = vpop.f32.mrb[48].mxu0 }
 0x913   :  { %v7550_v46 = vadd.f32 %v5222_v43, %v4810_v36  ;;  %v5307_v47 = vadd.f32 %v5306_v44, %v5266_v42  ;;  %v5224_v4 = vpop.f32.mrb[49].mxu1  ;;  %v7472_v48 = vpop.f32.mrb[49].mxu0  ;;  %v8405_v42 = vld [vmem:[%s9111_s4 + $0x78] sm:$0xff]  }
 0x914   :  { %v7551_v51 = vadd.f32 %v5224_v4, %v4814_v40  ;;  %v5226_v56 = vpop.f32.mrb[50].mxu1  ;;  %v5309_v52 = vpop.f32.mrb[50].mxu0  ;;  %v8406_v43 = vld [vmem:[%s9111_s4 + $0x38] sm:$0xff]  }
 0x915   :  { %v7552_v53 = vadd.f32 %v5226_v56, %v4810_v36  ;;  %v5310_v54 = vadd.f32 %v5309_v52, %v5269_v50  ;;  %v5228_v57 = vpop.f32.mrb[51].mxu1  ;;  %v7473_v58 = vpop.f32.mrb[51].mxu0  ;;  %v5313_v60 = vmax.f32 %v7550_v46, 0.0  ;;  %v5315_v63 = vmax.f32 %v5307_v47, 0.0  ;;  %v8403_v36 = vld [vmem:[%s9111_s4 + $0x30] sm:$0xff]  }
 0x916   :  { %v7553_v59 = vadd.f32 %v5228_v57, %v4814_v40  ;;  %v5314_v6 = vmax.f32 %v7551_v51, 0.0  ;;  %v8404_v40 = vld [vmem:[%s9111_s4 + $0x98] sm:$0xff]   ;;  %v5404_v51 = vld [vmem:[#allocation7 + $0x18] sm:$0x7] }
 0x917   :  { %v5316_v45 = vmax.f32 %v7552_v53, 0.0  ;;  %v5318_v5 = vmax.f32 %v5310_v54, 0.0  ;;  %v5417_v56 = vrot.slane %v5404_v51, %v8856_v62  ;;  %v5409_v52 = vrot.slane %v5404_v51, %v8858_v0 }
 0x918   :  { %v5317_v7 = vmax.f32 %v7553_v59, 0.0  ;;  %v5413_v53 = vrot.slane %v5404_v51, %v8860_v2  ;;  %v7083_v51 = vld [vmem:[#allocation13] ss:$0 sm:$0xff] }
 0x919   :  { %v5319_v35 = vpack.c.bf16 %v5316_v45, %v5313_v60  ;;  %v5321_v8 = vpack.c.bf16 %v5318_v5, %v5315_v63 }
 0x91a   :  { %v5320_v9 = vpack.c.bf16 %v5317_v7, %v5314_v6 }
 0x91c   :  { %5776 = vmatprep.mubr.bf16.mxu0 %v5320_v9  ;;  %5862 = vmatprep.mubr.bf16.mxu1 %v5320_v9 }
 0x91d   :  { %5777 = vmatmul.mubr.bf16.vlgmr.msra.gmra.mrb[52].mxu0 %v5319_v35  ;;  %5863 = vmatmul.mubr.bf16.vlgmr.msra.gmra.mrb[52].mxu1 %v5319_v35 }
 0x91e   :  { %5788 = vmatpush1.bf16.msra.mxu0 %v8371_v10  ;;  %7475 = vmatpush3.bf16.msra.mxu1 %v8374_v37 }
 0x91f   :  { %5789 = vmatprep.subr.bf16.mxu0 %v8377_v39  ;;  %7476 = vmatprep.subr.bf16.mxu1 %v8616_v32 }
 0x920   :  { %5819 = vmatprep.mubr.bf16.mxu0 %v8615_v1  ;;  %7482 = vmatprep.mubr.msk.bf16.mxu1 %vm8617_vm2, %v8616_v32  ;;  %v8387_v1 = vld [vmem:[%s9111_s4 + $0x40] sm:$0xff]  }
 0x922   :  { %5790 = vmatpush1.bf16.msra.mxu0 %v8375_v49  ;;  %7477 = vmatpush3.bf16.msra.mxu1 %v8378_v11 }
 0x923   :  { %5791 = vmatprep.subr.bf16.mxu0 %v8381_v12  ;;  %7478 = vmatprep.subr.bf16.mxu1 %v8616_v32 }
 0x926   :  { %5792 = vmatpush1.bf16.msra.mxu0 %v8379_v13  ;;  %7479 = vmatpush3.bf16.msra.mxu1 %v8382_v14 }
 0x927   :  { %5793 = vmatprep.subr.bf16.mxu0 %v8385_v15  ;;  %7480 = vmatprep.subr.bf16.mxu1 %v8616_v32 }
 0x92a   :  { %5794 = vmatpush1.bf16.msra.mxu0 %v8383_v16  ;;  %7481 = vmatpush3.bf16.msra.mxu1 %v8386_v17 }
 0x92b   :  { %7342 = vmatprep.subr.bf16.mxu1 %v8387_v1  ;;  %7486 = vmatprep.subr.bf16.mxu0 %v8616_v32 }
 0x92d   :  { %7059 = vmatmul.mubr.msk.bf16.vlgmr.msra.gmra.mrb[52].mxu0 %vm936_vm3, %v5321_v8  ;;  %7483 = vmatmul.mubr.msk.bf16.vlgmr.msra.gmra.mrb[56].mxu1 %vm936_vm3, %v5321_v8 }
 0x92e   :  { %7343 = vmatpush3.bf16.msra.mxu1 %v8388_v18  ;;  %7494 = vmatprep.mubr.msk.bf16.mxu0 %vm8617_vm2, %v8616_v32 }
 0x92f   :  { %7344 = vmatprep.subr.bf16.mxu1 %v8389_v20  ;;  %7487 = vmatpush3.bf16.msra.mxu0 %v8395_v61 }
 0x930   :  { %7488 = vmatprep.subr.bf16.mxu0 %v8616_v32 }
 0x932   :  { %7345 = vmatpush3.bf16.msra.mxu1 %v8390_v24 }
 0x933   :  { %7346 = vmatprep.subr.bf16.mxu1 %v8391_v25  ;;  %7489 = vmatpush3.bf16.msra.mxu0 %v8398_v55  ;;  %v7061_v25 = vld [vmem:[#allocation8] ss:$0 sm:$0xff] }
 0x934   :  { %7490 = vmatprep.subr.bf16.mxu0 %v8616_v32 }
 0x936   :  { %7347 = vmatpush3.bf16.msra.mxu1 %v8392_v26 }
 0x937   :  { %7348 = vmatprep.subr.bf16.mxu1 %v8393_v27  ;;  %7491 = vmatpush3.bf16.msra.mxu0 %v8401_v31 }
 0x938   :  { %7492 = vmatprep.subr.bf16.mxu0 %v8616_v32 }
 0x93a   :  { %7349 = vmatpush3.bf16.msra.mxu1 %v8394_v28 }
 0x93b   :  { %7350 = vmatprep.subr.bf16.mxu1 %v8396_v29  ;;  %7493 = vmatpush3.bf16.msra.mxu0 %v8404_v40 }
 0x93c   :  { %7514 = vmatprep.subr.bf16.mxu0 %v8616_v32 }
 0x93e   :  { %7351 = vmatpush3.bf16.msra.mxu1 %v8397_v30 }
 0x93f   :  { %7352 = vmatprep.subr.bf16.mxu1 %v8399_v3 }
 0x942   :  { %7353 = vmatpush3.bf16.msra.mxu1 %v8400_v33 }
 0x943   :  { %7354 = vmatprep.subr.bf16.mxu1 %v8402_v34 }
 0x946   :  { %7355 = vmatpush3.bf16.msra.mxu1 %v8403_v36 }
 0x947   :  { %7356 = vmatprep.subr.bf16.mxu1 %v8405_v42 }
 0x94a   :  { %7357 = vmatpush3.bf16.msra.mxu1 %v8406_v43 }
 0x94b   :  { %7498 = vmatprep.subr.bf16.mxu1 %v8616_v32 }
 0x9f0   :  { %v7331_v44 = vpop.f32.mrb[52].mxu1 }
 0x9f1   :  { %v7332_v46 = vpop.f32.mrb[53].mxu1 }
 0x9f2   :  { %v7333_v47 = vadd.f32 %v7332_v46, %v7331_v44  ;;  %v7334_v4 = vpop.f32.mrb[54].mxu1 }
 0x9f3   :  { %v7335_v48 = vpop.f32.mrb[55].mxu1 }
 0x9f4   :  { %v7336_v50 = vadd.f32 %v7335_v48, %v7334_v4  ;;  %v5865_v54 = vadd.f32 %v7333_v47, %v5417_v56 }
 0x9f6   :  { %v5868_v5 = vadd.f32 %v7336_v50, %v5417_v56 }
 0xa00   :  { %v5821_v57 = vpop.f32.mrb[52].mxu0  ;;  %v5905_v58 = vpop.f32.mrb[56].mxu1 }
 0xa01   :  { %v7554_v59 = vadd.f32 %v5821_v57, %v5409_v52  ;;  %v5906_v60 = vadd.f32 %v5905_v58, %v5865_v54  ;;  %v5823_v63 = vpop.f32.mrb[53].mxu0  ;;  %v7484_v45 = vpop.f32.mrb[57].mxu1 }
 0xa02   :  { %v7555_v6 = vadd.f32 %v5823_v63, %v5413_v53  ;;  %v5825_v7 = vpop.f32.mrb[54].mxu0  ;;  %v5908_v35 = vpop.f32.mrb[58].mxu1 }
 0xa03   :  { %v5912_v8 = vadd.f32 %v7554_v59, %v8953_v21  ;;  %v5914_v9 = vadd.f32 %v5906_v60, %v8974_v41  ;;  %v7556_v62 = vadd.f32 %v5825_v7, %v5409_v52  ;;  %v5909_v10 = vadd.f32 %v5908_v35, %v5868_v5  ;;  %v5827_v0 = vpop.f32.mrb[55].mxu0  ;;  %v7485_v37 = vpop.f32.mrb[59].mxu1 }
 0xa04   :  { %v5913_v2 = vadd.f32 %v7555_v6, %v8950_v19  ;;  %v7557_v39 = vadd.f32 %v5827_v0, %v5413_v53  ;;  %v8407_v19 = vld [vmem:[#allocation10] sm:$0xff]   ;;  %v8410_v0 = vld [vmem:[#allocation11 + $0x8] sm:$0xff]  }
 0xa05   :  { %v5915_v49 = vadd.f32 %v7556_v62, %v8956_v22  ;;  %v5917_v11 = vadd.f32 %v5909_v10, %v8970_v38  ;;  %v5918_v13 = vmax.f32 %v5912_v8, 0.0  ;;  %v5920_v14 = vmax.f32 %v5914_v9, 0.0  ;;  %v8408_v22 = vld [vmem:[#allocation10 + $0x8] sm:$0xff]   ;;  %v7084_v53 = vld [vmem:[#allocation14] ss:$0 sm:$0xff]  ;;  %v8409_v10 = vld [vmem:[#allocation11] sm:$0xff]  }
 0xa06   :  { %v5916_v12 = vadd.f32 %v7557_v39, %v8959_v23  ;;  %v5919_v21 = vmax.f32 %v5913_v2, 0.0  ;;  %v7088_v37 = vld [vmem:[#allocation13 + $0x1] ss:$0 sm:$0xff]  ;;  %v7089_v39 = vld [vmem:[#allocation14 + $0x1] ss:$0 sm:$0xff] }
 0xa07   :  { %v5921_v15 = vmax.f32 %v5915_v49, 0.0  ;;  %v5923_v16 = vmax.f32 %v5917_v11, 0.0 }
 0xa08   :  { %v5922_v17 = vmax.f32 %v5916_v12, 0.0 }
 0xa09   :  { %v5924_v41 = vpack.c.bf16 %v5921_v15, %v5918_v13  ;;  %v5926_v1 = vpack.c.bf16 %v5923_v16, %v5920_v14 }
 0xa0a   :  { %v5925_v18 = vpack.c.bf16 %v5922_v17, %v5919_v21  ;;  %v8411_v21 = vld [vmem:[%s9115_s8] sm:$0xff]   ;;  %v8412_v17 = vld [vmem:[%s9115_s8 + $0x8] sm:$0xff]  }
 0xa0b   :  { %7495 = vmatmul.mubr.msk.bf16.vlgmr.msra.gmra.mrb[56].mxu0 %vm936_vm3, %v5926_v1 }
 0xa0c   :  { %6129 = vmatprep.mubr.bf16.mxu1 %v5925_v18  ;;  %7518 = vmatprep.mubr.msk.bf16.mxu0 %vm8617_vm2, %v8616_v32  ;;  %v7094_v18 = vld [vmem:[#allocation14 + $0x2] ss:$0 sm:$0xff] }
 0xa0d   :  { %6130 = vmatmul.mubr.bf16.vlgmr.msra.gmra.mrb[60].mxu1 %v5924_v41  ;;  %7515 = vmatpush3.bf16.msra.mxu0 %v8411_v21  ;;  %v7093_v41 = vld [vmem:[#allocation13 + $0x2] ss:$0 sm:$0xff] }
 0xa0e   :  { %7502 = vmatprep.mubr.msk.bf16.mxu1 %vm8617_vm2, %v8616_v32  ;;  %7499 = vmatpush3.bf16.msra.mxu1 %v8407_v19 }
 0xa0f   :  { %7500 = vmatprep.subr.bf16.mxu1 %v8616_v32  ;;  %7516 = vmatprep.subr.bf16.mxu0 %v8616_v32 }
 0xa11   :  { %7517 = vmatpush3.bf16.msra.mxu0 %v8412_v17 }
 0xa12   :  { %7501 = vmatpush3.bf16.msra.mxu1 %v8408_v22 }
 0xa13   :  { %7506 = vmatprep.subr.bf16.mxu1 %v8616_v32 }
 0xade   :  { %v6172_v23 = vpop.f32.mrb[56].mxu0 }
 0xadf   :  { %v7496_v38 = vpop.f32.mrb[57].mxu0 }
 0xae0   :  { %v7358_v20 = vpop.f32.mrb[60].mxu1  ;;  %v6175_v24 = vpop.f32.mrb[58].mxu0 }
 0xae1   :  { %v7359_v26 = vpop.f32.mrb[61].mxu1  ;;  %v7497_v27 = vpop.f32.mrb[59].mxu0 }
 0xae2   :  { %v7360_v61 = vadd.f32 %v7359_v26, %v7358_v20  ;;  %v7361_v28 = vpop.f32.mrb[62].mxu1  ;;  %v7095_v26 = vld [vmem:[#allocation2] ss:$0 sm:$0xff] }
 0xae3   :  { %v7362_v29 = vpop.f32.mrb[63].mxu1 }
 0xae4   :  { %v6132_v30 = vadd.f32 %v7360_v61, %v7061_v25  ;;  %v7363_v55 = vadd.f32 %v7362_v29, %v7361_v28 }
 0xae6   :  { %v6173_v3 = vadd.f32 %v6172_v23, %v6132_v30  ;;  %v6135_v33 = vadd.f32 %v7363_v55, %v7061_v25 }
 0xae8   :  { %v6176_v31 = vadd.f32 %v6175_v24, %v6135_v33  ;;  %v6180_v34 = vsel %vm6179_vm4, %v6173_v3, 0.0 }
 0xae9   :  { %v6181_v36 = vrot.slane %v6180_v34, 4 }
 0xaea   :  { %v6187_v40 = vsel %vm6179_vm4, %v6176_v31, 0.0 }
 0xaeb   :  { %v6182_v42 = vadd.f32 %v6181_v36, %v6180_v34  ;;  %v6188_v43 = vrot.slane %v6187_v40, 4 }
 0xaed   :  { %v6183_v44 = vrot.slane %v6182_v42, 2  ;;  %v6189_v46 = vadd.f32 %v6188_v43, %v6187_v40 }
 0xaef   :  { %v6184_v47 = vadd.f32 %v6183_v44, %v6182_v42  ;;  %v6190_v4 = vrot.slane %v6189_v46, 2 }
 0xaf1   :  { %v6185_v48 = vrot.slane %v6184_v47, 1  ;;  %v6191_v50 = vadd.f32 %v6190_v4, %v6189_v46 }
 0xaf3   :  { %v6186_v56 = vadd.f32 %v6185_v48, %v6184_v47  ;;  %v6192_v52 = vrot.slane %v6191_v50, 1 }
 0xaf5   :  { %v6193_v54 = vadd.f32 %v6192_v52, %v6191_v50  ;;  %v6201_v57 = vmul.f32 %v7083_v51, %v6186_v56 }
 0xaf7   :  { %v6202_v58 = vmul.f32 %v7083_v51, %v6193_v54  ;;  %v6210_v59 = vadd.f32 %v7084_v53, %v6201_v57 }
 0xaf9   :  { %v6211_v60 = vadd.f32 %v7084_v53, %v6202_v58  ;;  %v6212_v63 = vmax.f32 %v6210_v59, 0.0 }
 0xafb   :  { %v6213_v45 = vmax.f32 %v6211_v60, 0.0  ;;  %v6214_v5 = vpack.c.bf16 %v6212_v63, %v6212_v63 }
 0xafd   :  { %v6215_v6 = vpack.c.bf16 %v6213_v45, %v6213_v45  ;;  %v6222_v35 = vunpack.c.l.b16 %v6214_v5 }
 0xaff   :  { %v6223_v7 = vunpack.c.l.b16 %v6215_v6 }
 0xb01   :  { %v6224_v8 = vrot.slane %v6223_v7, 7 }
 0xb03   :  { %v6226_v9 = vsel %vm6225_vm5, %v6224_v8, %v6222_v35 }
 0xb04   :  { %v6227_v62 = vpack.c.b16 %v6226_v9, %v6226_v9 }
 0xb06   :  { %7503 = vmatmul.mubr.msk.bf16.vlgmr.msra.gmra.mrb[64].mxu1 %vm6179_vm4, %v6227_v62 }
 0xb07   :  { %7510 = vmatprep.mubr.msk.bf16.mxu1 %vm8617_vm2, %v8616_v32  ;;  %7507 = vmatpush3.bf16.msra.mxu1 %v8409_v10 }
 0xb08   :  { %7508 = vmatprep.subr.bf16.mxu1 %v8616_v32 }
 0xb0b   :  { %7509 = vmatpush3.bf16.msra.mxu1 %v8410_v0 }
 0xbd9   :  { %v6277_v2 = vpop.f32.mrb[64].mxu1 }
 0xbda   :  { %v6291_v49 = vmul.f32 %v7088_v37, %v6277_v2  ;;  %v7504_v11 = vpop.f32.mrb[65].mxu1 }
 0xbdb   :  { %v6280_v12 = vpop.f32.mrb[66].mxu1 }
 0xbdc   :  { %v6300_v13 = vadd.f32 %v7089_v39, %v6291_v49  ;;  %v7505_v14 = vpop.f32.mrb[67].mxu1 }
 0xbde   :  { %v6301_v15 = vmax.f32 %v6300_v13, 0.0 }
 0xbe0   :  { %v6302_v16 = vpack.c.bf16 %v6301_v15, %v6301_v15 }
 0xbe2   :  { %7511 = vmatmul.mubr.msk.bf16.vlgmr.msra.gmra.mrb[68].mxu1 %vm6179_vm4, %v6302_v16 }
 0xcb5   :  { %v6356_v1 = vpop.f32.mrb[68].mxu1 }
 0xcb6   :  { %v6370_v19 = vmul.f32 %v7093_v41, %v6356_v1  ;;  %v7512_v22 = vpop.f32.mrb[69].mxu1 }
 0xcb7   :  { %v6359_v23 = vpop.f32.mrb[70].mxu1 }
 0xcb8   :  { %v6379_v38 = vadd.f32 %v7094_v18, %v6370_v19  ;;  %v7513_v20 = vpop.f32.mrb[71].mxu1 }
 0xcba   :  { %v6380_v24 = vmax.f32 %v6379_v38, 0.0 }
 0xcbc   :  { %v6381_v25 = vpack.c.bf16 %v6380_v24, %v6380_v24 }
 0xcbe   :  { %7519 = vmatmul.mubr.msk.bf16.vlgmr.msra.gmra.mrb[60].mxu0 %vm6179_vm4, %v6381_v25 }
 0xd91   :  { %v6442_v27 = vpop.f32.mrb[60].mxu0 }
 0xd92   :  { %v6443_v32 = vadd.f32 %v7095_v26, %v6442_v27  ;;  %v7520_v61 = vpop.f32.mrb[61].mxu0 }
 0xd93   :  { %v6445_v28 = vpop.f32.mrb[62].mxu0 }
 0xd94   :  { %6449 = vst.msk [vmem:[%s9119_s12] sm:$0x3] %vm6448_vm6, %v6443_v32  ;;  %v7521_v29 = vpop.f32.mrb[63].mxu0 }
 0xd95   :  { %6454 = vsyncpa [#allocation4], 1 }
 0xd96   :  { %6455 = vsyncpa [#allocation6], 1 }
 0xd97   :  { %6456 = vsyncpa [#allocation9], 1 }
 0xd98   :  { %6457 = vsyncpa [#allocation12], 1 }
 0xd99   :  { %6458 = vsyncpa [#allocation15], 1 }

</bundles_post_ra>
